<compile_context>
chip_gen: v7x
topology: tpu7x:2x2x1
jax: 0.10.0
libtpu: 0.0.40
codegen_flags: <defaults>
</compile_context>

<pallas_src>
import math

import jax
import jax.numpy as jnp
from jax import lax
from jax.experimental import pallas as pl
from jax.experimental.pallas import tpu as pltpu  # noqa: F401  (TPU backend)

# ---------------- small synthetic config ----------------
BATCH = 2
IN_CH = 4
IMG = 16
PATCH = 4
HIDDEN = 32
NUM_HEADS = 4
HEAD = HIDDEN // NUM_HEADS
MLP_DIM = 64
NUM_LAYERS = 2
NUM_CLASSES = 10
N_PATCHES = (IMG // PATCH) ** 2          # 16
SEQ = N_PATCHES + 1                      # 17 real tokens (cls + patches)
S_PAD = ((SEQ + 7) // 8) * 8             # 24: sublane-aligned padded sequence
PATCH_K = IN_CH * PATCH * PATCH          # 64
EPS = 1e-6


# ---------------- in-kernel helpers ----------------
def _erf(x):
    # Abramowitz & Stegun 7.1.26 rational approximation, |err| <= 1.5e-7
    # (exact within float32).  Kept instead of lax.erf to guarantee Mosaic
    # lowering; matches torch.nn.functional.gelu (exact erf GELU) in f32.
    a1, a2, a3, a4, a5 = 0.254829592, -0.284496736, 1.421413741, -1.453152027, 1.061405429
    p = 0.3275911
    sgn = jnp.where(x >= 0.0, 1.0, -1.0)
    ax = jnp.abs(x)
    t = 1.0 / (1.0 + p * ax)
    poly = t * (a1 + t * (a2 + t * (a3 + t * (a4 + t * a5))))
    return sgn * (1.0 - poly * jnp.exp(-ax * ax))


def _gelu(x):
    return 0.5 * x * (1.0 + _erf(x * (1.0 / math.sqrt(2.0))))


def _layernorm(x, g, b):
    mean = jnp.mean(x, axis=-1, keepdims=True)
    var = jnp.mean(jnp.square(x - mean), axis=-1, keepdims=True)
    return (x - mean) * lax.rsqrt(var + EPS) * g + b


# ---------------- fully fused ViT kernel ----------------
def _vit_kernel(patches_ref, base_ref, w2d_ref,
                ln1g_ref, ln1b_ref, wqkv_ref, bqkv_ref, wo_ref, bo_ref,
                ln2g_ref, ln2b_ref, w1_ref, b1_ref, w2_ref, b2_ref,
                encg_ref, encb_ref, headw_ref, headb_ref,
                out_ref):
    # ---- fused patch embedding: one (B*S_PAD, K) @ (K, D) matmul ----
    # `base` already contains cls_token + position embeddings + conv bias on
    # the right rows (and exact zeros on the padded rows / cls patch-row).
    x = jnp.dot(patches_ref[...], w2d_ref[...],
                preferred_element_type=jnp.float32) + base_ref[...]       # (B*S_PAD, D)

    scale = 1.0 / math.sqrt(HEAD)
    # additive key-padding mask: 0 for the SEQ real keys, -1e30 for padding.
    col = lax.broadcasted_iota(jnp.int32, (S_PAD, S_PAD), 1)
    key_bias = jnp.where(col < SEQ, 0.0, -1e30)

    for l in range(NUM_LAYERS):                         # static unroll (L=2)
        # ---------------- multi-head self-attention ----------------
        xn = _layernorm(x, ln1g_ref[l], ln1b_ref[l])
        qkv = jnp.dot(xn, wqkv_ref[l],
                      preferred_element_type=jnp.float32) + bqkv_ref[l]   # (BS, 3D)
        wo = wo_ref[l]                                                    # (D, D)
        attn_parts = []
        for b in range(BATCH):                          # static unroll (B=2)
            rows = slice(b * S_PAD, (b + 1) * S_PAD)
            qb = qkv[rows, 0:HIDDEN]
            kb = qkv[rows, HIDDEN:2 * HIDDEN]
            vb = qkv[rows, 2 * HIDDEN:3 * HIDDEN]
            acc = None
            for h in range(NUM_HEADS):                  # static unroll (H=4)
                cs = slice(h * HEAD, (h + 1) * HEAD)
                qh, kh, vh = qb[:, cs], kb[:, cs], vb[:, cs]
                s = lax.dot_general(qh, kh, (((1,), (1,)), ((), ())),
                                    preferred_element_type=jnp.float32) * scale
                s = s + key_bias
                s = s - jnp.max(s, axis=-1, keepdims=True)
                e = jnp.exp(s)
                p = e / jnp.sum(e, axis=-1, keepdims=True)
                ctx_h = jnp.dot(p, vh, preferred_element_type=jnp.float32)   # (S_PAD, HEAD)
                # fold output projection: ctx @ Wo == sum_h ctx_h @ Wo[h-rows]
                part = jnp.dot(ctx_h, wo[cs, :], preferred_element_type=jnp.float32)
                acc = part if acc is None else acc + part
            attn_parts.append(acc)                                           # (S_PAD, D)
        attn_out = jnp.concatenate(attn_parts, axis=0) + bo_ref[l]           # (BS, D)
        x = x + attn_out                                                     # residual 1

        # ---------------- MLP ----------------
        xn2 = _layernorm(x, ln2g_ref[l], ln2b_ref[l])
        m = jnp.dot(xn2, w1_ref[l], preferred_element_type=jnp.float32) + b1_ref[l]
        m = _gelu(m)
        m = jnp.dot(m, w2_ref[l], preferred_element_type=jnp.float32) + b2_ref[l]
        x = x + m                                                            # residual 2

    # ---- encoder_norm + classification head on the CLS row of each batch ----
    for b in range(BATCH):
        cls_b = x[b * S_PAD:b * S_PAD + 1, :]                                # (1, D)
        cn = _layernorm(cls_b, encg_ref[...], encb_ref[...])
        out_ref[b:b + 1, :] = (jnp.dot(cn, headw_ref[...],
                                       preferred_element_type=jnp.float32)
                               + headb_ref[...])


# ---------------- forward pass (wrapper glue is pure layout/constant prep) ----------------
@jax.jit
def vit_forward(x, params):
    B = x.shape[0]
    gh, gw = IMG // PATCH, IMG // PATCH
    # non-overlapping patch extraction == Conv2d(kernel=stride=PATCH) unfold
    patches = x.reshape(B, IN_CH, gh, PATCH, gw, PATCH)
    patches = patches.transpose(0, 2, 4, 1, 3, 5).reshape(B, N_PATCHES, PATCH_K)
    # pad token axis: slot 0 (cls) and slots SEQ..S_PAD-1 get zero patch rows,
    # so one flat (B*S_PAD, K) matmul in the kernel covers the whole batch.
    patches_pad = jnp.pad(patches, ((0, 0), (1, S_PAD - 1 - N_PATCHES), (0, 0)))
    patches_flat = patches_pad.reshape(B * S_PAD, PATCH_K)

    w2d = params["patch_w"].reshape(HIDDEN, PATCH_K).T              # (K, D)
    pos = params["pos_emb"][0]                                       # (SEQ, D)
    # additive "base": row 0 = cls_token + pos[0]; rows 1..16 = conv bias + pos;
    # padded rows stay exactly zero.
    row0 = params["cls_token"].reshape(1, HIDDEN) + pos[0:1]
    rows_p = params["patch_b"].reshape(1, HIDDEN) + pos[1:]
    base_one = jnp.concatenate(
        [row0, rows_p, jnp.zeros((S_PAD - SEQ, HIDDEN), jnp.float32)], axis=0)
    base = jnp.tile(base_one, (B, 1))                                # (B*S_PAD, D)

    stk = params["blocks"]
    logits = pl.pallas_call(
        _vit_kernel,
        out_shape=jax.ShapeDtypeStruct((B, NUM_CLASSES), jnp.float32),
    )(patches_flat, base, w2d,
      stk["ln1_g"], stk["ln1_b"], stk["wqkv"], stk["bqkv"], stk["wo"], stk["bo"],
      stk["ln2_g"], stk["ln2_b"], stk["w1"], stk["b1"], stk["w2"], stk["b2"],
      params["enc_g"], params["enc_b"], params["head_w"], params["head_b"])

    # TODO(synk): dropout layers are identity (inference / eval-mode semantics).
    attn_weights = []   # vis=False in the reference module
    return logits, attn_weights


# ---------------- deterministic parameter init ----------------
def init_params(key):
    ks = jax.random.split(key, 6 + NUM_LAYERS)

    def nrm(k, shape, std=0.02):
        return std * jax.random.normal(k, shape, jnp.float32)

    params = {
        "patch_w": nrm(ks[0], (HIDDEN, IN_CH, PATCH, PATCH)),   # torch Conv2d layout
        "patch_b": nrm(ks[1], (HIDDEN,)),
        "cls_token": nrm(ks[2], (1, 1, HIDDEN)),
        "pos_emb": nrm(ks[3], (1, SEQ, HIDDEN)),
        "enc_g": jnp.ones((1, HIDDEN), jnp.float32),
        "enc_b": jnp.zeros((1, HIDDEN), jnp.float32),
        "head_w": nrm(ks[4], (HIDDEN, NUM_CLASSES)),
        "head_b": jnp.zeros((1, NUM_CLASSES), jnp.float32),
    }
    blocks = []
    for i in range(NUM_LAYERS):
        lk = jax.random.split(ks[5 + i], 8)
        blocks.append({
            "ln1_g": jnp.ones((1, HIDDEN), jnp.float32),
            "ln1_b": jnp.zeros((1, HIDDEN), jnp.float32),
            "wq": nrm(lk[0], (HIDDEN, HIDDEN)), "bq": jnp.zeros((1, HIDDEN), jnp.float32),
            "wk": nrm(lk[1], (HIDDEN, HIDDEN)), "bk": jnp.zeros((1, HIDDEN), jnp.float32),
            "wv": nrm(lk[2], (HIDDEN, HIDDEN)), "bv": jnp.zeros((1, HIDDEN), jnp.float32),
            "wo": nrm(lk[3], (HIDDEN, HIDDEN)), "bo": jnp.zeros((1, HIDDEN), jnp.float32),
            "ln2_g": jnp.ones((1, HIDDEN), jnp.float32),
            "ln2_b": jnp.zeros((1, HIDDEN), jnp.float32),
            "w1": nrm(lk[4], (HIDDEN, MLP_DIM)),
            "b1": 1e-6 * jax.random.normal(lk[5], (1, MLP_DIM), jnp.float32),
            "w2": nrm(lk[6], (MLP_DIM, HIDDEN)),
            "b2": 1e-6 * jax.random.normal(lk[7], (1, HIDDEN), jnp.float32),
        })
    # stack per-layer weights along a leading L axis (static layer index inside
    # the fused kernel) and fuse Wq|Wk|Wv -> one (L, D, 3D) projection.
    params["blocks"] = {
        "ln1_g": jnp.stack([b["ln1_g"] for b in blocks]),
        "ln1_b": jnp.stack([b["ln1_b"] for b in blocks]),
        "wqkv": jnp.stack([jnp.concatenate([b["wq"], b["wk"], b["wv"]], axis=1)
                           for b in blocks]),
        "bqkv": jnp.stack([jnp.concatenate([b["bq"], b["bk"], b["bv"]], axis=1)
                           for b in blocks]),
        "wo": jnp.stack([b["wo"] for b in blocks]),
        "bo": jnp.stack([b["bo"] for b in blocks]),
        "ln2_g": jnp.stack([b["ln2_g"] for b in blocks]),
        "ln2_b": jnp.stack([b["ln2_b"] for b in blocks]),
        "w1": jnp.stack([b["w1"] for b in blocks]),
        "b1": jnp.stack([b["b1"] for b in blocks]),
        "w2": jnp.stack([b["w2"] for b in blocks]),
        "b2": jnp.stack([b["b2"] for b in blocks]),
    }
    return params


if __name__ == "__main__":
    key = jax.random.PRNGKey(0)
    k_x, k_p = jax.random.split(key)
    x = jax.random.normal(k_x, (BATCH, IN_CH, IMG, IMG), jnp.float32)
    params = init_params(k_p)

    logits, attn_w = vit_forward(x, params)
    logits = jax.block_until_ready(logits)
    assert logits.shape == (BATCH, NUM_CLASSES)
    assert bool(jnp.all(jnp.isfinite(logits)))
    print("KERNEL_OK")
</pallas_src>

<mosaic_0001>
module attributes {stable_mosaic.version = 11 : i64} {
  func.func @_vit_kernel(%arg0: memref<48x64xf32, #tpu.memory_space<vmem>>, %arg1: memref<48x32xf32, #tpu.memory_space<vmem>>, %arg2: memref<64x32xf32, #tpu.memory_space<vmem>>, %arg3: memref<2x1x32xf32, #tpu.memory_space<vmem>>, %arg4: memref<2x1x32xf32, #tpu.memory_space<vmem>>, %arg5: memref<2x32x96xf32, #tpu.memory_space<vmem>>, %arg6: memref<2x1x96xf32, #tpu.memory_space<vmem>>, %arg7: memref<2x32x32xf32, #tpu.memory_space<vmem>>, %arg8: memref<2x1x32xf32, #tpu.memory_space<vmem>>, %arg9: memref<2x1x32xf32, #tpu.memory_space<vmem>>, %arg10: memref<2x1x32xf32, #tpu.memory_space<vmem>>, %arg11: memref<2x32x64xf32, #tpu.memory_space<vmem>>, %arg12: memref<2x1x64xf32, #tpu.memory_space<vmem>>, %arg13: memref<2x64x32xf32, #tpu.memory_space<vmem>>, %arg14: memref<2x1x32xf32, #tpu.memory_space<vmem>>, %arg15: memref<1x32xf32, #tpu.memory_space<vmem>>, %arg16: memref<1x32xf32, #tpu.memory_space<vmem>>, %arg17: memref<32x10xf32, #tpu.memory_space<vmem>>, %arg18: memref<1x10xf32, #tpu.memory_space<vmem>>, %arg19: memref<2x10xf32, #tpu.memory_space<vmem>>) attributes {dimension_semantics = [], scalar_prefetch = 0 : i64, scratch_operands = 0 : i64, tpu.core_type = #tpu.core_type<tc>} {
    %c0 = arith.constant 0 : index
    %c0_0 = arith.constant 0 : index
    %0 = vector.load %arg0[%c0, %c0_0] : memref<48x64xf32, #tpu.memory_space<vmem>>, vector<48x64xf32>
    %c0_1 = arith.constant 0 : index
    %c0_2 = arith.constant 0 : index
    %1 = vector.load %arg2[%c0_1, %c0_2] : memref<64x32xf32, #tpu.memory_space<vmem>>, vector<64x32xf32>
    %cst = arith.constant dense<0.000000e+00> : vector<48x32xf32>
    %2 = tpu.matmul %0, %1, %cst {dimension_numbers = #tpu.dot_dimension_numbers<[1], [0], [0], [1], [0, 0, 1, 1], [], []>} : vector<48x64xf32>, vector<64x32xf32>, vector<48x32xf32> -> vector<48x32xf32>
    %c0_3 = arith.constant 0 : index
    %c0_4 = arith.constant 0 : index
    %3 = vector.load %arg1[%c0_3, %c0_4] : memref<48x32xf32, #tpu.memory_space<vmem>>, vector<48x32xf32>
    %4 = arith.addf %2, %3 : vector<48x32xf32>
    %5 = tpu.iota {dimensions = array<i32: 1>} : vector<24x24xi32>
    %c17_i32 = arith.constant 17 : i32
    %6 = vector.broadcast %c17_i32 : i32 to vector<24x24xi32>
    %7 = arith.cmpi slt, %5, %6 : vector<24x24xi32>
    %cst_5 = arith.constant 0.000000e+00 : f32
    %cst_6 = arith.constant -1.000000e+30 : f32
    %8 = vector.broadcast %cst_5 : f32 to vector<24x24xf32>
    %9 = vector.broadcast %cst_6 : f32 to vector<24x24xf32>
    %10 = arith.select %7, %8, %9 : vector<24x24xi1>, vector<24x24xf32>
    %c0_7 = arith.constant 0 : index
    %c0_8 = arith.constant 0 : index
    %c0_9 = arith.constant 0 : index
    %11 = vector.load %arg3[%c0_7, %c0_8, %c0_9] : memref<2x1x32xf32, #tpu.memory_space<vmem>>, vector<1x1x32xf32>
    %12 = vector.shape_cast %11 : vector<1x1x32xf32> to vector<1x32xf32>
    %c0_10 = arith.constant 0 : index
    %c0_11 = arith.constant 0 : index
    %c0_12 = arith.constant 0 : index
    %13 = vector.load %arg4[%c0_10, %c0_11, %c0_12] : memref<2x1x32xf32, #tpu.memory_space<vmem>>, vector<1x1x32xf32>
    %14 = vector.shape_cast %13 : vector<1x1x32xf32> to vector<1x32xf32>
    %cst_13 = arith.constant dense<0.000000e+00> : vector<48xf32>
    %15 = vector.multi_reduction <add>, %4, %cst_13 [1] : vector<48x32xf32> to vector<48xf32>
    %16 = vector.shape_cast %15 : vector<48xf32> to vector<48x1xf32>
    %cst_14 = arith.constant 3.200000e+01 : f32
    %17 = vector.broadcast %cst_14 : f32 to vector<48x1xf32>
    %18 = arith.divf %16, %17 : vector<48x1xf32>
    %19 = vector.broadcast %18 : vector<48x1xf32> to vector<48x32xf32>
    %20 = arith.subf %4, %19 : vector<48x32xf32>
    %21 = arith.mulf %20, %20 : vector<48x32xf32>
    %cst_15 = arith.constant dense<0.000000e+00> : vector<48xf32>
    %22 = vector.multi_reduction <add>, %21, %cst_15 [1] : vector<48x32xf32> to vector<48xf32>
    %23 = vector.shape_cast %22 : vector<48xf32> to vector<48x1xf32>
    %cst_16 = arith.constant 3.200000e+01 : f32
    %24 = vector.broadcast %cst_16 : f32 to vector<48x1xf32>
    %25 = arith.divf %23, %24 : vector<48x1xf32>
    %26 = vector.broadcast %18 : vector<48x1xf32> to vector<48x32xf32>
    %27 = arith.subf %4, %26 : vector<48x32xf32>
    %cst_17 = arith.constant 9.99999997E-7 : f32
    %28 = vector.broadcast %cst_17 : f32 to vector<48x1xf32>
    %29 = arith.addf %25, %28 : vector<48x1xf32>
    %30 = math.rsqrt %29 : vector<48x1xf32>
    %31 = vector.broadcast %30 : vector<48x1xf32> to vector<48x32xf32>
    %32 = arith.mulf %27, %31 : vector<48x32xf32>
    %33 = vector.broadcast %12 : vector<1x32xf32> to vector<48x32xf32>
    %34 = arith.mulf %32, %33 : vector<48x32xf32>
    %35 = vector.broadcast %14 : vector<1x32xf32> to vector<48x32xf32>
    %36 = arith.addf %34, %35 : vector<48x32xf32>
    %c0_18 = arith.constant 0 : index
    %c0_19 = arith.constant 0 : index
    %c0_20 = arith.constant 0 : index
    %37 = vector.load %arg5[%c0_18, %c0_19, %c0_20] : memref<2x32x96xf32, #tpu.memory_space<vmem>>, vector<1x32x96xf32>
    %38 = vector.shape_cast %37 : vector<1x32x96xf32> to vector<32x96xf32>
    %cst_21 = arith.constant dense<0.000000e+00> : vector<48x96xf32>
    %39 = tpu.matmul %36, %38, %cst_21 {dimension_numbers = #tpu.dot_dimension_numbers<[1], [0], [0], [1], [0, 0, 1, 1], [], []>} : vector<48x32xf32>, vector<32x96xf32>, vector<48x96xf32> -> vector<48x96xf32>
    %c0_22 = arith.constant 0 : index
    %c0_23 = arith.constant 0 : index
    %c0_24 = arith.constant 0 : index
    %40 = vector.load %arg6[%c0_22, %c0_23, %c0_24] : memref<2x1x96xf32, #tpu.memory_space<vmem>>, vector<1x1x96xf32>
    %41 = vector.shape_cast %40 : vector<1x1x96xf32> to vector<1x96xf32>
    %42 = vector.broadcast %41 : vector<1x96xf32> to vector<48x96xf32>
    %43 = arith.addf %39, %42 : vector<48x96xf32>
    %c0_25 = arith.constant 0 : index
    %c0_26 = arith.constant 0 : index
    %c0_27 = arith.constant 0 : index
    %44 = vector.load %arg7[%c0_25, %c0_26, %c0_27] : memref<2x32x32xf32, #tpu.memory_space<vmem>>, vector<1x32x32xf32>
    %45 = vector.shape_cast %44 : vector<1x32x32xf32> to vector<32x32xf32>
    %46 = vector.extract_strided_slice %43 {offsets = [0, 0], sizes = [24, 32], strides = [1, 1]} : vector<48x96xf32> to vector<24x32xf32>
    %47 = vector.extract_strided_slice %43 {offsets = [0, 32], sizes = [24, 32], strides = [1, 1]} : vector<48x96xf32> to vector<24x32xf32>
    %48 = vector.extract_strided_slice %43 {offsets = [0, 64], sizes = [24, 32], strides = [1, 1]} : vector<48x96xf32> to vector<24x32xf32>
    %49 = vector.extract_strided_slice %46 {offsets = [0, 0], sizes = [24, 8], strides = [1, 1]} : vector<24x32xf32> to vector<24x8xf32>
    %50 = vector.extract_strided_slice %47 {offsets = [0, 0], sizes = [24, 8], strides = [1, 1]} : vector<24x32xf32> to vector<24x8xf32>
    %51 = vector.extract_strided_slice %48 {offsets = [0, 0], sizes = [24, 8], strides = [1, 1]} : vector<24x32xf32> to vector<24x8xf32>
    %cst_28 = arith.constant dense<0.000000e+00> : vector<24x24xf32>
    %52 = tpu.matmul %49, %50, %cst_28 {dimension_numbers = #tpu.dot_dimension_numbers<[1], [1], [0], [0], [0, 0, 1, 0], [], []>} : vector<24x8xf32>, vector<24x8xf32>, vector<24x24xf32> -> vector<24x24xf32>
    %cst_29 = arith.constant 0.353553385 : f32
    %53 = vector.broadcast %cst_29 : f32 to vector<24x24xf32>
    %54 = arith.mulf %52, %53 : vector<24x24xf32>
    %55 = arith.addf %54, %10 : vector<24x24xf32>
    %cst_30 = arith.constant dense<0xFF800000> : vector<24xf32>
    %56 = vector.multi_reduction <maximumf>, %55, %cst_30 [1] : vector<24x24xf32> to vector<24xf32>
    %57 = vector.shape_cast %56 : vector<24xf32> to vector<24x1xf32>
    %58 = vector.broadcast %57 : vector<24x1xf32> to vector<24x24xf32>
    %59 = arith.subf %55, %58 : vector<24x24xf32>
    %60 = math.exp %59 : vector<24x24xf32>
    %cst_31 = arith.constant dense<0.000000e+00> : vector<24xf32>
    %61 = vector.multi_reduction <add>, %60, %cst_31 [1] : vector<24x24xf32> to vector<24xf32>
    %62 = vector.shape_cast %61 : vector<24xf32> to vector<24x1xf32>
    %63 = vector.broadcast %62 : vector<24x1xf32> to vector<24x24xf32>
    %64 = arith.divf %60, %63 : vector<24x24xf32>
    %cst_32 = arith.constant dense<0.000000e+00> : vector<24x8xf32>
    %65 = tpu.matmul %64, %51, %cst_32 {dimension_numbers = #tpu.dot_dimension_numbers<[1], [0], [0], [1], [0, 0, 1, 1], [], []>} : vector<24x24xf32>, vector<24x8xf32>, vector<24x8xf32> -> vector<24x8xf32>
    %66 = vector.extract_strided_slice %45 {offsets = [0, 0], sizes = [8, 32], strides = [1, 1]} : vector<32x32xf32> to vector<8x32xf32>
    %cst_33 = arith.constant dense<0.000000e+00> : vector<24x32xf32>
    %67 = tpu.matmul %65, %66, %cst_33 {dimension_numbers = #tpu.dot_dimension_numbers<[1], [0], [0], [1], [0, 0, 1, 1], [], []>} : vector<24x8xf32>, vector<8x32xf32>, vector<24x32xf32> -> vector<24x32xf32>
    %68 = vector.extract_strided_slice %46 {offsets = [0, 8], sizes = [24, 8], strides = [1, 1]} : vector<24x32xf32> to vector<24x8xf32>
    %69 = vector.extract_strided_slice %47 {offsets = [0, 8], sizes = [24, 8], strides = [1, 1]} : vector<24x32xf32> to vector<24x8xf32>
    %70 = vector.extract_strided_slice %48 {offsets = [0, 8], sizes = [24, 8], strides = [1, 1]} : vector<24x32xf32> to vector<24x8xf32>
    %cst_34 = arith.constant dense<0.000000e+00> : vector<24x24xf32>
    %71 = tpu.matmul %68, %69, %cst_34 {dimension_numbers = #tpu.dot_dimension_numbers<[1], [1], [0], [0], [0, 0, 1, 0], [], []>} : vector<24x8xf32>, vector<24x8xf32>, vector<24x24xf32> -> vector<24x24xf32>
    %cst_35 = arith.constant 0.353553385 : f32
    %72 = vector.broadcast %cst_35 : f32 to vector<24x24xf32>
    %73 = arith.mulf %71, %72 : vector<24x24xf32>
    %74 = arith.addf %73, %10 : vector<24x24xf32>
    %cst_36 = arith.constant dense<0xFF800000> : vector<24xf32>
    %75 = vector.multi_reduction <maximumf>, %74, %cst_36 [1] : vector<24x24xf32> to vector<24xf32>
    %76 = vector.shape_cast %75 : vector<24xf32> to vector<24x1xf32>
    %77 = vector.broadcast %76 : vector<24x1xf32> to vector<24x24xf32>
    %78 = arith.subf %74, %77 : vector<24x24xf32>
    %79 = math.exp %78 : vector<24x24xf32>
    %cst_37 = arith.constant dense<0.000000e+00> : vector<24xf32>
    %80 = vector.multi_reduction <add>, %79, %cst_37 [1] : vector<24x24xf32> to vector<24xf32>
    %81 = vector.shape_cast %80 : vector<24xf32> to vector<24x1xf32>
    %82 = vector.broadcast %81 : vector<24x1xf32> to vector<24x24xf32>
    %83 = arith.divf %79, %82 : vector<24x24xf32>
    %cst_38 = arith.constant dense<0.000000e+00> : vector<24x8xf32>
    %84 = tpu.matmul %83, %70, %cst_38 {dimension_numbers = #tpu.dot_dimension_numbers<[1], [0], [0], [1], [0, 0, 1, 1], [], []>} : vector<24x24xf32>, vector<24x8xf32>, vector<24x8xf32> -> vector<24x8xf32>
    %85 = vector.extract_strided_slice %45 {offsets = [8, 0], sizes = [8, 32], strides = [1, 1]} : vector<32x32xf32> to vector<8x32xf32>
    %cst_39 = arith.constant dense<0.000000e+00> : vector<24x32xf32>
    %86 = tpu.matmul %84, %85, %cst_39 {dimension_numbers = #tpu.dot_dimension_numbers<[1], [0], [0], [1], [0, 0, 1, 1], [], []>} : vector<24x8xf32>, vector<8x32xf32>, vector<24x32xf32> -> vector<24x32xf32>
    %87 = arith.addf %67, %86 : vector<24x32xf32>
    %88 = vector.extract_strided_slice %46 {offsets = [0, 16], sizes = [24, 8], strides = [1, 1]} : vector<24x32xf32> to vector<24x8xf32>
    %89 = vector.extract_strided_slice %47 {offsets = [0, 16], sizes = [24, 8], strides = [1, 1]} : vector<24x32xf32> to vector<24x8xf32>
    %90 = vector.extract_strided_slice %48 {offsets = [0, 16], sizes = [24, 8], strides = [1, 1]} : vector<24x32xf32> to vector<24x8xf32>
    %cst_40 = arith.constant dense<0.000000e+00> : vector<24x24xf32>
    %91 = tpu.matmul %88, %89, %cst_40 {dimension_numbers = #tpu.dot_dimension_numbers<[1], [1], [0], [0], [0, 0, 1, 0], [], []>} : vector<24x8xf32>, vector<24x8xf32>, vector<24x24xf32> -> vector<24x24xf32>
    %cst_41 = arith.constant 0.353553385 : f32
    %92 = vector.broadcast %cst_41 : f32 to vector<24x24xf32>
    %93 = arith.mulf %91, %92 : vector<24x24xf32>
    %94 = arith.addf %93, %10 : vector<24x24xf32>
    %cst_42 = arith.constant dense<0xFF800000> : vector<24xf32>
    %95 = vector.multi_reduction <maximumf>, %94, %cst_42 [1] : vector<24x24xf32> to vector<24xf32>
    %96 = vector.shape_cast %95 : vector<24xf32> to vector<24x1xf32>
    %97 = vector.broadcast %96 : vector<24x1xf32> to vector<24x24xf32>
    %98 = arith.subf %94, %97 : vector<24x24xf32>
    %99 = math.exp %98 : vector<24x24xf32>
    %cst_43 = arith.constant dense<0.000000e+00> : vector<24xf32>
    %100 = vector.multi_reduction <add>, %99, %cst_43 [1] : vector<24x24xf32> to vector<24xf32>
    %101 = vector.shape_cast %100 : vector<24xf32> to vector<24x1xf32>
    %102 = vector.broadcast %101 : vector<24x1xf32> to vector<24x24xf32>
    %103 = arith.divf %99, %102 : vector<24x24xf32>
    %cst_44 = arith.constant dense<0.000000e+00> : vector<24x8xf32>
    %104 = tpu.matmul %103, %90, %cst_44 {dimension_numbers = #tpu.dot_dimension_numbers<[1], [0], [0], [1], [0, 0, 1, 1], [], []>} : vector<24x24xf32>, vector<24x8xf32>, vector<24x8xf32> -> vector<24x8xf32>
    %105 = vector.extract_strided_slice %45 {offsets = [16, 0], sizes = [8, 32], strides = [1, 1]} : vector<32x32xf32> to vector<8x32xf32>
    %cst_45 = arith.constant dense<0.000000e+00> : vector<24x32xf32>
    %106 = tpu.matmul %104, %105, %cst_45 {dimension_numbers = #tpu.dot_dimension_numbers<[1], [0], [0], [1], [0, 0, 1, 1], [], []>} : vector<24x8xf32>, vector<8x32xf32>, vector<24x32xf32> -> vector<24x32xf32>
    %107 = arith.addf %87, %106 : vector<24x32xf32>
    %108 = vector.extract_strided_slice %46 {offsets = [0, 24], sizes = [24, 8], strides = [1, 1]} : vector<24x32xf32> to vector<24x8xf32>
    %109 = vector.extract_strided_slice %47 {offsets = [0, 24], sizes = [24, 8], strides = [1, 1]} : vector<24x32xf32> to vector<24x8xf32>
    %110 = vector.extract_strided_slice %48 {offsets = [0, 24], sizes = [24, 8], strides = [1, 1]} : vector<24x32xf32> to vector<24x8xf32>
    %cst_46 = arith.constant dense<0.000000e+00> : vector<24x24xf32>
    %111 = tpu.matmul %108, %109, %cst_46 {dimension_numbers = #tpu.dot_dimension_numbers<[1], [1], [0], [0], [0, 0, 1, 0], [], []>} : vector<24x8xf32>, vector<24x8xf32>, vector<24x24xf32> -> vector<24x24xf32>
    %cst_47 = arith.constant 0.353553385 : f32
    %112 = vector.broadcast %cst_47 : f32 to vector<24x24xf32>
    %113 = arith.mulf %111, %112 : vector<24x24xf32>
    %114 = arith.addf %113, %10 : vector<24x24xf32>
    %cst_48 = arith.constant dense<0xFF800000> : vector<24xf32>
    %115 = vector.multi_reduction <maximumf>, %114, %cst_48 [1] : vector<24x24xf32> to vector<24xf32>
    %116 = vector.shape_cast %115 : vector<24xf32> to vector<24x1xf32>
    %117 = vector.broadcast %116 : vector<24x1xf32> to vector<24x24xf32>
    %118 = arith.subf %114, %117 : vector<24x24xf32>
    %119 = math.exp %118 : vector<24x24xf32>
    %cst_49 = arith.constant dense<0.000000e+00> : vector<24xf32>
    %120 = vector.multi_reduction <add>, %119, %cst_49 [1] : vector<24x24xf32> to vector<24xf32>
    %121 = vector.shape_cast %120 : vector<24xf32> to vector<24x1xf32>
    %122 = vector.broadcast %121 : vector<24x1xf32> to vector<24x24xf32>
    %123 = arith.divf %119, %122 : vector<24x24xf32>
    %cst_50 = arith.constant dense<0.000000e+00> : vector<24x8xf32>
    %124 = tpu.matmul %123, %110, %cst_50 {dimension_numbers = #tpu.dot_dimension_numbers<[1], [0], [0], [1], [0, 0, 1, 1], [], []>} : vector<24x24xf32>, vector<24x8xf32>, vector<24x8xf32> -> vector<24x8xf32>
    %125 = vector.extract_strided_slice %45 {offsets = [24, 0], sizes = [8, 32], strides = [1, 1]} : vector<32x32xf32> to vector<8x32xf32>
    %cst_51 = arith.constant dense<0.000000e+00> : vector<24x32xf32>
    %126 = tpu.matmul %124, %125, %cst_51 {dimension_numbers = #tpu.dot_dimension_numbers<[1], [0], [0], [1], [0, 0, 1, 1], [], []>} : vector<24x8xf32>, vector<8x32xf32>, vector<24x32xf32> -> vector<24x32xf32>
    %127 = arith.addf %107, %126 : vector<24x32xf32>
    %128 = vector.extract_strided_slice %43 {offsets = [24, 0], sizes = [24, 32], strides = [1, 1]} : vector<48x96xf32> to vector<24x32xf32>
    %129 = vector.extract_strided_slice %43 {offsets = [24, 32], sizes = [24, 32], strides = [1, 1]} : vector<48x96xf32> to vector<24x32xf32>
    %130 = vector.extract_strided_slice %43 {offsets = [24, 64], sizes = [24, 32], strides = [1, 1]} : vector<48x96xf32> to vector<24x32xf32>
    %131 = vector.extract_strided_slice %128 {offsets = [0, 0], sizes = [24, 8], strides = [1, 1]} : vector<24x32xf32> to vector<24x8xf32>
    %132 = vector.extract_strided_slice %129 {offsets = [0, 0], sizes = [24, 8], strides = [1, 1]} : vector<24x32xf32> to vector<24x8xf32>
    %133 = vector.extract_strided_slice %130 {offsets = [0, 0], sizes = [24, 8], strides = [1, 1]} : vector<24x32xf32> to vector<24x8xf32>
    %cst_52 = arith.constant dense<0.000000e+00> : vector<24x24xf32>
    %134 = tpu.matmul %131, %132, %cst_52 {dimension_numbers = #tpu.dot_dimension_numbers<[1], [1], [0], [0], [0, 0, 1, 0], [], []>} : vector<24x8xf32>, vector<24x8xf32>, vector<24x24xf32> -> vector<24x24xf32>
    %cst_53 = arith.constant 0.353553385 : f32
    %135 = vector.broadcast %cst_53 : f32 to vector<24x24xf32>
    %136 = arith.mulf %134, %135 : vector<24x24xf32>
    %137 = arith.addf %136, %10 : vector<24x24xf32>
    %cst_54 = arith.constant dense<0xFF800000> : vector<24xf32>
    %138 = vector.multi_reduction <maximumf>, %137, %cst_54 [1] : vector<24x24xf32> to vector<24xf32>
    %139 = vector.shape_cast %138 : vector<24xf32> to vector<24x1xf32>
    %140 = vector.broadcast %139 : vector<24x1xf32> to vector<24x24xf32>
    %141 = arith.subf %137, %140 : vector<24x24xf32>
    %142 = math.exp %141 : vector<24x24xf32>
    %cst_55 = arith.constant dense<0.000000e+00> : vector<24xf32>
    %143 = vector.multi_reduction <add>, %142, %cst_55 [1] : vector<24x24xf32> to vector<24xf32>
    %144 = vector.shape_cast %143 : vector<24xf32> to vector<24x1xf32>
    %145 = vector.broadcast %144 : vector<24x1xf32> to vector<24x24xf32>
    %146 = arith.divf %142, %145 : vector<24x24xf32>
    %cst_56 = arith.constant dense<0.000000e+00> : vector<24x8xf32>
    %147 = tpu.matmul %146, %133, %cst_56 {dimension_numbers = #tpu.dot_dimension_numbers<[1], [0], [0], [1], [0, 0, 1, 1], [], []>} : vector<24x24xf32>, vector<24x8xf32>, vector<24x8xf32> -> vector<24x8xf32>
    %148 = vector.extract_strided_slice %45 {offsets = [0, 0], sizes = [8, 32], strides = [1, 1]} : vector<32x32xf32> to vector<8x32xf32>
    %cst_57 = arith.constant dense<0.000000e+00> : vector<24x32xf32>
    %149 = tpu.matmul %147, %148, %cst_57 {dimension_numbers = #tpu.dot_dimension_numbers<[1], [0], [0], [1], [0, 0, 1, 1], [], []>} : vector<24x8xf32>, vector<8x32xf32>, vector<24x32xf32> -> vector<24x32xf32>
    %150 = vector.extract_strided_slice %128 {offsets = [0, 8], sizes = [24, 8], strides = [1, 1]} : vector<24x32xf32> to vector<24x8xf32>
    %151 = vector.extract_strided_slice %129 {offsets = [0, 8], sizes = [24, 8], strides = [1, 1]} : vector<24x32xf32> to vector<24x8xf32>
    %152 = vector.extract_strided_slice %130 {offsets = [0, 8], sizes = [24, 8], strides = [1, 1]} : vector<24x32xf32> to vector<24x8xf32>
    %cst_58 = arith.constant dense<0.000000e+00> : vector<24x24xf32>
    %153 = tpu.matmul %150, %151, %cst_58 {dimension_numbers = #tpu.dot_dimension_numbers<[1], [1], [0], [0], [0, 0, 1, 0], [], []>} : vector<24x8xf32>, vector<24x8xf32>, vector<24x24xf32> -> vector<24x24xf32>
    %cst_59 = arith.constant 0.353553385 : f32
    %154 = vector.broadcast %cst_59 : f32 to vector<24x24xf32>
    %155 = arith.mulf %153, %154 : vector<24x24xf32>
    %156 = arith.addf %155, %10 : vector<24x24xf32>
    %cst_60 = arith.constant dense<0xFF800000> : vector<24xf32>
    %157 = vector.multi_reduction <maximumf>, %156, %cst_60 [1] : vector<24x24xf32> to vector<24xf32>
    %158 = vector.shape_cast %157 : vector<24xf32> to vector<24x1xf32>
    %159 = vector.broadcast %158 : vector<24x1xf32> to vector<24x24xf32>
    %160 = arith.subf %156, %159 : vector<24x24xf32>
    %161 = math.exp %160 : vector<24x24xf32>
    %cst_61 = arith.constant dense<0.000000e+00> : vector<24xf32>
    %162 = vector.multi_reduction <add>, %161, %cst_61 [1] : vector<24x24xf32> to vector<24xf32>
    %163 = vector.shape_cast %162 : vector<24xf32> to vector<24x1xf32>
    %164 = vector.broadcast %163 : vector<24x1xf32> to vector<24x24xf32>
    %165 = arith.divf %161, %164 : vector<24x24xf32>
    %cst_62 = arith.constant dense<0.000000e+00> : vector<24x8xf32>
    %166 = tpu.matmul %165, %152, %cst_62 {dimension_numbers = #tpu.dot_dimension_numbers<[1], [0], [0], [1], [0, 0, 1, 1], [], []>} : vector<24x24xf32>, vector<24x8xf32>, vector<24x8xf32> -> vector<24x8xf32>
    %167 = vector.extract_strided_slice %45 {offsets = [8, 0], sizes = [8, 32], strides = [1, 1]} : vector<32x32xf32> to vector<8x32xf32>
    %cst_63 = arith.constant dense<0.000000e+00> : vector<24x32xf32>
    %168 = tpu.matmul %166, %167, %cst_63 {dimension_numbers = #tpu.dot_dimension_numbers<[1], [0], [0], [1], [0, 0, 1, 1], [], []>} : vector<24x8xf32>, vector<8x32xf32>, vector<24x32xf32> -> vector<24x32xf32>
    %169 = arith.addf %149, %168 : vector<24x32xf32>
    %170 = vector.extract_strided_slice %128 {offsets = [0, 16], sizes = [24, 8], strides = [1, 1]} : vector<24x32xf32> to vector<24x8xf32>
    %171 = vector.extract_strided_slice %129 {offsets = [0, 16], sizes = [24, 8], strides = [1, 1]} : vector<24x32xf32> to vector<24x8xf32>
    %172 = vector.extract_strided_slice %130 {offsets = [0, 16], sizes = [24, 8], strides = [1, 1]} : vector<24x32xf32> to vector<24x8xf32>
    %cst_64 = arith.constant dense<0.000000e+00> : vector<24x24xf32>
    %173 = tpu.matmul %170, %171, %cst_64 {dimension_numbers = #tpu.dot_dimension_numbers<[1], [1], [0], [0], [0, 0, 1, 0], [], []>} : vector<24x8xf32>, vector<24x8xf32>, vector<24x24xf32> -> vector<24x24xf32>
    %cst_65 = arith.constant 0.353553385 : f32
    %174 = vector.broadcast %cst_65 : f32 to vector<24x24xf32>
    %175 = arith.mulf %173, %174 : vector<24x24xf32>
    %176 = arith.addf %175, %10 : vector<24x24xf32>
    %cst_66 = arith.constant dense<0xFF800000> : vector<24xf32>
    %177 = vector.multi_reduction <maximumf>, %176, %cst_66 [1] : vector<24x24xf32> to vector<24xf32>
    %178 = vector.shape_cast %177 : vector<24xf32> to vector<24x1xf32>
    %179 = vector.broadcast %178 : vector<24x1xf32> to vector<24x24xf32>
    %180 = arith.subf %176, %179 : vector<24x24xf32>
    %181 = math.exp %180 : vector<24x24xf32>
    %cst_67 = arith.constant dense<0.000000e+00> : vector<24xf32>
    %182 = vector.multi_reduction <add>, %181, %cst_67 [1] : vector<24x24xf32> to vector<24xf32>
    %183 = vector.shape_cast %182 : vector<24xf32> to vector<24x1xf32>
    %184 = vector.broadcast %183 : vector<24x1xf32> to vector<24x24xf32>
    %185 = arith.divf %181, %184 : vector<24x24xf32>
    %cst_68 = arith.constant dense<0.000000e+00> : vector<24x8xf32>
    %186 = tpu.matmul %185, %172, %cst_68 {dimension_numbers = #tpu.dot_dimension_numbers<[1], [0], [0], [1], [0, 0, 1, 1], [], []>} : vector<24x24xf32>, vector<24x8xf32>, vector<24x8xf32> -> vector<24x8xf32>
    %187 = vector.extract_strided_slice %45 {offsets = [16, 0], sizes = [8, 32], strides = [1, 1]} : vector<32x32xf32> to vector<8x32xf32>
    %cst_69 = arith.constant dense<0.000000e+00> : vector<24x32xf32>
    %188 = tpu.matmul %186, %187, %cst_69 {dimension_numbers = #tpu.dot_dimension_numbers<[1], [0], [0], [1], [0, 0, 1, 1], [], []>} : vector<24x8xf32>, vector<8x32xf32>, vector<24x32xf32> -> vector<24x32xf32>
    %189 = arith.addf %169, %188 : vector<24x32xf32>
    %190 = vector.extract_strided_slice %128 {offsets = [0, 24], sizes = [24, 8], strides = [1, 1]} : vector<24x32xf32> to vector<24x8xf32>
    %191 = vector.extract_strided_slice %129 {offsets = [0, 24], sizes = [24, 8], strides = [1, 1]} : vector<24x32xf32> to vector<24x8xf32>
    %192 = vector.extract_strided_slice %130 {offsets = [0, 24], sizes = [24, 8], strides = [1, 1]} : vector<24x32xf32> to vector<24x8xf32>
    %cst_70 = arith.constant dense<0.000000e+00> : vector<24x24xf32>
    %193 = tpu.matmul %190, %191, %cst_70 {dimension_numbers = #tpu.dot_dimension_numbers<[1], [1], [0], [0], [0, 0, 1, 0], [], []>} : vector<24x8xf32>, vector<24x8xf32>, vector<24x24xf32> -> vector<24x24xf32>
    %cst_71 = arith.constant 0.353553385 : f32
    %194 = vector.broadcast %cst_71 : f32 to vector<24x24xf32>
    %195 = arith.mulf %193, %194 : vector<24x24xf32>
    %196 = arith.addf %195, %10 : vector<24x24xf32>
    %cst_72 = arith.constant dense<0xFF800000> : vector<24xf32>
    %197 = vector.multi_reduction <maximumf>, %196, %cst_72 [1] : vector<24x24xf32> to vector<24xf32>
    %198 = vector.shape_cast %197 : vector<24xf32> to vector<24x1xf32>
    %199 = vector.broadcast %198 : vector<24x1xf32> to vector<24x24xf32>
    %200 = arith.subf %196, %199 : vector<24x24xf32>
    %201 = math.exp %200 : vector<24x24xf32>
    %cst_73 = arith.constant dense<0.000000e+00> : vector<24xf32>
    %202 = vector.multi_reduction <add>, %201, %cst_73 [1] : vector<24x24xf32> to vector<24xf32>
    %203 = vector.shape_cast %202 : vector<24xf32> to vector<24x1xf32>
    %204 = vector.broadcast %203 : vector<24x1xf32> to vector<24x24xf32>
    %205 = arith.divf %201, %204 : vector<24x24xf32>
    %cst_74 = arith.constant dense<0.000000e+00> : vector<24x8xf32>
    %206 = tpu.matmul %205, %192, %cst_74 {dimension_numbers = #tpu.dot_dimension_numbers<[1], [0], [0], [1], [0, 0, 1, 1], [], []>} : vector<24x24xf32>, vector<24x8xf32>, vector<24x8xf32> -> vector<24x8xf32>
    %207 = vector.extract_strided_slice %45 {offsets = [24, 0], sizes = [8, 32], strides = [1, 1]} : vector<32x32xf32> to vector<8x32xf32>
    %cst_75 = arith.constant dense<0.000000e+00> : vector<24x32xf32>
    %208 = tpu.matmul %206, %207, %cst_75 {dimension_numbers = #tpu.dot_dimension_numbers<[1], [0], [0], [1], [0, 0, 1, 1], [], []>} : vector<24x8xf32>, vector<8x32xf32>, vector<24x32xf32> -> vector<24x32xf32>
    %209 = arith.addf %189, %208 : vector<24x32xf32>
    %210 = tpu.concatenate %127, %209 in 0 : vector<24x32xf32>, vector<24x32xf32> -> vector<48x32xf32>
    %c0_76 = arith.constant 0 : index
    %c0_77 = arith.constant 0 : index
    %c0_78 = arith.constant 0 : index
    %211 = vector.load %arg8[%c0_76, %c0_77, %c0_78] : memref<2x1x32xf32, #tpu.memory_space<vmem>>, vector<1x1x32xf32>
    %212 = vector.shape_cast %211 : vector<1x1x32xf32> to vector<1x32xf32>
    %213 = vector.broadcast %212 : vector<1x32xf32> to vector<48x32xf32>
    %214 = arith.addf %210, %213 : vector<48x32xf32>
    %215 = arith.addf %4, %214 : vector<48x32xf32>
    %c0_79 = arith.constant 0 : index
    %c0_80 = arith.constant 0 : index
    %c0_81 = arith.constant 0 : index
    %216 = vector.load %arg9[%c0_79, %c0_80, %c0_81] : memref<2x1x32xf32, #tpu.memory_space<vmem>>, vector<1x1x32xf32>
    %217 = vector.shape_cast %216 : vector<1x1x32xf32> to vector<1x32xf32>
    %c0_82 = arith.constant 0 : index
    %c0_83 = arith.constant 0 : index
    %c0_84 = arith.constant 0 : index
    %218 = vector.load %arg10[%c0_82, %c0_83, %c0_84] : memref<2x1x32xf32, #tpu.memory_space<vmem>>, vector<1x1x32xf32>
    %219 = vector.shape_cast %218 : vector<1x1x32xf32> to vector<1x32xf32>
    %cst_85 = arith.constant dense<0.000000e+00> : vector<48xf32>
    %220 = vector.multi_reduction <add>, %215, %cst_85 [1] : vector<48x32xf32> to vector<48xf32>
    %221 = vector.shape_cast %220 : vector<48xf32> to vector<48x1xf32>
    %cst_86 = arith.constant 3.200000e+01 : f32
    %222 = vector.broadcast %cst_86 : f32 to vector<48x1xf32>
    %223 = arith.divf %221, %222 : vector<48x1xf32>
    %224 = vector.broadcast %223 : vector<48x1xf32> to vector<48x32xf32>
    %225 = arith.subf %215, %224 : vector<48x32xf32>
    %226 = arith.mulf %225, %225 : vector<48x32xf32>
    %cst_87 = arith.constant dense<0.000000e+00> : vector<48xf32>
    %227 = vector.multi_reduction <add>, %226, %cst_87 [1] : vector<48x32xf32> to vector<48xf32>
    %228 = vector.shape_cast %227 : vector<48xf32> to vector<48x1xf32>
    %cst_88 = arith.constant 3.200000e+01 : f32
    %229 = vector.broadcast %cst_88 : f32 to vector<48x1xf32>
    %230 = arith.divf %228, %229 : vector<48x1xf32>
    %231 = vector.broadcast %223 : vector<48x1xf32> to vector<48x32xf32>
    %232 = arith.subf %215, %231 : vector<48x32xf32>
    %cst_89 = arith.constant 9.99999997E-7 : f32
    %233 = vector.broadcast %cst_89 : f32 to vector<48x1xf32>
    %234 = arith.addf %230, %233 : vector<48x1xf32>
    %235 = math.rsqrt %234 : vector<48x1xf32>
    %236 = vector.broadcast %235 : vector<48x1xf32> to vector<48x32xf32>
    %237 = arith.mulf %232, %236 : vector<48x32xf32>
    %238 = vector.broadcast %217 : vector<1x32xf32> to vector<48x32xf32>
    %239 = arith.mulf %237, %238 : vector<48x32xf32>
    %240 = vector.broadcast %219 : vector<1x32xf32> to vector<48x32xf32>
    %241 = arith.addf %239, %240 : vector<48x32xf32>
    %c0_90 = arith.constant 0 : index
    %c0_91 = arith.constant 0 : index
    %c0_92 = arith.constant 0 : index
    %242 = vector.load %arg11[%c0_90, %c0_91, %c0_92] : memref<2x32x64xf32, #tpu.memory_space<vmem>>, vector<1x32x64xf32>
    %243 = vector.shape_cast %242 : vector<1x32x64xf32> to vector<32x64xf32>
    %cst_93 = arith.constant dense<0.000000e+00> : vector<48x64xf32>
    %244 = tpu.matmul %241, %243, %cst_93 {dimension_numbers = #tpu.dot_dimension_numbers<[1], [0], [0], [1], [0, 0, 1, 1], [], []>} : vector<48x32xf32>, vector<32x64xf32>, vector<48x64xf32> -> vector<48x64xf32>
    %c0_94 = arith.constant 0 : index
    %c0_95 = arith.constant 0 : index
    %c0_96 = arith.constant 0 : index
    %245 = vector.load %arg12[%c0_94, %c0_95, %c0_96] : memref<2x1x64xf32, #tpu.memory_space<vmem>>, vector<1x1x64xf32>
    %246 = vector.shape_cast %245 : vector<1x1x64xf32> to vector<1x64xf32>
    %247 = vector.broadcast %246 : vector<1x64xf32> to vector<48x64xf32>
    %248 = arith.addf %244, %247 : vector<48x64xf32>
    %cst_97 = arith.constant 5.000000e-01 : f32
    %249 = vector.broadcast %cst_97 : f32 to vector<48x64xf32>
    %250 = arith.mulf %249, %248 : vector<48x64xf32>
    %cst_98 = arith.constant 0.707106769 : f32
    %251 = vector.broadcast %cst_98 : f32 to vector<48x64xf32>
    %252 = arith.mulf %248, %251 : vector<48x64xf32>
    %cst_99 = arith.constant 0.000000e+00 : f32
    %253 = vector.broadcast %cst_99 : f32 to vector<48x64xf32>
    %254 = arith.cmpf oge, %252, %253 : vector<48x64xf32>
    %cst_100 = arith.constant 1.000000e+00 : f32
    %cst_101 = arith.constant -1.000000e+00 : f32
    %255 = vector.broadcast %cst_100 : f32 to vector<48x64xf32>
    %256 = vector.broadcast %cst_101 : f32 to vector<48x64xf32>
    %257 = arith.select %254, %255, %256 : vector<48x64xi1>, vector<48x64xf32>
    %258 = math.absf %252 : vector<48x64xf32>
    %cst_102 = arith.constant 0.327591091 : f32
    %259 = vector.broadcast %cst_102 : f32 to vector<48x64xf32>
    %260 = arith.mulf %259, %258 : vector<48x64xf32>
    %cst_103 = arith.constant 1.000000e+00 : f32
    %261 = vector.broadcast %cst_103 : f32 to vector<48x64xf32>
    %262 = arith.addf %261, %260 : vector<48x64xf32>
    %cst_104 = arith.constant 1.000000e+00 : f32
    %263 = vector.broadcast %cst_104 : f32 to vector<48x64xf32>
    %264 = arith.divf %263, %262 : vector<48x64xf32>
    %cst_105 = arith.constant 1.06140542 : f32
    %265 = vector.broadcast %cst_105 : f32 to vector<48x64xf32>
    %266 = arith.mulf %264, %265 : vector<48x64xf32>
    %cst_106 = arith.constant -1.45315206 : f32
    %267 = vector.broadcast %cst_106 : f32 to vector<48x64xf32>
    %268 = arith.addf %267, %266 : vector<48x64xf32>
    %269 = arith.mulf %264, %268 : vector<48x64xf32>
    %cst_107 = arith.constant 1.42141378 : f32
    %270 = vector.broadcast %cst_107 : f32 to vector<48x64xf32>
    %271 = arith.addf %270, %269 : vector<48x64xf32>
    %272 = arith.mulf %264, %271 : vector<48x64xf32>
    %cst_108 = arith.constant -0.284496725 : f32
    %273 = vector.broadcast %cst_108 : f32 to vector<48x64xf32>
    %274 = arith.addf %273, %272 : vector<48x64xf32>
    %275 = arith.mulf %264, %274 : vector<48x64xf32>
    %cst_109 = arith.constant 0.254829586 : f32
    %276 = vector.broadcast %cst_109 : f32 to vector<48x64xf32>
    %277 = arith.addf %276, %275 : vector<48x64xf32>
    %278 = arith.mulf %264, %277 : vector<48x64xf32>
    %cst_110 = arith.constant 0.000000e+00 : f32
    %279 = vector.broadcast %cst_110 : f32 to vector<48x64xf32>
    %280 = arith.subf %279, %258 : vector<48x64xf32>
    %281 = arith.mulf %280, %258 : vector<48x64xf32>
    %282 = math.exp %281 : vector<48x64xf32>
    %283 = arith.mulf %278, %282 : vector<48x64xf32>
    %cst_111 = arith.constant 1.000000e+00 : f32
    %284 = vector.broadcast %cst_111 : f32 to vector<48x64xf32>
    %285 = arith.subf %284, %283 : vector<48x64xf32>
    %286 = arith.mulf %257, %285 : vector<48x64xf32>
    %cst_112 = arith.constant 1.000000e+00 : f32
    %287 = vector.broadcast %cst_112 : f32 to vector<48x64xf32>
    %288 = arith.addf %287, %286 : vector<48x64xf32>
    %289 = arith.mulf %250, %288 : vector<48x64xf32>
    %c0_113 = arith.constant 0 : index
    %c0_114 = arith.constant 0 : index
    %c0_115 = arith.constant 0 : index
    %290 = vector.load %arg13[%c0_113, %c0_114, %c0_115] : memref<2x64x32xf32, #tpu.memory_space<vmem>>, vector<1x64x32xf32>
    %291 = vector.shape_cast %290 : vector<1x64x32xf32> to vector<64x32xf32>
    %cst_116 = arith.constant dense<0.000000e+00> : vector<48x32xf32>
    %292 = tpu.matmul %289, %291, %cst_116 {dimension_numbers = #tpu.dot_dimension_numbers<[1], [0], [0], [1], [0, 0, 1, 1], [], []>} : vector<48x64xf32>, vector<64x32xf32>, vector<48x32xf32> -> vector<48x32xf32>
    %c0_117 = arith.constant 0 : index
    %c0_118 = arith.constant 0 : index
    %c0_119 = arith.constant 0 : index
    %293 = vector.load %arg14[%c0_117, %c0_118, %c0_119] : memref<2x1x32xf32, #tpu.memory_space<vmem>>, vector<1x1x32xf32>
    %294 = vector.shape_cast %293 : vector<1x1x32xf32> to vector<1x32xf32>
    %295 = vector.broadcast %294 : vector<1x32xf32> to vector<48x32xf32>
    %296 = arith.addf %292, %295 : vector<48x32xf32>
    %297 = arith.addf %215, %296 : vector<48x32xf32>
    %c1 = arith.constant 1 : index
    %c0_120 = arith.constant 0 : index
    %c0_121 = arith.constant 0 : index
    %298 = vector.load %arg3[%c1, %c0_120, %c0_121] : memref<2x1x32xf32, #tpu.memory_space<vmem>>, vector<1x1x32xf32>
    %299 = vector.shape_cast %298 : vector<1x1x32xf32> to vector<1x32xf32>
    %c1_122 = arith.constant 1 : index
    %c0_123 = arith.constant 0 : index
    %c0_124 = arith.constant 0 : index
    %300 = vector.load %arg4[%c1_122, %c0_123, %c0_124] : memref<2x1x32xf32, #tpu.memory_space<vmem>>, vector<1x1x32xf32>
    %301 = vector.shape_cast %300 : vector<1x1x32xf32> to vector<1x32xf32>
    %cst_125 = arith.constant dense<0.000000e+00> : vector<48xf32>
    %302 = vector.multi_reduction <add>, %297, %cst_125 [1] : vector<48x32xf32> to vector<48xf32>
    %303 = vector.shape_cast %302 : vector<48xf32> to vector<48x1xf32>
    %cst_126 = arith.constant 3.200000e+01 : f32
    %304 = vector.broadcast %cst_126 : f32 to vector<48x1xf32>
    %305 = arith.divf %303, %304 : vector<48x1xf32>
    %306 = vector.broadcast %305 : vector<48x1xf32> to vector<48x32xf32>
    %307 = arith.subf %297, %306 : vector<48x32xf32>
    %308 = arith.mulf %307, %307 : vector<48x32xf32>
    %cst_127 = arith.constant dense<0.000000e+00> : vector<48xf32>
    %309 = vector.multi_reduction <add>, %308, %cst_127 [1] : vector<48x32xf32> to vector<48xf32>
    %310 = vector.shape_cast %309 : vector<48xf32> to vector<48x1xf32>
    %cst_128 = arith.constant 3.200000e+01 : f32
    %311 = vector.broadcast %cst_128 : f32 to vector<48x1xf32>
    %312 = arith.divf %310, %311 : vector<48x1xf32>
    %313 = vector.broadcast %305 : vector<48x1xf32> to vector<48x32xf32>
    %314 = arith.subf %297, %313 : vector<48x32xf32>
    %cst_129 = arith.constant 9.99999997E-7 : f32
    %315 = vector.broadcast %cst_129 : f32 to vector<48x1xf32>
    %316 = arith.addf %312, %315 : vector<48x1xf32>
    %317 = math.rsqrt %316 : vector<48x1xf32>
    %318 = vector.broadcast %317 : vector<48x1xf32> to vector<48x32xf32>
    %319 = arith.mulf %314, %318 : vector<48x32xf32>
    %320 = vector.broadcast %299 : vector<1x32xf32> to vector<48x32xf32>
    %321 = arith.mulf %319, %320 : vector<48x32xf32>
    %322 = vector.broadcast %301 : vector<1x32xf32> to vector<48x32xf32>
    %323 = arith.addf %321, %322 : vector<48x32xf32>
    %c1_130 = arith.constant 1 : index
    %c0_131 = arith.constant 0 : index
    %c0_132 = arith.constant 0 : index
    %324 = vector.load %arg5[%c1_130, %c0_131, %c0_132] : memref<2x32x96xf32, #tpu.memory_space<vmem>>, vector<1x32x96xf32>
    %325 = vector.shape_cast %324 : vector<1x32x96xf32> to vector<32x96xf32>
    %cst_133 = arith.constant dense<0.000000e+00> : vector<48x96xf32>
    %326 = tpu.matmul %323, %325, %cst_133 {dimension_numbers = #tpu.dot_dimension_numbers<[1], [0], [0], [1], [0, 0, 1, 1], [], []>} : vector<48x32xf32>, vector<32x96xf32>, vector<48x96xf32> -> vector<48x96xf32>
    %c1_134 = arith.constant 1 : index
    %c0_135 = arith.constant 0 : index
    %c0_136 = arith.constant 0 : index
    %327 = vector.load %arg6[%c1_134, %c0_135, %c0_136] : memref<2x1x96xf32, #tpu.memory_space<vmem>>, vector<1x1x96xf32>
    %328 = vector.shape_cast %327 : vector<1x1x96xf32> to vector<1x96xf32>
    %329 = vector.broadcast %328 : vector<1x96xf32> to vector<48x96xf32>
    %330 = arith.addf %326, %329 : vector<48x96xf32>
    %c1_137 = arith.constant 1 : index
    %c0_138 = arith.constant 0 : index
    %c0_139 = arith.constant 0 : index
    %331 = vector.load %arg7[%c1_137, %c0_138, %c0_139] : memref<2x32x32xf32, #tpu.memory_space<vmem>>, vector<1x32x32xf32>
    %332 = vector.shape_cast %331 : vector<1x32x32xf32> to vector<32x32xf32>
    %333 = vector.extract_strided_slice %330 {offsets = [0, 0], sizes = [24, 32], strides = [1, 1]} : vector<48x96xf32> to vector<24x32xf32>
    %334 = vector.extract_strided_slice %330 {offsets = [0, 32], sizes = [24, 32], strides = [1, 1]} : vector<48x96xf32> to vector<24x32xf32>
    %335 = vector.extract_strided_slice %330 {offsets = [0, 64], sizes = [24, 32], strides = [1, 1]} : vector<48x96xf32> to vector<24x32xf32>
    %336 = vector.extract_strided_slice %333 {offsets = [0, 0], sizes = [24, 8], strides = [1, 1]} : vector<24x32xf32> to vector<24x8xf32>
    %337 = vector.extract_strided_slice %334 {offsets = [0, 0], sizes = [24, 8], strides = [1, 1]} : vector<24x32xf32> to vector<24x8xf32>
    %338 = vector.extract_strided_slice %335 {offsets = [0, 0], sizes = [24, 8], strides = [1, 1]} : vector<24x32xf32> to vector<24x8xf32>
    %cst_140 = arith.constant dense<0.000000e+00> : vector<24x24xf32>
    %339 = tpu.matmul %336, %337, %cst_140 {dimension_numbers = #tpu.dot_dimension_numbers<[1], [1], [0], [0], [0, 0, 1, 0], [], []>} : vector<24x8xf32>, vector<24x8xf32>, vector<24x24xf32> -> vector<24x24xf32>
    %cst_141 = arith.constant 0.353553385 : f32
    %340 = vector.broadcast %cst_141 : f32 to vector<24x24xf32>
    %341 = arith.mulf %339, %340 : vector<24x24xf32>
    %342 = arith.addf %341, %10 : vector<24x24xf32>
    %cst_142 = arith.constant dense<0xFF800000> : vector<24xf32>
    %343 = vector.multi_reduction <maximumf>, %342, %cst_142 [1] : vector<24x24xf32> to vector<24xf32>
    %344 = vector.shape_cast %343 : vector<24xf32> to vector<24x1xf32>
    %345 = vector.broadcast %344 : vector<24x1xf32> to vector<24x24xf32>
    %346 = arith.subf %342, %345 : vector<24x24xf32>
    %347 = math.exp %346 : vector<24x24xf32>
    %cst_143 = arith.constant dense<0.000000e+00> : vector<24xf32>
    %348 = vector.multi_reduction <add>, %347, %cst_143 [1] : vector<24x24xf32> to vector<24xf32>
    %349 = vector.shape_cast %348 : vector<24xf32> to vector<24x1xf32>
    %350 = vector.broadcast %349 : vector<24x1xf32> to vector<24x24xf32>
    %351 = arith.divf %347, %350 : vector<24x24xf32>
    %cst_144 = arith.constant dense<0.000000e+00> : vector<24x8xf32>
    %352 = tpu.matmul %351, %338, %cst_144 {dimension_numbers = #tpu.dot_dimension_numbers<[1], [0], [0], [1], [0, 0, 1, 1], [], []>} : vector<24x24xf32>, vector<24x8xf32>, vector<24x8xf32> -> vector<24x8xf32>
    %353 = vector.extract_strided_slice %332 {offsets = [0, 0], sizes = [8, 32], strides = [1, 1]} : vector<32x32xf32> to vector<8x32xf32>
    %cst_145 = arith.constant dense<0.000000e+00> : vector<24x32xf32>
    %354 = tpu.matmul %352, %353, %cst_145 {dimension_numbers = #tpu.dot_dimension_numbers<[1], [0], [0], [1], [0, 0, 1, 1], [], []>} : vector<24x8xf32>, vector<8x32xf32>, vector<24x32xf32> -> vector<24x32xf32>
    %355 = vector.extract_strided_slice %333 {offsets = [0, 8], sizes = [24, 8], strides = [1, 1]} : vector<24x32xf32> to vector<24x8xf32>
    %356 = vector.extract_strided_slice %334 {offsets = [0, 8], sizes = [24, 8], strides = [1, 1]} : vector<24x32xf32> to vector<24x8xf32>
    %357 = vector.extract_strided_slice %335 {offsets = [0, 8], sizes = [24, 8], strides = [1, 1]} : vector<24x32xf32> to vector<24x8xf32>
    %cst_146 = arith.constant dense<0.000000e+00> : vector<24x24xf32>
    %358 = tpu.matmul %355, %356, %cst_146 {dimension_numbers = #tpu.dot_dimension_numbers<[1], [1], [0], [0], [0, 0, 1, 0], [], []>} : vector<24x8xf32>, vector<24x8xf32>, vector<24x24xf32> -> vector<24x24xf32>
    %cst_147 = arith.constant 0.353553385 : f32
    %359 = vector.broadcast %cst_147 : f32 to vector<24x24xf32>
    %360 = arith.mulf %358, %359 : vector<24x24xf32>
    %361 = arith.addf %360, %10 : vector<24x24xf32>
    %cst_148 = arith.constant dense<0xFF800000> : vector<24xf32>
    %362 = vector.multi_reduction <maximumf>, %361, %cst_148 [1] : vector<24x24xf32> to vector<24xf32>
    %363 = vector.shape_cast %362 : vector<24xf32> to vector<24x1xf32>
    %364 = vector.broadcast %363 : vector<24x1xf32> to vector<24x24xf32>
    %365 = arith.subf %361, %364 : vector<24x24xf32>
    %366 = math.exp %365 : vector<24x24xf32>
    %cst_149 = arith.constant dense<0.000000e+00> : vector<24xf32>
    %367 = vector.multi_reduction <add>, %366, %cst_149 [1] : vector<24x24xf32> to vector<24xf32>
    %368 = vector.shape_cast %367 : vector<24xf32> to vector<24x1xf32>
    %369 = vector.broadcast %368 : vector<24x1xf32> to vector<24x24xf32>
    %370 = arith.divf %366, %369 : vector<24x24xf32>
    %cst_150 = arith.constant dense<0.000000e+00> : vector<24x8xf32>
    %371 = tpu.matmul %370, %357, %cst_150 {dimension_numbers = #tpu.dot_dimension_numbers<[1], [0], [0], [1], [0, 0, 1, 1], [], []>} : vector<24x24xf32>, vector<24x8xf32>, vector<24x8xf32> -> vector<24x8xf32>
    %372 = vector.extract_strided_slice %332 {offsets = [8, 0], sizes = [8, 32], strides = [1, 1]} : vector<32x32xf32> to vector<8x32xf32>
    %cst_151 = arith.constant dense<0.000000e+00> : vector<24x32xf32>
    %373 = tpu.matmul %371, %372, %cst_151 {dimension_numbers = #tpu.dot_dimension_numbers<[1], [0], [0], [1], [0, 0, 1, 1], [], []>} : vector<24x8xf32>, vector<8x32xf32>, vector<24x32xf32> -> vector<24x32xf32>
    %374 = arith.addf %354, %373 : vector<24x32xf32>
    %375 = vector.extract_strided_slice %333 {offsets = [0, 16], sizes = [24, 8], strides = [1, 1]} : vector<24x32xf32> to vector<24x8xf32>
    %376 = vector.extract_strided_slice %334 {offsets = [0, 16], sizes = [24, 8], strides = [1, 1]} : vector<24x32xf32> to vector<24x8xf32>
    %377 = vector.extract_strided_slice %335 {offsets = [0, 16], sizes = [24, 8], strides = [1, 1]} : vector<24x32xf32> to vector<24x8xf32>
    %cst_152 = arith.constant dense<0.000000e+00> : vector<24x24xf32>
    %378 = tpu.matmul %375, %376, %cst_152 {dimension_numbers = #tpu.dot_dimension_numbers<[1], [1], [0], [0], [0, 0, 1, 0], [], []>} : vector<24x8xf32>, vector<24x8xf32>, vector<24x24xf32> -> vector<24x24xf32>
    %cst_153 = arith.constant 0.353553385 : f32
    %379 = vector.broadcast %cst_153 : f32 to vector<24x24xf32>
    %380 = arith.mulf %378, %379 : vector<24x24xf32>
    %381 = arith.addf %380, %10 : vector<24x24xf32>
    %cst_154 = arith.constant dense<0xFF800000> : vector<24xf32>
    %382 = vector.multi_reduction <maximumf>, %381, %cst_154 [1] : vector<24x24xf32> to vector<24xf32>
    %383 = vector.shape_cast %382 : vector<24xf32> to vector<24x1xf32>
    %384 = vector.broadcast %383 : vector<24x1xf32> to vector<24x24xf32>
    %385 = arith.subf %381, %384 : vector<24x24xf32>
    %386 = math.exp %385 : vector<24x24xf32>
    %cst_155 = arith.constant dense<0.000000e+00> : vector<24xf32>
    %387 = vector.multi_reduction <add>, %386, %cst_155 [1] : vector<24x24xf32> to vector<24xf32>
    %388 = vector.shape_cast %387 : vector<24xf32> to vector<24x1xf32>
    %389 = vector.broadcast %388 : vector<24x1xf32> to vector<24x24xf32>
    %390 = arith.divf %386, %389 : vector<24x24xf32>
    %cst_156 = arith.constant dense<0.000000e+00> : vector<24x8xf32>
    %391 = tpu.matmul %390, %377, %cst_156 {dimension_numbers = #tpu.dot_dimension_numbers<[1], [0], [0], [1], [0, 0, 1, 1], [], []>} : vector<24x24xf32>, vector<24x8xf32>, vector<24x8xf32> -> vector<24x8xf32>
    %392 = vector.extract_strided_slice %332 {offsets = [16, 0], sizes = [8, 32], strides = [1, 1]} : vector<32x32xf32> to vector<8x32xf32>
    %cst_157 = arith.constant dense<0.000000e+00> : vector<24x32xf32>
    %393 = tpu.matmul %391, %392, %cst_157 {dimension_numbers = #tpu.dot_dimension_numbers<[1], [0], [0], [1], [0, 0, 1, 1], [], []>} : vector<24x8xf32>, vector<8x32xf32>, vector<24x32xf32> -> vector<24x32xf32>
    %394 = arith.addf %374, %393 : vector<24x32xf32>
    %395 = vector.extract_strided_slice %333 {offsets = [0, 24], sizes = [24, 8], strides = [1, 1]} : vector<24x32xf32> to vector<24x8xf32>
    %396 = vector.extract_strided_slice %334 {offsets = [0, 24], sizes = [24, 8], strides = [1, 1]} : vector<24x32xf32> to vector<24x8xf32>
    %397 = vector.extract_strided_slice %335 {offsets = [0, 24], sizes = [24, 8], strides = [1, 1]} : vector<24x32xf32> to vector<24x8xf32>
    %cst_158 = arith.constant dense<0.000000e+00> : vector<24x24xf32>
    %398 = tpu.matmul %395, %396, %cst_158 {dimension_numbers = #tpu.dot_dimension_numbers<[1], [1], [0], [0], [0, 0, 1, 0], [], []>} : vector<24x8xf32>, vector<24x8xf32>, vector<24x24xf32> -> vector<24x24xf32>
    %cst_159 = arith.constant 0.353553385 : f32
    %399 = vector.broadcast %cst_159 : f32 to vector<24x24xf32>
    %400 = arith.mulf %398, %399 : vector<24x24xf32>
    %401 = arith.addf %400, %10 : vector<24x24xf32>
    %cst_160 = arith.constant dense<0xFF800000> : vector<24xf32>
    %402 = vector.multi_reduction <maximumf>, %401, %cst_160 [1] : vector<24x24xf32> to vector<24xf32>
    %403 = vector.shape_cast %402 : vector<24xf32> to vector<24x1xf32>
    %404 = vector.broadcast %403 : vector<24x1xf32> to vector<24x24xf32>
    %405 = arith.subf %401, %404 : vector<24x24xf32>
    %406 = math.exp %405 : vector<24x24xf32>
    %cst_161 = arith.constant dense<0.000000e+00> : vector<24xf32>
    %407 = vector.multi_reduction <add>, %406, %cst_161 [1] : vector<24x24xf32> to vector<24xf32>
    %408 = vector.shape_cast %407 : vector<24xf32> to vector<24x1xf32>
    %409 = vector.broadcast %408 : vector<24x1xf32> to vector<24x24xf32>
    %410 = arith.divf %406, %409 : vector<24x24xf32>
    %cst_162 = arith.constant dense<0.000000e+00> : vector<24x8xf32>
    %411 = tpu.matmul %410, %397, %cst_162 {dimension_numbers = #tpu.dot_dimension_numbers<[1], [0], [0], [1], [0, 0, 1, 1], [], []>} : vector<24x24xf32>, vector<24x8xf32>, vector<24x8xf32> -> vector<24x8xf32>
    %412 = vector.extract_strided_slice %332 {offsets = [24, 0], sizes = [8, 32], strides = [1, 1]} : vector<32x32xf32> to vector<8x32xf32>
    %cst_163 = arith.constant dense<0.000000e+00> : vector<24x32xf32>
    %413 = tpu.matmul %411, %412, %cst_163 {dimension_numbers = #tpu.dot_dimension_numbers<[1], [0], [0], [1], [0, 0, 1, 1], [], []>} : vector<24x8xf32>, vector<8x32xf32>, vector<24x32xf32> -> vector<24x32xf32>
    %414 = arith.addf %394, %413 : vector<24x32xf32>
    %415 = vector.extract_strided_slice %330 {offsets = [24, 0], sizes = [24, 32], strides = [1, 1]} : vector<48x96xf32> to vector<24x32xf32>
    %416 = vector.extract_strided_slice %330 {offsets = [24, 32], sizes = [24, 32], strides = [1, 1]} : vector<48x96xf32> to vector<24x32xf32>
    %417 = vector.extract_strided_slice %330 {offsets = [24, 64], sizes = [24, 32], strides = [1, 1]} : vector<48x96xf32> to vector<24x32xf32>
    %418 = vector.extract_strided_slice %415 {offsets = [0, 0], sizes = [24, 8], strides = [1, 1]} : vector<24x32xf32> to vector<24x8xf32>
    %419 = vector.extract_strided_slice %416 {offsets = [0, 0], sizes = [24, 8], strides = [1, 1]} : vector<24x32xf32> to vector<24x8xf32>
    %420 = vector.extract_strided_slice %417 {offsets = [0, 0], sizes = [24, 8], strides = [1, 1]} : vector<24x32xf32> to vector<24x8xf32>
    %cst_164 = arith.constant dense<0.000000e+00> : vector<24x24xf32>
    %421 = tpu.matmul %418, %419, %cst_164 {dimension_numbers = #tpu.dot_dimension_numbers<[1], [1], [0], [0], [0, 0, 1, 0], [], []>} : vector<24x8xf32>, vector<24x8xf32>, vector<24x24xf32> -> vector<24x24xf32>
    %cst_165 = arith.constant 0.353553385 : f32
    %422 = vector.broadcast %cst_165 : f32 to vector<24x24xf32>
    %423 = arith.mulf %421, %422 : vector<24x24xf32>
    %424 = arith.addf %423, %10 : vector<24x24xf32>
    %cst_166 = arith.constant dense<0xFF800000> : vector<24xf32>
    %425 = vector.multi_reduction <maximumf>, %424, %cst_166 [1] : vector<24x24xf32> to vector<24xf32>
    %426 = vector.shape_cast %425 : vector<24xf32> to vector<24x1xf32>
    %427 = vector.broadcast %426 : vector<24x1xf32> to vector<24x24xf32>
    %428 = arith.subf %424, %427 : vector<24x24xf32>
    %429 = math.exp %428 : vector<24x24xf32>
    %cst_167 = arith.constant dense<0.000000e+00> : vector<24xf32>
    %430 = vector.multi_reduction <add>, %429, %cst_167 [1] : vector<24x24xf32> to vector<24xf32>
    %431 = vector.shape_cast %430 : vector<24xf32> to vector<24x1xf32>
    %432 = vector.broadcast %431 : vector<24x1xf32> to vector<24x24xf32>
    %433 = arith.divf %429, %432 : vector<24x24xf32>
    %cst_168 = arith.constant dense<0.000000e+00> : vector<24x8xf32>
    %434 = tpu.matmul %433, %420, %cst_168 {dimension_numbers = #tpu.dot_dimension_numbers<[1], [0], [0], [1], [0, 0, 1, 1], [], []>} : vector<24x24xf32>, vector<24x8xf32>, vector<24x8xf32> -> vector<24x8xf32>
    %435 = vector.extract_strided_slice %332 {offsets = [0, 0], sizes = [8, 32], strides = [1, 1]} : vector<32x32xf32> to vector<8x32xf32>
    %cst_169 = arith.constant dense<0.000000e+00> : vector<24x32xf32>
    %436 = tpu.matmul %434, %435, %cst_169 {dimension_numbers = #tpu.dot_dimension_numbers<[1], [0], [0], [1], [0, 0, 1, 1], [], []>} : vector<24x8xf32>, vector<8x32xf32>, vector<24x32xf32> -> vector<24x32xf32>
    %437 = vector.extract_strided_slice %415 {offsets = [0, 8], sizes = [24, 8], strides = [1, 1]} : vector<24x32xf32> to vector<24x8xf32>
    %438 = vector.extract_strided_slice %416 {offsets = [0, 8], sizes = [24, 8], strides = [1, 1]} : vector<24x32xf32> to vector<24x8xf32>
    %439 = vector.extract_strided_slice %417 {offsets = [0, 8], sizes = [24, 8], strides = [1, 1]} : vector<24x32xf32> to vector<24x8xf32>
    %cst_170 = arith.constant dense<0.000000e+00> : vector<24x24xf32>
    %440 = tpu.matmul %437, %438, %cst_170 {dimension_numbers = #tpu.dot_dimension_numbers<[1], [1], [0], [0], [0, 0, 1, 0], [], []>} : vector<24x8xf32>, vector<24x8xf32>, vector<24x24xf32> -> vector<24x24xf32>
    %cst_171 = arith.constant 0.353553385 : f32
    %441 = vector.broadcast %cst_171 : f32 to vector<24x24xf32>
    %442 = arith.mulf %440, %441 : vector<24x24xf32>
    %443 = arith.addf %442, %10 : vector<24x24xf32>
    %cst_172 = arith.constant dense<0xFF800000> : vector<24xf32>
    %444 = vector.multi_reduction <maximumf>, %443, %cst_172 [1] : vector<24x24xf32> to vector<24xf32>
    %445 = vector.shape_cast %444 : vector<24xf32> to vector<24x1xf32>
    %446 = vector.broadcast %445 : vector<24x1xf32> to vector<24x24xf32>
    %447 = arith.subf %443, %446 : vector<24x24xf32>
    %448 = math.exp %447 : vector<24x24xf32>
    %cst_173 = arith.constant dense<0.000000e+00> : vector<24xf32>
    %449 = vector.multi_reduction <add>, %448, %cst_173 [1] : vector<24x24xf32> to vector<24xf32>
    %450 = vector.shape_cast %449 : vector<24xf32> to vector<24x1xf32>
    %451 = vector.broadcast %450 : vector<24x1xf32> to vector<24x24xf32>
    %452 = arith.divf %448, %451 : vector<24x24xf32>
    %cst_174 = arith.constant dense<0.000000e+00> : vector<24x8xf32>
    %453 = tpu.matmul %452, %439, %cst_174 {dimension_numbers = #tpu.dot_dimension_numbers<[1], [0], [0], [1], [0, 0, 1, 1], [], []>} : vector<24x24xf32>, vector<24x8xf32>, vector<24x8xf32> -> vector<24x8xf32>
    %454 = vector.extract_strided_slice %332 {offsets = [8, 0], sizes = [8, 32], strides = [1, 1]} : vector<32x32xf32> to vector<8x32xf32>
    %cst_175 = arith.constant dense<0.000000e+00> : vector<24x32xf32>
    %455 = tpu.matmul %453, %454, %cst_175 {dimension_numbers = #tpu.dot_dimension_numbers<[1], [0], [0], [1], [0, 0, 1, 1], [], []>} : vector<24x8xf32>, vector<8x32xf32>, vector<24x32xf32> -> vector<24x32xf32>
    %456 = arith.addf %436, %455 : vector<24x32xf32>
    %457 = vector.extract_strided_slice %415 {offsets = [0, 16], sizes = [24, 8], strides = [1, 1]} : vector<24x32xf32> to vector<24x8xf32>
    %458 = vector.extract_strided_slice %416 {offsets = [0, 16], sizes = [24, 8], strides = [1, 1]} : vector<24x32xf32> to vector<24x8xf32>
    %459 = vector.extract_strided_slice %417 {offsets = [0, 16], sizes = [24, 8], strides = [1, 1]} : vector<24x32xf32> to vector<24x8xf32>
    %cst_176 = arith.constant dense<0.000000e+00> : vector<24x24xf32>
    %460 = tpu.matmul %457, %458, %cst_176 {dimension_numbers = #tpu.dot_dimension_numbers<[1], [1], [0], [0], [0, 0, 1, 0], [], []>} : vector<24x8xf32>, vector<24x8xf32>, vector<24x24xf32> -> vector<24x24xf32>
    %cst_177 = arith.constant 0.353553385 : f32
    %461 = vector.broadcast %cst_177 : f32 to vector<24x24xf32>
    %462 = arith.mulf %460, %461 : vector<24x24xf32>
    %463 = arith.addf %462, %10 : vector<24x24xf32>
    %cst_178 = arith.constant dense<0xFF800000> : vector<24xf32>
    %464 = vector.multi_reduction <maximumf>, %463, %cst_178 [1] : vector<24x24xf32> to vector<24xf32>
    %465 = vector.shape_cast %464 : vector<24xf32> to vector<24x1xf32>
    %466 = vector.broadcast %465 : vector<24x1xf32> to vector<24x24xf32>
    %467 = arith.subf %463, %466 : vector<24x24xf32>
    %468 = math.exp %467 : vector<24x24xf32>
    %cst_179 = arith.constant dense<0.000000e+00> : vector<24xf32>
    %469 = vector.multi_reduction <add>, %468, %cst_179 [1] : vector<24x24xf32> to vector<24xf32>
    %470 = vector.shape_cast %469 : vector<24xf32> to vector<24x1xf32>
    %471 = vector.broadcast %470 : vector<24x1xf32> to vector<24x24xf32>
    %472 = arith.divf %468, %471 : vector<24x24xf32>
    %cst_180 = arith.constant dense<0.000000e+00> : vector<24x8xf32>
    %473 = tpu.matmul %472, %459, %cst_180 {dimension_numbers = #tpu.dot_dimension_numbers<[1], [0], [0], [1], [0, 0, 1, 1], [], []>} : vector<24x24xf32>, vector<24x8xf32>, vector<24x8xf32> -> vector<24x8xf32>
    %474 = vector.extract_strided_slice %332 {offsets = [16, 0], sizes = [8, 32], strides = [1, 1]} : vector<32x32xf32> to vector<8x32xf32>
    %cst_181 = arith.constant dense<0.000000e+00> : vector<24x32xf32>
    %475 = tpu.matmul %473, %474, %cst_181 {dimension_numbers = #tpu.dot_dimension_numbers<[1], [0], [0], [1], [0, 0, 1, 1], [], []>} : vector<24x8xf32>, vector<8x32xf32>, vector<24x32xf32> -> vector<24x32xf32>
    %476 = arith.addf %456, %475 : vector<24x32xf32>
    %477 = vector.extract_strided_slice %415 {offsets = [0, 24], sizes = [24, 8], strides = [1, 1]} : vector<24x32xf32> to vector<24x8xf32>
    %478 = vector.extract_strided_slice %416 {offsets = [0, 24], sizes = [24, 8], strides = [1, 1]} : vector<24x32xf32> to vector<24x8xf32>
    %479 = vector.extract_strided_slice %417 {offsets = [0, 24], sizes = [24, 8], strides = [1, 1]} : vector<24x32xf32> to vector<24x8xf32>
    %cst_182 = arith.constant dense<0.000000e+00> : vector<24x24xf32>
    %480 = tpu.matmul %477, %478, %cst_182 {dimension_numbers = #tpu.dot_dimension_numbers<[1], [1], [0], [0], [0, 0, 1, 0], [], []>} : vector<24x8xf32>, vector<24x8xf32>, vector<24x24xf32> -> vector<24x24xf32>
    %cst_183 = arith.constant 0.353553385 : f32
    %481 = vector.broadcast %cst_183 : f32 to vector<24x24xf32>
    %482 = arith.mulf %480, %481 : vector<24x24xf32>
    %483 = arith.addf %482, %10 : vector<24x24xf32>
    %cst_184 = arith.constant dense<0xFF800000> : vector<24xf32>
    %484 = vector.multi_reduction <maximumf>, %483, %cst_184 [1] : vector<24x24xf32> to vector<24xf32>
    %485 = vector.shape_cast %484 : vector<24xf32> to vector<24x1xf32>
    %486 = vector.broadcast %485 : vector<24x1xf32> to vector<24x24xf32>
    %487 = arith.subf %483, %486 : vector<24x24xf32>
    %488 = math.exp %487 : vector<24x24xf32>
    %cst_185 = arith.constant dense<0.000000e+00> : vector<24xf32>
    %489 = vector.multi_reduction <add>, %488, %cst_185 [1] : vector<24x24xf32> to vector<24xf32>
    %490 = vector.shape_cast %489 : vector<24xf32> to vector<24x1xf32>
    %491 = vector.broadcast %490 : vector<24x1xf32> to vector<24x24xf32>
    %492 = arith.divf %488, %491 : vector<24x24xf32>
    %cst_186 = arith.constant dense<0.000000e+00> : vector<24x8xf32>
    %493 = tpu.matmul %492, %479, %cst_186 {dimension_numbers = #tpu.dot_dimension_numbers<[1], [0], [0], [1], [0, 0, 1, 1], [], []>} : vector<24x24xf32>, vector<24x8xf32>, vector<24x8xf32> -> vector<24x8xf32>
    %494 = vector.extract_strided_slice %332 {offsets = [24, 0], sizes = [8, 32], strides = [1, 1]} : vector<32x32xf32> to vector<8x32xf32>
    %cst_187 = arith.constant dense<0.000000e+00> : vector<24x32xf32>
    %495 = tpu.matmul %493, %494, %cst_187 {dimension_numbers = #tpu.dot_dimension_numbers<[1], [0], [0], [1], [0, 0, 1, 1], [], []>} : vector<24x8xf32>, vector<8x32xf32>, vector<24x32xf32> -> vector<24x32xf32>
    %496 = arith.addf %476, %495 : vector<24x32xf32>
    %497 = tpu.concatenate %414, %496 in 0 : vector<24x32xf32>, vector<24x32xf32> -> vector<48x32xf32>
    %c1_188 = arith.constant 1 : index
    %c0_189 = arith.constant 0 : index
    %c0_190 = arith.constant 0 : index
    %498 = vector.load %arg8[%c1_188, %c0_189, %c0_190] : memref<2x1x32xf32, #tpu.memory_space<vmem>>, vector<1x1x32xf32>
    %499 = vector.shape_cast %498 : vector<1x1x32xf32> to vector<1x32xf32>
    %500 = vector.broadcast %499 : vector<1x32xf32> to vector<48x32xf32>
    %501 = arith.addf %497, %500 : vector<48x32xf32>
    %502 = arith.addf %297, %501 : vector<48x32xf32>
    %c1_191 = arith.constant 1 : index
    %c0_192 = arith.constant 0 : index
    %c0_193 = arith.constant 0 : index
    %503 = vector.load %arg9[%c1_191, %c0_192, %c0_193] : memref<2x1x32xf32, #tpu.memory_space<vmem>>, vector<1x1x32xf32>
    %504 = vector.shape_cast %503 : vector<1x1x32xf32> to vector<1x32xf32>
    %c1_194 = arith.constant 1 : index
    %c0_195 = arith.constant 0 : index
    %c0_196 = arith.constant 0 : index
    %505 = vector.load %arg10[%c1_194, %c0_195, %c0_196] : memref<2x1x32xf32, #tpu.memory_space<vmem>>, vector<1x1x32xf32>
    %506 = vector.shape_cast %505 : vector<1x1x32xf32> to vector<1x32xf32>
    %cst_197 = arith.constant dense<0.000000e+00> : vector<48xf32>
    %507 = vector.multi_reduction <add>, %502, %cst_197 [1] : vector<48x32xf32> to vector<48xf32>
    %508 = vector.shape_cast %507 : vector<48xf32> to vector<48x1xf32>
    %cst_198 = arith.constant 3.200000e+01 : f32
    %509 = vector.broadcast %cst_198 : f32 to vector<48x1xf32>
    %510 = arith.divf %508, %509 : vector<48x1xf32>
    %511 = vector.broadcast %510 : vector<48x1xf32> to vector<48x32xf32>
    %512 = arith.subf %502, %511 : vector<48x32xf32>
    %513 = arith.mulf %512, %512 : vector<48x32xf32>
    %cst_199 = arith.constant dense<0.000000e+00> : vector<48xf32>
    %514 = vector.multi_reduction <add>, %513, %cst_199 [1] : vector<48x32xf32> to vector<48xf32>
    %515 = vector.shape_cast %514 : vector<48xf32> to vector<48x1xf32>
    %cst_200 = arith.constant 3.200000e+01 : f32
    %516 = vector.broadcast %cst_200 : f32 to vector<48x1xf32>
    %517 = arith.divf %515, %516 : vector<48x1xf32>
    %518 = vector.broadcast %510 : vector<48x1xf32> to vector<48x32xf32>
    %519 = arith.subf %502, %518 : vector<48x32xf32>
    %cst_201 = arith.constant 9.99999997E-7 : f32
    %520 = vector.broadcast %cst_201 : f32 to vector<48x1xf32>
    %521 = arith.addf %517, %520 : vector<48x1xf32>
    %522 = math.rsqrt %521 : vector<48x1xf32>
    %523 = vector.broadcast %522 : vector<48x1xf32> to vector<48x32xf32>
    %524 = arith.mulf %519, %523 : vector<48x32xf32>
    %525 = vector.broadcast %504 : vector<1x32xf32> to vector<48x32xf32>
    %526 = arith.mulf %524, %525 : vector<48x32xf32>
    %527 = vector.broadcast %506 : vector<1x32xf32> to vector<48x32xf32>
    %528 = arith.addf %526, %527 : vector<48x32xf32>
    %c1_202 = arith.constant 1 : index
    %c0_203 = arith.constant 0 : index
    %c0_204 = arith.constant 0 : index
    %529 = vector.load %arg11[%c1_202, %c0_203, %c0_204] : memref<2x32x64xf32, #tpu.memory_space<vmem>>, vector<1x32x64xf32>
    %530 = vector.shape_cast %529 : vector<1x32x64xf32> to vector<32x64xf32>
    %cst_205 = arith.constant dense<0.000000e+00> : vector<48x64xf32>
    %531 = tpu.matmul %528, %530, %cst_205 {dimension_numbers = #tpu.dot_dimension_numbers<[1], [0], [0], [1], [0, 0, 1, 1], [], []>} : vector<48x32xf32>, vector<32x64xf32>, vector<48x64xf32> -> vector<48x64xf32>
    %c1_206 = arith.constant 1 : index
    %c0_207 = arith.constant 0 : index
    %c0_208 = arith.constant 0 : index
    %532 = vector.load %arg12[%c1_206, %c0_207, %c0_208] : memref<2x1x64xf32, #tpu.memory_space<vmem>>, vector<1x1x64xf32>
    %533 = vector.shape_cast %532 : vector<1x1x64xf32> to vector<1x64xf32>
    %534 = vector.broadcast %533 : vector<1x64xf32> to vector<48x64xf32>
    %535 = arith.addf %531, %534 : vector<48x64xf32>
    %cst_209 = arith.constant 5.000000e-01 : f32
    %536 = vector.broadcast %cst_209 : f32 to vector<48x64xf32>
    %537 = arith.mulf %536, %535 : vector<48x64xf32>
    %cst_210 = arith.constant 0.707106769 : f32
    %538 = vector.broadcast %cst_210 : f32 to vector<48x64xf32>
    %539 = arith.mulf %535, %538 : vector<48x64xf32>
    %cst_211 = arith.constant 0.000000e+00 : f32
    %540 = vector.broadcast %cst_211 : f32 to vector<48x64xf32>
    %541 = arith.cmpf oge, %539, %540 : vector<48x64xf32>
    %cst_212 = arith.constant 1.000000e+00 : f32
    %cst_213 = arith.constant -1.000000e+00 : f32
    %542 = vector.broadcast %cst_212 : f32 to vector<48x64xf32>
    %543 = vector.broadcast %cst_213 : f32 to vector<48x64xf32>
    %544 = arith.select %541, %542, %543 : vector<48x64xi1>, vector<48x64xf32>
    %545 = math.absf %539 : vector<48x64xf32>
    %cst_214 = arith.constant 0.327591091 : f32
    %546 = vector.broadcast %cst_214 : f32 to vector<48x64xf32>
    %547 = arith.mulf %546, %545 : vector<48x64xf32>
    %cst_215 = arith.constant 1.000000e+00 : f32
    %548 = vector.broadcast %cst_215 : f32 to vector<48x64xf32>
    %549 = arith.addf %548, %547 : vector<48x64xf32>
    %cst_216 = arith.constant 1.000000e+00 : f32
    %550 = vector.broadcast %cst_216 : f32 to vector<48x64xf32>
    %551 = arith.divf %550, %549 : vector<48x64xf32>
    %cst_217 = arith.constant 1.06140542 : f32
    %552 = vector.broadcast %cst_217 : f32 to vector<48x64xf32>
    %553 = arith.mulf %551, %552 : vector<48x64xf32>
    %cst_218 = arith.constant -1.45315206 : f32
    %554 = vector.broadcast %cst_218 : f32 to vector<48x64xf32>
    %555 = arith.addf %554, %553 : vector<48x64xf32>
    %556 = arith.mulf %551, %555 : vector<48x64xf32>
    %cst_219 = arith.constant 1.42141378 : f32
    %557 = vector.broadcast %cst_219 : f32 to vector<48x64xf32>
    %558 = arith.addf %557, %556 : vector<48x64xf32>
    %559 = arith.mulf %551, %558 : vector<48x64xf32>
    %cst_220 = arith.constant -0.284496725 : f32
    %560 = vector.broadcast %cst_220 : f32 to vector<48x64xf32>
    %561 = arith.addf %560, %559 : vector<48x64xf32>
    %562 = arith.mulf %551, %561 : vector<48x64xf32>
    %cst_221 = arith.constant 0.254829586 : f32
    %563 = vector.broadcast %cst_221 : f32 to vector<48x64xf32>
    %564 = arith.addf %563, %562 : vector<48x64xf32>
    %565 = arith.mulf %551, %564 : vector<48x64xf32>
    %cst_222 = arith.constant 0.000000e+00 : f32
    %566 = vector.broadcast %cst_222 : f32 to vector<48x64xf32>
    %567 = arith.subf %566, %545 : vector<48x64xf32>
    %568 = arith.mulf %567, %545 : vector<48x64xf32>
    %569 = math.exp %568 : vector<48x64xf32>
    %570 = arith.mulf %565, %569 : vector<48x64xf32>
    %cst_223 = arith.constant 1.000000e+00 : f32
    %571 = vector.broadcast %cst_223 : f32 to vector<48x64xf32>
    %572 = arith.subf %571, %570 : vector<48x64xf32>
    %573 = arith.mulf %544, %572 : vector<48x64xf32>
    %cst_224 = arith.constant 1.000000e+00 : f32
    %574 = vector.broadcast %cst_224 : f32 to vector<48x64xf32>
    %575 = arith.addf %574, %573 : vector<48x64xf32>
    %576 = arith.mulf %537, %575 : vector<48x64xf32>
    %c1_225 = arith.constant 1 : index
    %c0_226 = arith.constant 0 : index
    %c0_227 = arith.constant 0 : index
    %577 = vector.load %arg13[%c1_225, %c0_226, %c0_227] : memref<2x64x32xf32, #tpu.memory_space<vmem>>, vector<1x64x32xf32>
    %578 = vector.shape_cast %577 : vector<1x64x32xf32> to vector<64x32xf32>
    %cst_228 = arith.constant dense<0.000000e+00> : vector<48x32xf32>
    %579 = tpu.matmul %576, %578, %cst_228 {dimension_numbers = #tpu.dot_dimension_numbers<[1], [0], [0], [1], [0, 0, 1, 1], [], []>} : vector<48x64xf32>, vector<64x32xf32>, vector<48x32xf32> -> vector<48x32xf32>
    %c1_229 = arith.constant 1 : index
    %c0_230 = arith.constant 0 : index
    %c0_231 = arith.constant 0 : index
    %580 = vector.load %arg14[%c1_229, %c0_230, %c0_231] : memref<2x1x32xf32, #tpu.memory_space<vmem>>, vector<1x1x32xf32>
    %581 = vector.shape_cast %580 : vector<1x1x32xf32> to vector<1x32xf32>
    %582 = vector.broadcast %581 : vector<1x32xf32> to vector<48x32xf32>
    %583 = arith.addf %579, %582 : vector<48x32xf32>
    %584 = arith.addf %502, %583 : vector<48x32xf32>
    %585 = vector.extract_strided_slice %584 {offsets = [0, 0], sizes = [1, 32], strides = [1, 1]} : vector<48x32xf32> to vector<1x32xf32>
    %c0_232 = arith.constant 0 : index
    %c0_233 = arith.constant 0 : index
    %586 = vector.load %arg15[%c0_232, %c0_233] : memref<1x32xf32, #tpu.memory_space<vmem>>, vector<1x32xf32>
    %c0_234 = arith.constant 0 : index
    %c0_235 = arith.constant 0 : index
    %587 = vector.load %arg16[%c0_234, %c0_235] : memref<1x32xf32, #tpu.memory_space<vmem>>, vector<1x32xf32>
    %cst_236 = arith.constant dense<0.000000e+00> : vector<1xf32>
    %588 = vector.multi_reduction <add>, %585, %cst_236 [1] : vector<1x32xf32> to vector<1xf32>
    %589 = vector.shape_cast %588 : vector<1xf32> to vector<1x1xf32>
    %cst_237 = arith.constant 3.200000e+01 : f32
    %590 = vector.broadcast %cst_237 : f32 to vector<1x1xf32>
    %591 = arith.divf %589, %590 : vector<1x1xf32>
    %592 = vector.broadcast %591 : vector<1x1xf32> to vector<1x32xf32>
    %593 = arith.subf %585, %592 : vector<1x32xf32>
    %594 = arith.mulf %593, %593 : vector<1x32xf32>
    %cst_238 = arith.constant dense<0.000000e+00> : vector<1xf32>
    %595 = vector.multi_reduction <add>, %594, %cst_238 [1] : vector<1x32xf32> to vector<1xf32>
    %596 = vector.shape_cast %595 : vector<1xf32> to vector<1x1xf32>
    %cst_239 = arith.constant 3.200000e+01 : f32
    %597 = vector.broadcast %cst_239 : f32 to vector<1x1xf32>
    %598 = arith.divf %596, %597 : vector<1x1xf32>
    %599 = vector.broadcast %591 : vector<1x1xf32> to vector<1x32xf32>
    %600 = arith.subf %585, %599 : vector<1x32xf32>
    %cst_240 = arith.constant 9.99999997E-7 : f32
    %601 = vector.broadcast %cst_240 : f32 to vector<1x1xf32>
    %602 = arith.addf %598, %601 : vector<1x1xf32>
    %603 = math.rsqrt %602 : vector<1x1xf32>
    %604 = vector.broadcast %603 : vector<1x1xf32> to vector<1x32xf32>
    %605 = arith.mulf %600, %604 : vector<1x32xf32>
    %606 = arith.mulf %605, %586 : vector<1x32xf32>
    %607 = arith.addf %606, %587 : vector<1x32xf32>
    %c0_241 = arith.constant 0 : index
    %c0_242 = arith.constant 0 : index
    %608 = vector.load %arg17[%c0_241, %c0_242] : memref<32x10xf32, #tpu.memory_space<vmem>>, vector<32x10xf32>
    %cst_243 = arith.constant dense<0.000000e+00> : vector<1x10xf32>
    %609 = tpu.matmul %607, %608, %cst_243 {dimension_numbers = #tpu.dot_dimension_numbers<[1], [0], [0], [1], [0, 0, 1, 1], [], []>} : vector<1x32xf32>, vector<32x10xf32>, vector<1x10xf32> -> vector<1x10xf32>
    %c0_244 = arith.constant 0 : index
    %c0_245 = arith.constant 0 : index
    %610 = vector.load %arg18[%c0_244, %c0_245] : memref<1x10xf32, #tpu.memory_space<vmem>>, vector<1x10xf32>
    %611 = arith.addf %609, %610 : vector<1x10xf32>
    %c0_246 = arith.constant 0 : index
    %c0_247 = arith.constant 0 : index
    %612 = vector.load %arg19[%c0_246, %c0_247] : memref<2x10xf32, #tpu.memory_space<vmem>>, vector<1x10xf32>
    tpu.vector_store %arg19[%c0_246, %c0_247], %611 {strides = array<i32>} : memref<2x10xf32, #tpu.memory_space<vmem>>, vector<1x10xf32>,
    %613 = vector.extract_strided_slice %584 {offsets = [24, 0], sizes = [1, 32], strides = [1, 1]} : vector<48x32xf32> to vector<1x32xf32>
    %c0_248 = arith.constant 0 : index
    %c0_249 = arith.constant 0 : index
    %614 = vector.load %arg15[%c0_248, %c0_249] : memref<1x32xf32, #tpu.memory_space<vmem>>, vector<1x32xf32>
    %c0_250 = arith.constant 0 : index
    %c0_251 = arith.constant 0 : index
    %615 = vector.load %arg16[%c0_250, %c0_251] : memref<1x32xf32, #tpu.memory_space<vmem>>, vector<1x32xf32>
    %cst_252 = arith.constant dense<0.000000e+00> : vector<1xf32>
    %616 = vector.multi_reduction <add>, %613, %cst_252 [1] : vector<1x32xf32> to vector<1xf32>
    %617 = vector.shape_cast %616 : vector<1xf32> to vector<1x1xf32>
    %cst_253 = arith.constant 3.200000e+01 : f32
    %618 = vector.broadcast %cst_253 : f32 to vector<1x1xf32>
    %619 = arith.divf %617, %618 : vector<1x1xf32>
    %620 = vector.broadcast %619 : vector<1x1xf32> to vector<1x32xf32>
    %621 = arith.subf %613, %620 : vector<1x32xf32>
    %622 = arith.mulf %621, %621 : vector<1x32xf32>
    %cst_254 = arith.constant dense<0.000000e+00> : vector<1xf32>
    %623 = vector.multi_reduction <add>, %622, %cst_254 [1] : vector<1x32xf32> to vector<1xf32>
    %624 = vector.shape_cast %623 : vector<1xf32> to vector<1x1xf32>
    %cst_255 = arith.constant 3.200000e+01 : f32
    %625 = vector.broadcast %cst_255 : f32 to vector<1x1xf32>
    %626 = arith.divf %624, %625 : vector<1x1xf32>
    %627 = vector.broadcast %619 : vector<1x1xf32> to vector<1x32xf32>
    %628 = arith.subf %613, %627 : vector<1x32xf32>
    %cst_256 = arith.constant 9.99999997E-7 : f32
    %629 = vector.broadcast %cst_256 : f32 to vector<1x1xf32>
    %630 = arith.addf %626, %629 : vector<1x1xf32>
    %631 = math.rsqrt %630 : vector<1x1xf32>
    %632 = vector.broadcast %631 : vector<1x1xf32> to vector<1x32xf32>
    %633 = arith.mulf %628, %632 : vector<1x32xf32>
    %634 = arith.mulf %633, %614 : vector<1x32xf32>
    %635 = arith.addf %634, %615 : vector<1x32xf32>
    %c0_257 = arith.constant 0 : index
    %c0_258 = arith.constant 0 : index
    %636 = vector.load %arg17[%c0_257, %c0_258] : memref<32x10xf32, #tpu.memory_space<vmem>>, vector<32x10xf32>
    %cst_259 = arith.constant dense<0.000000e+00> : vector<1x10xf32>
    %637 = tpu.matmul %635, %636, %cst_259 {dimension_numbers = #tpu.dot_dimension_numbers<[1], [0], [0], [1], [0, 0, 1, 1], [], []>} : vector<1x32xf32>, vector<32x10xf32>, vector<1x10xf32> -> vector<1x10xf32>
    %c0_260 = arith.constant 0 : index
    %c0_261 = arith.constant 0 : index
    %638 = vector.load %arg18[%c0_260, %c0_261] : memref<1x10xf32, #tpu.memory_space<vmem>>, vector<1x10xf32>
    %639 = arith.addf %637, %638 : vector<1x10xf32>
    %c1_262 = arith.constant 1 : index
    %c0_263 = arith.constant 0 : index
    %640 = vector.load %arg19[%c1_262, %c0_263] : memref<2x10xf32, #tpu.memory_space<vmem>>, vector<1x10xf32>
    tpu.vector_store %arg19[%c1_262, %c0_263], %639 {strides = array<i32>} : memref<2x10xf32, #tpu.memory_space<vmem>>, vector<1x10xf32>,
    return
  }
}

</mosaic_0001>

<bundles_post_ra>
// kernel: vit_forward.1
= control target key start
LH: loop header
LB: loop body
LE: loop exit
PB: predicated region body
PF: predicated region fallthrough
CT: control target
= control target key end

     0   :  { %s11390_s0 = inlined_call_operand.vmem [shape: f32[48,64], index: 0, kind: input, shape index: {}]   ;;  %s11391_s1 = inlined_call_operand.vmem [shape: f32[48,32], index: 1, kind: input, shape index: {}]   ;;  %s11392_s2 = inlined_call_operand.vmem [shape: f32[64,32], index: 2, kind: input, shape index: {}]   ;;  %s11393_s3 = inlined_call_operand.vmem [shape: f32[2,1,32], index: 3, kind: input, shape index: {}]   ;;  %s11394_s4 = inlined_call_operand.vmem [shape: f32[2,1,32], index: 4, kind: input, shape index: {}]   ;;  %s11395_s5 = inlined_call_operand.vmem [shape: f32[2,32,96], index: 5, kind: input, shape index: {}]   ;;  %s11396_s6 = inlined_call_operand.vmem [shape: f32[2,1,96], index: 6, kind: input, shape index: {}]   ;;  %s11397_s7 = inlined_call_operand.vmem [shape: f32[2,32,32], index: 7, kind: input, shape index: {}]   ;;  %s11398_s8 = inlined_call_operand.vmem [shape: f32[2,1,32], index: 8, kind: input, shape index: {}]   ;;  %s11399_s9 = inlined_call_operand.vmem [shape: f32[2,1,32], index: 9, kind: input, shape index: {}]   ;;  %s11400_s10 = inlined_call_operand.vmem [shape: f32[2,1,32], index: 10, kind: input, shape index: {}]   ;;  %s11401_s11 = inlined_call_operand.vmem [shape: f32[2,32,64], index: 11, kind: input, shape index: {}]   ;;  %s11402_s12 = inlined_call_operand.vmem [shape: f32[2,1,64], index: 12, kind: input, shape index: {}]   ;;  %s11403_s13 = inlined_call_operand.vmem [shape: f32[2,64,32], index: 13, kind: input, shape index: {}]   ;;  %s11404_s14 = inlined_call_operand.vmem [shape: f32[2,1,32], index: 14, kind: input, shape index: {}]   ;;  %s11405_s15 = inlined_call_operand.vmem [shape: f32[1,32], index: 15, kind: input, shape index: {}]   ;;  %s11406_s16 = inlined_call_operand.vmem [shape: f32[1,32], index: 16, kind: input, shape index: {}]   ;;  %s11407_s17 = inlined_call_operand.vmem [shape: f32[32,10], index: 17, kind: input, shape index: {}]   ;;  %s11408_s18 = inlined_call_operand.vmem [shape: f32[1,10], index: 18, kind: input, shape index: {}]   ;;  %s11409_s19 = inlined_call_operand.hbm [shape: f32[2,10], index: 19, kind: output, shape index: {}]  }
   0x1   :  { %11424 = sst [smem:[#allocation5_spill]] %s11390_s0 }
   0x2   :  { %11425 = sst [smem:[#allocation6_spill]] %s11391_s1 }
   0x3   :  { %11426 = sst [smem:[#allocation7_spill]] %s11392_s2 }
   0x4   :  { %11427 = sst [smem:[#allocation8_spill]] %s11393_s3 }
   0x5   :  { %s11428_s20 = sld [smem:[#allocation7_spill]]  ;;  %vm83_vm0 = vcmask 523264   ;;  %s11429_s0 = sld [smem:[#allocation5_spill]] }
   0xb   :  { %v69_v0 = vld [vmem:[%s11428_s20] sm:$0xff]  ;;  %v70_v1 = vld [vmem:[%s11428_s20 + $0x8] sm:$0xff]  ;;  %v71_v2 = vld [vmem:[%s11428_s20 + $0x10] sm:$0xff] }
   0xc   :  { %v8708_v3 = vpack.c.bf16 %v70_v1, %v69_v0  ;;  %v72_v4 = vld [vmem:[%s11428_s20 + $0x18] sm:$0xff]  ;;  %v73_v6 = vld [vmem:[%s11428_s20 + $0x20] sm:$0xff]  ;;  %v74_v7 = vld [vmem:[%s11428_s20 + $0x28] sm:$0xff] }
   0xd   :  { %v8712_v5 = vpack.c.bf16 %v72_v4, %v71_v2  ;;  %v63_v8 = vld [vmem:[%s11429_s0] sm:$0xff]  ;;  %v8716_v9 = vpack.c.bf16 %v74_v7, %v73_v6 }
   0xe   :  { %8709 = vmatprep.subr.bf16.mxu0 %v8708_v3  ;;  %7903 = vmatprep.mubr.msk.f32.mxu0 %vm83_vm0, %v63_v8 }
   0xf   :  { %8711 = vmatpush3.bf16.msra.mxu0 %v8708_v3 }
  0x10   :  { %8713 = vmatprep.subr.bf16.mxu0 %v8712_v5 }
  0x11   :  { %24 = vsyncpa [#allocation3], 0  ;;  %v75_v10 = vld [vmem:[%s11428_s20 + $0x30] sm:$0xff]  ;;  %v76_v11 = vld [vmem:[%s11428_s20 + $0x38] sm:$0xff]  ;;  %s11430_s1 = sld [smem:[#allocation6_spill]]  ;;  %vm203_vm1 = vcmask 261120  }
  0x12   :  { %v8720_v12 = vpack.c.bf16 %v76_v11, %v75_v10  ;;  %v64_v13 = vld [vmem:[%s11429_s0 + $0x8] sm:$0xff]  ;;  %v65_v14 = vld [vmem:[%s11429_s0 + $0x10] sm:$0xff]  ;;  %v66_v15 = vld [vmem:[%s11429_s0 + $0x18] sm:$0xff]  ;;  %s11431_s25 = sld [smem:[#allocation8_spill]]  ;;  %s9407_s28 = smov 96   ;;  %vm9408_vm2 = vmmov 0  }
  0x13   :  { %8715 = vmatpush3.bf16.msra.mxu0 %v8712_v5  ;;  %v67_v16 = vld [vmem:[%s11429_s0 + $0x20] sm:$0xff]  ;;  %v68_v17 = vld [vmem:[%s11429_s0 + $0x28] sm:$0xff]  ;;  %v309_v1 = vld [vmem:[%s11395_s5 + $0x10] sm:$0xff]  ;;  %s9410_s29 = smov 120   ;;  %s9411_s30 = smov 88   ;;  %vm444_vm3 = vcmask 64512  }
  0x14   :  { %8717 = vmatprep.subr.bf16.mxu0 %v8716_v9  ;;  %v307_v62 = vld [vmem:[%s11395_s5] sm:$0xff]  ;;  %v308_v63 = vld [vmem:[%s11395_s5 + $0x8] sm:$0xff]  ;;  %v310_v2 = vld [vmem:[%s11395_s5 + $0x18] sm:$0xff]  ;;  %vm543_vm6 = vcmask 195584   ;;  %s9413_s21 = smov 64   ;;  %s9415_s22 = smov 80  }
  0x15   :  { %v8724_v0 = vpack.c.bf16 %v308_v63, %v307_v62  ;;  %v8728_v3 = vpack.c.bf16 %v310_v2, %v309_v1  ;;  %v9674_v1 = vld [vmem:[%s11396_s6] ss:$0 sm:$0xff]  ;;  %vm9711_vm4 = vmpackc.low %vm444_vm3, %vm444_vm3  ;;  %s11422_s2 = smov 112   ;;  %s11420_s20 = smov 48  }
  0x16   :  { %s11418_s26 = smov 72   ;;  %s11416_s27 = smov 104  }
  0x17   :  { %8719 = vmatpush3.bf16.msra.mxu0 %v8716_v9  ;;  %v77_v18 = vld [vmem:[%s11430_s1] sm:$0xff]  ;;  %v78_v20 = vld [vmem:[%s11430_s1 + $0x8] sm:$0xff]  ;;  %v80_v23 = vld [vmem:[%s11430_s1 + $0x18] sm:$0xff]  ;;  %8725 = vmatprep.subr.bf16.mxu1 %v8724_v0  ;;  %s11414_s0 = smov 40  }
  0x18   :  { %8721 = vmatprep.subr.bf16.mxu0 %v8720_v12  ;;  %v79_v24 = vld [vmem:[%s11430_s1 + $0x10] sm:$0xff]  ;;  %v81_v44 = vld [vmem:[%s11430_s1 + $0x20] sm:$0xff]  ;;  %v82_v53 = vld [vmem:[%s11430_s1 + $0x28] sm:$0xff]  ;;  %8727 = vmatpush3.bf16.msra.mxu1 %v8724_v0  ;;  %v9406_v0 = vmov 0.0|0.0   ;;  %s9414_s1 = smov 56  }
  0x19   :  { %8729 = vmatprep.subr.bf16.mxu1 %v8728_v3 }
  0x1b   :  { %8723 = vmatpush3.bf16.msra.mxu0 %v8720_v12 }
  0x1c   :  { %8731 = vmatpush3.bf16.msra.mxu1 %v8728_v3  ;;  %8736 = vmatprep.subr.bf16.mxu0 %v9406_v0 }
  0x1d   :  { %8732 = vmatprep.subr.bf16.mxu1 %v9406_v0 }
  0x1e   :  { %7904 = vmatmul.mubr.msk.f32.vlgmr.msra.gmra.mrb[0].mxu0 %vm83_vm0, %v64_v13 }
  0x1f   :  { %7906 = vmatprep.mubr.msk.f32.mxu0 %vm83_vm0, %v65_v14 }
  0x22   :  { %7907 = vmatmul.mubr.msk.f32.gmra.mrb[2].mxu0 %vm83_vm0, %v66_v15 }
  0x23   :  { %7909 = vmatprep.mubr.msk.f32.mxu0 %vm83_vm0, %v67_v16 }
  0x26   :  { %7910 = vmatmul.mubr.msk.f32.gmra.mrb[4].mxu0 %vm83_vm0, %v68_v17 }
  0xf1   :  { %v7905_v19 = vpop.f32.mrb[0].mxu0 }
  0xf2   :  { %v168_v21 = vpop.f32.mrb[1].mxu0  ;;  %v9585_v25 = vadd.f32 %v7905_v19, %v78_v20 }
  0xf3   :  { %v9577_v22 = vadd.f32 %v168_v21, %v77_v18 }
  0xf4   :  { %v207_v32 = vsel %vm203_vm1, %v9585_v25, 0.0 }
  0xf5   :  { %v7908_v26 = vpop.f32.mrb[2].mxu0  ;;  %v204_v27 = vsel %vm203_vm1, %v9577_v22, 0.0 }
  0xf6   :  { %v178_v28 = vpop.f32.mrb[3].mxu0  ;;  %205 = vadd.xlane.f32.xlu0 %v204_v27  ;;  %v9589_v29 = vadd.f32 %v7908_v26, %v80_v23  ;;  %v7265_v27 = vld [vmem:[%s11431_s25] ss:$0 sm:$0xff] }
  0xf7   :  { %v9591_v30 = vadd.f32 %v178_v28, %v79_v24 }
  0xf8   :  { %v213_v33 = vsel %vm203_vm1, %v9589_v29, 0.0 }
  0xf9   :  { %v210_v31 = vsel %vm203_vm1, %v9591_v30, 0.0  ;;  %v7911_v34 = vpop.f32.mrb[4].mxu0 }
  0xfa   :  { %211 = vadd.xlane.f32.xlu1 %v210_v31  ;;  %208 = vadd.xlane.f32.xlu0 %v207_v32  ;;  %v188_v35 = vpop.f32.mrb[5].mxu0  ;;  %v9628_v57 = vadd.f32 %v7911_v34, %v82_v53  ;;  %v7266_v32 = vld [vmem:[%s11394_s4] ss:$0 sm:$0xff] }
  0xfb   :  { %v9614_v50 = vadd.f32 %v188_v35, %v81_v44 }
  0xfc   :  { %v219_v61 = vsel %vm203_vm1, %v9628_v57, 0.0 }
  0xfd   :  { %v216_v58 = vsel %vm203_vm1, %v9614_v50, 0.0 }
  0xfe   :  { %214 = vadd.xlane.f32.xlu1 %v213_v33 }
 0x183   :  { %v206_v36 = vpop.xlane.xlu0 %205 }
 0x184   :  { %v223_v37 = vmul.f32 0.03125, %v206_v36 }
 0x186   :  { %v9600_v38 = vsub.f32 %v9577_v22, %v223_v37 }
 0x187   :  { %v212_v39 = vpop.xlane.xlu1 %211  ;;  %v209_v40 = vpop.xlane.xlu0 %208 }
 0x188   :  { %v225_v41 = vmul.f32 0.03125, %v212_v39  ;;  %v224_v42 = vmul.f32 0.03125, %v209_v40  ;;  %v235_v43 = vmul.f32 %v9600_v38, %v9600_v38 }
 0x18a   :  { %v9608_v45 = vsub.f32 %v9591_v30, %v225_v41  ;;  %v9611_v46 = vsub.f32 %v9585_v25, %v224_v42  ;;  %v241_v47 = vsel %vm203_vm1, %v235_v43, 0.0 }
 0x18b   :  { %v215_v48 = vpop.xlane.xlu1 %214  ;;  %242 = vadd.xlane.f32.xlu0 %v241_v47 }
 0x18c   :  { %v226_v49 = vmul.f32 0.03125, %v215_v48  ;;  %v237_v51 = vmul.f32 %v9608_v45, %v9608_v45  ;;  %v236_v52 = vmul.f32 %v9611_v46, %v9611_v46 }
 0x18e   :  { %v9624_v54 = vsub.f32 %v9589_v29, %v226_v49  ;;  %v247_v55 = vsel %vm203_vm1, %v237_v51, 0.0  ;;  %v244_v56 = vsel %vm203_vm1, %v236_v52, 0.0 }
 0x18f   :  { %248 = vadd.xlane.f32.xlu0 %v247_v55  ;;  %245 = vadd.xlane.f32.xlu1 %v244_v56 }
 0x190   :  { %v238_v59 = vmul.f32 %v9624_v54, %v9624_v54 }
 0x192   :  { %v250_v60 = vsel %vm203_vm1, %v238_v59, 0.0 }
 0x193   :  { %217 = vadd.xlane.f32.xlu0 %v216_v58  ;;  %251 = vadd.xlane.f32.xlu1 %v250_v60 }
 0x197   :  { %220 = vadd.xlane.f32.xlu1 %v219_v61 }
 0x218   :  { %v243_v4 = vpop.xlane.xlu0 %242 }
 0x219   :  { %v259_v5 = vmul.f32 0.03125, %v243_v4 }
 0x21b   :  { %v265_v6 = vadd.f32 1e-06, %v259_v5 }
 0x21c   :  { %v246_v7 = vpop.xlane.xlu1 %245  ;;  %v249_v8 = vpop.xlane.xlu0 %248 }
 0x21d   :  { %9089 = vrsqrt.f32 %v265_v6  ;;  %v260_v9 = vmul.f32 0.03125, %v246_v7  ;;  %v261_v10 = vmul.f32 0.03125, %v249_v8 }
 0x21f   :  { %v266_v11 = vadd.f32 1e-06, %v260_v9  ;;  %v267_v12 = vadd.f32 1e-06, %v261_v10  ;;  %v9409_v10 = vmov 0.0  }
 0x220   :  { %v252_v13 = vpop.xlane.xlu1 %251  ;;  %v218_v14 = vpop.xlane.xlu0 %217  ;;  %7950 = vmatprep.mubr.msk.f32.mxu0 %vm9408_vm2, %v9409_v10 }
 0x221   :  { %9091 = vrsqrt.f32 %v266_v11  ;;  %v262_v15 = vmul.f32 0.03125, %v252_v13  ;;  %v227_v16 = vmul.f32 0.03125, %v218_v14 }
 0x222   :  { %9093 = vrsqrt.f32 %v267_v12 }
 0x223   :  { %v268_v17 = vadd.f32 1e-06, %v262_v15  ;;  %v233_v18 = vsub.f32 %v9614_v50, %v227_v16 }
 0x224   :  { %v221_v19 = vpop.xlane.xlu1 %220 }
 0x225   :  { %9095 = vrsqrt.f32 %v268_v17  ;;  %v228_v20 = vmul.f32 0.03125, %v221_v19  ;;  %v239_v21 = vmul.f32 %v233_v18, %v233_v18 }
 0x227   :  { %v9090_v23 = vpop.eup %9089  ;;  %v234_v24 = vsub.f32 %v9628_v57, %v228_v20  ;;  %v253_v26 = vsel %vm203_vm1, %v239_v21, 0.0 }
 0x228   :  { %254 = vadd.xlane.f32.xlu0 %v253_v26  ;;  %v277_v28 = vmul.f32 %v9090_v23, %v9600_v38 }
 0x229   :  { %v240_v31 = vmul.f32 %v234_v24, %v234_v24 }
 0x22a   :  { %v289_v33 = vmul.f32 %v7265_v27, %v277_v28 }
 0x22b   :  { %v9092_v34 = vpop.eup %9091  ;;  %v256_v35 = vsel %vm203_vm1, %v240_v31, 0.0  ;;  %v197_v31 = vlaneseq }
 0x22c   :  { %v9094_v36 = vpop.eup %9093  ;;  %257 = vadd.xlane.f32.xlu1 %v256_v35  ;;  %v301_v37 = vadd.f32 %v7266_v32, %v289_v33  ;;  %v278_v39 = vmul.f32 %v9092_v34, %v9611_v46  ;;  %v9412_v34 = vmov -1e+30  }
 0x22d   :  { %v279_v40 = vmul.f32 %v9094_v36, %v9608_v45 }
 0x22e   :  { %7920 = vmatprep.mubr.msk.f32.mxu1 %vm203_vm1, %v301_v37  ;;  %v290_v41 = vmul.f32 %v7265_v27, %v278_v39 }
 0x22f   :  { %v9096_v38 = vpop.eup %9095  ;;  %v291_v42 = vmul.f32 %v7265_v27, %v279_v40 }
 0x230   :  { %v302_v43 = vadd.f32 %v7266_v32, %v290_v41  ;;  %v280_v44 = vmul.f32 %v9096_v38, %v9624_v54 }
 0x231   :  { %v303_v47 = vadd.f32 %v7266_v32, %v291_v42 }
 0x232   :  { %7921 = vmatmul.mubr.msk.f32.vlgmr.msra.gmra.mrb[0].mxu1 %vm203_vm1, %v302_v43  ;;  %v292_v48 = vmul.f32 %v7265_v27, %v280_v44 }
 0x233   :  { %7923 = vmatprep.mubr.msk.f32.mxu1 %vm203_vm1, %v303_v47 }
 0x234   :  { %v304_v49 = vadd.f32 %v7266_v32, %v292_v48 }
 0x236   :  { %7924 = vmatmul.mubr.msk.f32.gmra.mrb[2].mxu1 %vm203_vm1, %v304_v49 }
 0x2b5   :  { %v255_v46 = vpop.xlane.xlu0 %254 }
 0x2b6   :  { %v263_v51 = vmul.f32 0.03125, %v255_v46 }
 0x2b8   :  { %v269_v45 = vadd.f32 1e-06, %v263_v51 }
 0x2b9   :  { %v258_v52 = vpop.xlane.xlu1 %257 }
 0x2ba   :  { %9097 = vrsqrt.f32 %v269_v45  ;;  %v264_v53 = vmul.f32 0.03125, %v258_v52 }
 0x2bc   :  { %v270_v55 = vadd.f32 1e-06, %v264_v53 }
 0x2be   :  { %9099 = vrsqrt.f32 %v270_v55 }
 0x2c4   :  { %v9098_v56 = vpop.eup %9097 }
 0x2c5   :  { %v281_v58 = vmul.f32 %v9098_v56, %v233_v18 }
 0x2c7   :  { %v293_v54 = vmul.f32 %v7265_v27, %v281_v58 }
 0x2c8   :  { %v9100_v59 = vpop.eup %9099 }
 0x2c9   :  { %v305_v60 = vadd.f32 %v7266_v32, %v293_v54  ;;  %v282_v61 = vmul.f32 %v9100_v59, %v234_v24 }
 0x2cb   :  { %7926 = vmatprep.mubr.msk.f32.mxu1 %vm203_vm1, %v305_v60  ;;  %v294_v62 = vmul.f32 %v7265_v27, %v282_v61 }
 0x2cd   :  { %v306_v63 = vadd.f32 %v7266_v32, %v294_v62  ;;  %v198_v32 = vand.u32 127, %v197_v31 }
 0x2cf   :  { %7927 = vmatmul.mubr.msk.f32.gmra.mrb[4].mxu1 %vm203_vm1, %v306_v63  ;;  %vm199_vm5 = vcmp.lt.s32.totalorder %v198_v32, 17 }
 0x2d0   :  { %7935 = vmatprep.mubr.msk.f32.mxu1 %vm9408_vm2, %v9409_v10  ;;  %v9750_v35 = vsel %vm199_vm5, 0.0, %v9412_v34 }
 0x305   :  { %v7922_v2 = vpop.f32.mrb[0].mxu1 }
 0x306   :  { %v9677_v3 = vadd.f32 %v7922_v2, %v9674_v1  ;;  %v402_v4 = vpop.f32.mrb[1].mxu1 }
 0x307   :  { %v9680_v5 = vadd.f32 %v9674_v1, %v402_v4 }
 0x309   :  { %v9682_v6 = vpop.f32.mrb[2].mxu1  ;;  %v9686_v7 = vpack.i.bf16 %v9677_v3, %v9680_v5 }
 0x30a   :  { %v412_v8 = vpop.f32.mrb[3].mxu1 }
 0x30b   :  { %v9689_v9 = vadd.f32 %v9674_v1, %v412_v8  ;;  %8930 = vrot.lane.b32.xlu0 %v9686_v7, %s9407_s28 }
 0x30d   :  { %442 = vrot.lane.b32.xlu1 %v9689_v9, %s9407_s28 }
 0x30f   :  { %675 = vrot.lane.b32.xlu0 %v9680_v5, %s9410_s29 }
 0x311   :  { %8935 = vrot.lane.b32.xlu1 %v9686_v7, %s9411_s30 }
 0x313   :  { %679 = vrot.lane.b32.xlu0 %v9689_v9, %s9410_s29 }
 0x315   :  { %685 = vrot.lane.b32.xlu1 %v9689_v9, %s9411_s30 }
 0x319   :  { %677 = vrot.lane.b32.xlu1 %v9677_v3, %s9410_s29 }
 0x37d   :  { %v8931_v11 = vpop.permute.xlu0 %8930 }
 0x37e   :  { %v8933_v12 = vunpack.i.h.bf16 %v8931_v11  ;;  %v8932_v13 = vunpack.i.l.bf16 %v8931_v11 }
 0x37f   :  { %v443_v14 = vpop.permute.xlu1 %442 }
 0x380   :  { %v8733_v16 = vpack.c.bf16 %v8933_v12, %v8932_v13 }
 0x381   :  { %v676_v23 = vpop.permute.xlu0 %675 }
 0x382   :  { %8735 = vmatpush3.bf16.xpose.msk.msra.mxu1 %vm9711_vm4, %v8733_v16 }
 0x383   :  { %7933 = vmatprep.subr.mxu1 %v9409_v10  ;;  %v8936_v17 = vpop.permute.xlu1 %8935 }
 0x384   :  { %v8938_v18 = vunpack.i.h.bf16 %v8936_v17  ;;  %v8937_v19 = vunpack.i.l.bf16 %v8936_v17 }
 0x385   :  { %v680_v26 = vpop.permute.xlu0 %679 }
 0x386   :  { %v8740_v20 = vpack.c.bf16 %v8938_v18, %v8937_v19 }
 0x387   :  { %v686_v21 = vpop.permute.xlu1 %685 }
 0x38a   :  { %7934 = vmatpush3.xpose.msk.msra.mxu1 %vm444_vm3, %v443_v14 }
 0x38b   :  { %8739 = vmatprep.subr.bf16.mxu1 %v9406_v0  ;;  %v678_v24 = vpop.permute.xlu1 %677 }
 0x38d   :  { %7936 = vmatmul.mubr.msk.f32.vlgmr.msra.gmra.mrb[6].mxu1 %vm444_vm3, %v9680_v5 }
 0x38e   :  { %8742 = vmatpush3.bf16.xpose.msk.msra.mxu1 %vm9711_vm4, %v8740_v20  ;;  %7938 = vmatprep.mubr.msk.f32.mxu1 %vm9408_vm2, %v9409_v10 }
 0x38f   :  { %7963 = vmatprep.subr.mxu1 %v9409_v10 }
 0x391   :  { %7939 = vmatmul.mubr.msk.f32.gmra.mrb[8].mxu1 %vm444_vm3, %v9677_v3 }
 0x392   :  { %7941 = vmatprep.mubr.msk.f32.mxu1 %vm9408_vm2, %v9409_v10 }
 0x395   :  { %7942 = vmatmul.mubr.msk.f32.gmra.mrb[10].mxu1 %vm444_vm3, %v9689_v9 }
 0x396   :  { %7964 = vmatpush3.xpose.msk.msra.mxu1 %vm444_vm3, %v686_v21  ;;  %7965 = vmatprep.mubr.msk.f32.mxu1 %vm9408_vm2, %v9409_v10 }
 0x397   :  { %7989 = vmatprep.subr.mxu1 %v9409_v10 }
 0x399   :  { %7966 = vmatmul.mubr.msk.f32.vlgmr.msra.gmra.mrb[12].mxu1 %vm444_vm3, %v676_v23 }
 0x39a   :  { %7968 = vmatprep.mubr.msk.f32.mxu1 %vm9408_vm2, %v9409_v10 }
 0x39d   :  { %7969 = vmatmul.mubr.msk.f32.gmra.mrb[14].mxu1 %vm444_vm3, %v678_v24 }
 0x39e   :  { %7971 = vmatprep.mubr.msk.f32.mxu1 %vm9408_vm2, %v9409_v10 }
 0x3a1   :  { %7972 = vmatmul.mubr.msk.f32.gmra.mrb[16].mxu1 %vm444_vm3, %v680_v26 }
 0x3a2   :  { %v9744_v27 = vpop.f32.mrb[4].mxu1  ;;  %7991 = vmatprep.mubr.msk.f32.mxu1 %vm9408_vm2, %v9409_v10 }
 0x3a3   :  { %v9748_v28 = vpop.f32.mrb[5].mxu1 }
 0x460   :  { %v523_v33 = vpop.f32.mrb[6].mxu1 }
 0x461   :  { %v537_v36 = vmul.f32 0.35355338, %v523_v33  ;;  %v7937_v37 = vpop.f32.mrb[7].mxu1 }
 0x463   :  { %v540_v39 = vadd.f32 %v537_v36, %v9750_v35 }
 0x464   :  { %v528_v40 = vpop.f32.mrb[8].mxu1 }
 0x465   :  { %v538_v41 = vmul.f32 0.35355338, %v528_v40  ;;  %v7940_v38 = vpop.f32.mrb[9].mxu1  ;;  %v544_v42 = vsel %vm543_vm6, %v540_v39, -inf }
 0x466   :  { %545 = vmax.xlane.f32.xlu1 %v544_v42 }
 0x467   :  { %v541_v43 = vadd.f32 %v538_v41, %v9750_v35 }
 0x468   :  { %v533_v44 = vpop.f32.mrb[10].mxu1 }
 0x469   :  { %v539_v47 = vmul.f32 0.35355338, %v533_v44  ;;  %v7943_v48 = vpop.f32.mrb[11].mxu1  ;;  %v547_v49 = vsel %vm543_vm6, %v541_v43, -inf }
 0x46a   :  { %548 = vmax.xlane.f32.xlu0 %v547_v49 }
 0x46b   :  { %v542_v46 = vadd.f32 %v539_v47, %v9750_v35 }
 0x46c   :  { %v765_v51 = vpop.f32.mrb[12].mxu1 }
 0x46d   :  { %v779_v45 = vmul.f32 0.35355338, %v765_v51  ;;  %v7967_v52 = vpop.f32.mrb[13].mxu1  ;;  %v550_v53 = vsel %vm543_vm6, %v542_v46, -inf }
 0x46e   :  { %551 = vmax.xlane.f32.xlu0 %v550_v53 }
 0x46f   :  { %v782_v55 = vadd.f32 %v779_v45, %v9750_v35 }
 0x470   :  { %v770_v56 = vpop.f32.mrb[14].mxu1 }
 0x471   :  { %v780_v58 = vmul.f32 0.35355338, %v770_v56  ;;  %v7970_v54 = vpop.f32.mrb[15].mxu1  ;;  %v785_v59 = vsel %vm543_vm6, %v782_v55, -inf }
 0x472   :  { %786 = vmax.xlane.f32.xlu0 %v785_v59 }
 0x473   :  { %v783_v60 = vadd.f32 %v780_v58, %v9750_v35 }
 0x474   :  { %v775_v61 = vpop.f32.mrb[16].mxu1 }
 0x475   :  { %v781_v62 = vmul.f32 0.35355338, %v775_v61  ;;  %v7973_v63 = vpop.f32.mrb[17].mxu1  ;;  %v788_v2 = vsel %vm543_vm6, %v783_v60, -inf }
 0x476   :  { %789 = vmax.xlane.f32.xlu1 %v788_v2 }
 0x477   :  { %v784_v4 = vadd.f32 %v781_v62, %v9750_v35 }
 0x479   :  { %v791_v8 = vsel %vm543_vm6, %v784_v4, -inf }
 0x47a   :  { %792 = vmax.xlane.f32.xlu0 %v791_v8 }
 0x487   :  { %581 = vrot.lane.b32.xlu1 %v9689_v9, %s9413_s21 }
 0x490   :  { %8940 = vrot.lane.b32.xlu0 %v9686_v7, %s9413_s21 }
 0x4f3   :  { %v546_v11 = vpop.xlane.xlu1 %545 }
 0x4f4   :  { %v553_v12 = vsub.f32 %v540_v39, %v546_v11 }
 0x4f6   :  { %v556_v13 = vmul.f32 1.442695, %v553_v12 }
 0x4f7   :  { %v549_v14 = vpop.xlane.xlu0 %548 }
 0x4f8   :  { %9101 = vpow2.f32 %v556_v13  ;;  %v554_v16 = vsub.f32 %v541_v43, %v549_v14 }
 0x4fa   :  { %v558_v17 = vmul.f32 1.442695, %v554_v16 }
 0x4fb   :  { %v552_v18 = vpop.xlane.xlu0 %551 }
 0x4fc   :  { %9103 = vpow2.f32 %v558_v17  ;;  %v555_v19 = vsub.f32 %v542_v46, %v552_v18 }
 0x4fe   :  { %v560_v20 = vmul.f32 1.442695, %v555_v19 }
 0x4ff   :  { %v787_v21 = vpop.xlane.xlu0 %786 }
 0x500   :  { %9105 = vpow2.f32 %v560_v20  ;;  %v794_v23 = vsub.f32 %v782_v55, %v787_v21 }
 0x502   :  { %v9102_v24 = vpop.eup %9101  ;;  %v797_v26 = vmul.f32 1.442695, %v794_v23 }
 0x503   :  { %v790_v31 = vpop.xlane.xlu1 %789  ;;  %v562_v32 = vsel %vm543_vm6, %v9102_v24, 0.0 }
 0x504   :  { %9107 = vpow2.f32 %v797_v26  ;;  %v795_v33 = vsub.f32 %v783_v60, %v790_v31  ;;  %563 = vadd.xlane.f32.xlu1 %v562_v32  ;;  %v9813_v26 = vld [vmem:[%s11397_s7] sm:$0xff]  ;;  %v9820_v31 = vld [vmem:[%s11397_s7 + $0x8] sm:$0xff] }
 0x505   :  { %7990 = vmatpush3.msra.mxu1 %v9820_v31 }
 0x506   :  { %v9104_v34 = vpop.eup %9103  ;;  %v799_v36 = vmul.f32 1.442695, %v795_v33  ;;  %8746 = vmatprep.subr.bf16.mxu1 %v9406_v0 }
 0x507   :  { %v793_v37 = vpop.xlane.xlu0 %792  ;;  %v565_v39 = vsel %vm543_vm6, %v9104_v34, 0.0  ;;  %v582_v45 = vpop.permute.xlu1 %581 }
 0x508   :  { %9109 = vpow2.f32 %v799_v36  ;;  %v796_v40 = vsub.f32 %v784_v4, %v793_v37  ;;  %566 = vadd.xlane.f32.xlu0 %v565_v39 }
 0x50a   :  { %v9106_v41 = vpop.eup %9105  ;;  %v801_v38 = vmul.f32 1.442695, %v796_v40 }
 0x50b   :  { %v8941_v42 = vpop.permute.xlu0 %8940  ;;  %v568_v43 = vsel %vm543_vm6, %v9106_v41, 0.0 }
 0x50c   :  { %9111 = vpow2.f32 %v801_v38  ;;  %v8943_v44 = vunpack.i.h.bf16 %v8941_v42  ;;  %v8942_v47 = vunpack.i.l.bf16 %v8941_v42  ;;  %569 = vadd.xlane.f32.xlu1 %v568_v43 }
 0x50e   :  { %v9108_v48 = vpop.eup %9107  ;;  %v8737_v49 = vpack.c.bf16 %v8943_v44, %v8942_v47 }
 0x50f   :  { %v803_v46 = vsel %vm543_vm6, %v9108_v48, 0.0 }
 0x510   :  { %804 = vadd.xlane.f32.xlu0 %v803_v46  ;;  %8738 = vmatpush3.bf16.msra.mxu0 %v8737_v49 }
 0x511   :  { %7948 = vmatprep.subr.mxu0 %v9409_v10 }
 0x512   :  { %v9110_v51 = vpop.eup %9109 }
 0x513   :  { %v806_v52 = vsel %vm543_vm6, %v9110_v51, 0.0 }
 0x514   :  { %807 = vadd.xlane.f32.xlu1 %v806_v52  ;;  %7949 = vmatpush3.msra.mxu0 %v582_v45 }
 0x515   :  { %8743 = vmatprep.subr.bf16.mxu0 %v9406_v0 }
 0x516   :  { %v9112_v53 = vpop.eup %9111 }
 0x517   :  { %v809_v55 = vsel %vm543_vm6, %v9112_v53, 0.0 }
 0x518   :  { %810 = vadd.xlane.f32.xlu1 %v809_v55 }
 0x526   :  { %822 = vrot.lane.b32.xlu0 %v9689_v9, %s9414_s1 }
 0x529   :  { %8945 = vrot.lane.b32.xlu1 %v9686_v7, %s9414_s1 }
 0x52a   :  { %1104 = vrot.lane.b32.xlu0 %v9689_v9, %s9415_s22 }
 0x52d   :  { %8950 = vrot.lane.b32.xlu1 %v9686_v7, %s9415_s22 }
 0x52e   :  { %1096 = vrot.lane.b32.xlu0 %v9677_v3, %s11422_s2 }
 0x531   :  { %1094 = vrot.lane.b32.xlu1 %v9680_v5, %s11422_s2 }
 0x535   :  { %1098 = vrot.lane.b32.xlu1 %v9689_v9, %s11422_s2 }
 0x591   :  { %v564_v56 = vpop.xlane.xlu1 %563 }
 0x592   :  { %9113 = vrcp.f32 %v564_v56 }
 0x595   :  { %v567_v58 = vpop.xlane.xlu0 %566 }
 0x596   :  { %9115 = vrcp.f32 %v567_v58 }
 0x599   :  { %v570_v54 = vpop.xlane.xlu1 %569 }
 0x59a   :  { %9117 = vrcp.f32 %v570_v54 }
 0x59c   :  { %v9114_v59 = vpop.eup %9113 }
 0x59d   :  { %v572_v60 = vmul.f32 %v9114_v59, %v9102_v24  ;;  %v805_v62 = vpop.xlane.xlu0 %804 }
 0x59e   :  { %9119 = vrcp.f32 %v805_v62 }
 0x59f   :  { %7951 = vmatmul.mubr.msk.f32.vlgmr.msra.gmra.mrb[6].mxu0 %vm543_vm6, %v572_v60 }
 0x5a0   :  { %v9116_v61 = vpop.eup %9115  ;;  %7953 = vmatprep.mubr.msk.f32.mxu0 %vm9408_vm2, %v9409_v10 }
 0x5a1   :  { %v808_v63 = vpop.xlane.xlu1 %807  ;;  %v574_v2 = vmul.f32 %v9116_v61, %v9104_v34  ;;  %v823_v19 = vpop.permute.xlu0 %822 }
 0x5a2   :  { %9121 = vrcp.f32 %v808_v63 }
 0x5a3   :  { %7954 = vmatmul.mubr.msk.f32.gmra.mrb[8].mxu0 %vm543_vm6, %v574_v2 }
 0x5a4   :  { %v9118_v4 = vpop.eup %9117  ;;  %7956 = vmatprep.mubr.msk.f32.mxu0 %vm9408_vm2, %v9409_v10 }
 0x5a5   :  { %v811_v8 = vpop.xlane.xlu1 %810  ;;  %v576_v11 = vmul.f32 %v9118_v4, %v9106_v41  ;;  %v1105_v46 = vpop.permute.xlu0 %1104 }
 0x5a6   :  { %9123 = vrcp.f32 %v811_v8 }
 0x5a7   :  { %7957 = vmatmul.mubr.msk.f32.gmra.mrb[10].mxu0 %vm543_vm6, %v576_v11 }
 0x5a8   :  { %7980 = vmatprep.mubr.msk.f32.mxu0 %vm9408_vm2, %v9409_v10  ;;  %v9120_v17 = vpop.eup %9119 }
 0x5a9   :  { %v8946_v12 = vpop.permute.xlu1 %8945  ;;  %v813_v18 = vmul.f32 %v9120_v17, %v9108_v48  ;;  %v1097_v52 = vpop.permute.xlu0 %1096 }
 0x5aa   :  { %v8948_v13 = vunpack.i.h.bf16 %v8946_v12  ;;  %v8947_v14 = vunpack.i.l.bf16 %v8946_v12 }
 0x5ac   :  { %v8744_v16 = vpack.c.bf16 %v8948_v13, %v8947_v14  ;;  %v9122_v20 = vpop.eup %9121 }
 0x5ad   :  { %v815_v21 = vmul.f32 %v9122_v20, %v9110_v51  ;;  %v8951_v40 = vpop.permute.xlu1 %8950 }
 0x5ae   :  { %8745 = vmatpush3.bf16.msra.mxu0 %v8744_v16  ;;  %v8953_v41 = vunpack.i.h.bf16 %v8951_v40  ;;  %v8952_v38 = vunpack.i.l.bf16 %v8951_v40 }
 0x5af   :  { %7978 = vmatprep.subr.mxu0 %v9409_v10 }
 0x5b0   :  { %v9124_v23 = vpop.eup %9123  ;;  %v8747_v42 = vpack.c.bf16 %v8953_v41, %v8952_v38 }
 0x5b1   :  { %v817_v24 = vmul.f32 %v9124_v23, %v9112_v53  ;;  %v1095_v45 = vpop.permute.xlu1 %1094 }
 0x5b2   :  { %7979 = vmatpush3.msra.mxu0 %v823_v19 }
 0x5b3   :  { %7981 = vmatmul.mubr.msk.f32.vlgmr.msra.gmra.mrb[12].mxu0 %vm543_vm6, %v813_v18  ;;  %8000 = vmatprep.subr.mxu0 %v9409_v10 }
 0x5b4   :  { %7983 = vmatprep.mubr.msk.f32.mxu0 %vm9408_vm2, %v9409_v10  ;;  %8001 = vmatpush3.msra.mxu0 %v9813_v26 }
 0x5b5   :  { %8750 = vmatprep.subr.bf16.mxu0 %v9406_v0  ;;  %v1099_v53 = vpop.permute.xlu1 %1098 }
 0x5b7   :  { %7984 = vmatmul.mubr.msk.f32.gmra.mrb[14].mxu0 %vm543_vm6, %v815_v21 }
 0x5b8   :  { %7986 = vmatprep.mubr.msk.f32.mxu0 %vm9408_vm2, %v9409_v10 }
 0x5bb   :  { %7987 = vmatmul.mubr.msk.f32.gmra.mrb[16].mxu0 %vm543_vm6, %v817_v24 }
 0x5bc   :  { %8002 = vmatprep.mubr.msk.f32.mxu0 %vm9408_vm2, %v9409_v10 }
 0x672   :  { %v661_v32 = vpop.f32.mrb[6].mxu0 }
 0x673   :  { %v7952_v33 = vpop.f32.mrb[7].mxu0  ;;  %8003 = vmatmul.mubr.msk.f32.vlgmr.msra.gmra.mrb[18].mxu0 %vm444_vm3, %v661_v32 }
 0x674   :  { %8005 = vmatprep.mubr.msk.f32.mxu0 %vm9408_vm2, %v9409_v10 }
 0x676   :  { %v666_v34 = vpop.f32.mrb[8].mxu0 }
 0x677   :  { %v7955_v36 = vpop.f32.mrb[9].mxu0  ;;  %8006 = vmatmul.mubr.msk.f32.gmra.mrb[20].mxu0 %vm444_vm3, %v666_v34 }
 0x678   :  { %8008 = vmatprep.mubr.msk.f32.mxu0 %vm9408_vm2, %v9409_v10 }
 0x67a   :  { %v671_v37 = vpop.f32.mrb[10].mxu0 }
 0x67b   :  { %v7958_v39 = vpop.f32.mrb[11].mxu0  ;;  %8009 = vmatmul.mubr.msk.f32.gmra.mrb[22].mxu0 %vm444_vm3, %v671_v37 }
 0x67c   :  { %8032 = vmatprep.mubr.msk.f32.mxu0 %vm9408_vm2, %v9409_v10 }
 0x686   :  { %v902_v43 = vpop.f32.mrb[12].mxu0 }
 0x687   :  { %v7982_v44 = vpop.f32.mrb[13].mxu0  ;;  %7992 = vmatmul.mubr.msk.f32.vlgmr.msra.gmra.mrb[18].mxu1 %vm444_vm3, %v902_v43 }
 0x688   :  { %8749 = vmatpush3.bf16.xpose.msk.msra.mxu1 %vm9711_vm4, %v8747_v42  ;;  %7994 = vmatprep.mubr.msk.f32.mxu1 %vm9408_vm2, %v9409_v10 }
 0x689   :  { %8015 = vmatprep.subr.mxu1 %v9409_v10 }
 0x68a   :  { %v907_v47 = vpop.f32.mrb[14].mxu0 }
 0x68b   :  { %v7985_v48 = vpop.f32.mrb[15].mxu0  ;;  %7995 = vmatmul.mubr.msk.f32.gmra.mrb[20].mxu1 %vm444_vm3, %v907_v47 }
 0x68c   :  { %7997 = vmatprep.mubr.msk.f32.mxu1 %vm9408_vm2, %v9409_v10 }
 0x68e   :  { %v912_v49 = vpop.f32.mrb[16].mxu0 }
 0x68f   :  { %v7988_v51 = vpop.f32.mrb[17].mxu0  ;;  %7998 = vmatmul.mubr.msk.f32.gmra.mrb[22].mxu1 %vm444_vm3, %v912_v49 }
 0x690   :  { %8016 = vmatpush3.xpose.msk.msra.mxu1 %vm444_vm3, %v1105_v46  ;;  %8017 = vmatprep.mubr.msk.f32.mxu1 %vm9408_vm2, %v9409_v10 }
 0x691   :  { %8041 = vmatprep.subr.mxu1 %v9409_v10 }
 0x693   :  { %8018 = vmatmul.mubr.msk.f32.vlgmr.msra.gmra.mrb[24].mxu1 %vm444_vm3, %v1095_v45 }
 0x694   :  { %8020 = vmatprep.mubr.msk.f32.mxu1 %vm9408_vm2, %v9409_v10 }
 0x697   :  { %8021 = vmatmul.mubr.msk.f32.gmra.mrb[26].mxu1 %vm444_vm3, %v1097_v52 }
 0x698   :  { %8023 = vmatprep.mubr.msk.f32.mxu1 %vm9408_vm2, %v9409_v10 }
 0x69b   :  { %8024 = vmatmul.mubr.msk.f32.gmra.mrb[28].mxu1 %vm444_vm3, %v1099_v53 }
 0x69c   :  { %8043 = vmatprep.mubr.msk.f32.mxu1 %vm9408_vm2, %v9409_v10 }
 0x746   :  { %v1080_v55 = vpop.f32.mrb[18].mxu0 }
 0x747   :  { %v8004_v56 = vpop.f32.mrb[19].mxu0 }
 0x74a   :  { %v1085_v58 = vpop.f32.mrb[20].mxu0 }
 0x74b   :  { %v8007_v54 = vpop.f32.mrb[21].mxu0 }
 0x74e   :  { %v1090_v59 = vpop.f32.mrb[22].mxu0 }
 0x74f   :  { %v8010_v60 = vpop.f32.mrb[23].mxu0 }
 0x75a   :  { %v991_v61 = vpop.f32.mrb[18].mxu1 }
 0x75b   :  { %v9856_v62 = vadd.f32 %v1080_v55, %v991_v61  ;;  %v7993_v63 = vpop.f32.mrb[19].mxu1 }
 0x75e   :  { %v996_v2 = vpop.f32.mrb[20].mxu1 }
 0x75f   :  { %v9858_v4 = vadd.f32 %v1085_v58, %v996_v2  ;;  %v7996_v8 = vpop.f32.mrb[21].mxu1 }
 0x762   :  { %v1001_v11 = vpop.f32.mrb[22].mxu1 }
 0x763   :  { %v9860_v12 = vadd.f32 %v1090_v59, %v1001_v11  ;;  %v7999_v13 = vpop.f32.mrb[23].mxu1 }
 0x766   :  { %v1184_v14 = vpop.f32.mrb[24].mxu1 }
 0x767   :  { %v1198_v16 = vmul.f32 0.35355338, %v1184_v14  ;;  %v8019_v17 = vpop.f32.mrb[25].mxu1 }
 0x769   :  { %v1201_v18 = vadd.f32 %v1198_v16, %v9750_v35 }
 0x76a   :  { %v1189_v19 = vpop.f32.mrb[26].mxu1 }
 0x76b   :  { %v1199_v20 = vmul.f32 0.35355338, %v1189_v19  ;;  %v8022_v21 = vpop.f32.mrb[27].mxu1  ;;  %v1204_v23 = vsel %vm543_vm6, %v1201_v18, -inf }
 0x76c   :  { %1205 = vmax.xlane.f32.xlu0 %v1204_v23 }
 0x76d   :  { %v1202_v24 = vadd.f32 %v1199_v20, %v9750_v35 }
 0x76e   :  { %v1194_v32 = vpop.f32.mrb[28].mxu1 }
 0x76f   :  { %v1200_v33 = vmul.f32 0.35355338, %v1194_v32  ;;  %v8025_v34 = vpop.f32.mrb[29].mxu1  ;;  %v1207_v36 = vsel %vm543_vm6, %v1202_v24, -inf  ;;  %v9913_v32 = vld [vmem:[%s11397_s7 + $0x10] sm:$0xff] }
 0x770   :  { %1208 = vmax.xlane.f32.xlu1 %v1207_v36  ;;  %8042 = vmatpush3.msra.mxu1 %v9913_v32 }
 0x771   :  { %v1203_v37 = vadd.f32 %v1200_v33, %v9750_v35  ;;  %8757 = vmatprep.subr.bf16.mxu1 %v9406_v0 }
 0x773   :  { %v1210_v39 = vsel %vm543_vm6, %v1203_v37, -inf }
 0x774   :  { %1211 = vmax.xlane.f32.xlu0 %v1210_v39 }
 0x781   :  { %1241 = vrot.lane.b32.xlu1 %v9689_v9, %s11420_s20 }
 0x785   :  { %8960 = vrot.lane.b32.xlu1 %v9686_v7, %s11418_s26 }
 0x789   :  { %1437 = vrot.lane.b32.xlu1 %v9689_v9, %s11418_s26 }
 0x7f9   :  { %v1206_v40 = vpop.xlane.xlu0 %1205 }
 0x7fa   :  { %v1213_v41 = vsub.f32 %v1201_v18, %v1206_v40 }
 0x7fc   :  { %v1216_v38 = vmul.f32 1.442695, %v1213_v41 }
 0x7fd   :  { %v1209_v42 = vpop.xlane.xlu1 %1208 }
 0x7fe   :  { %9125 = vpow2.f32 %v1216_v38  ;;  %v1214_v43 = vsub.f32 %v1202_v24, %v1209_v42 }
 0x800   :  { %v1218_v44 = vmul.f32 1.442695, %v1214_v43 }
 0x801   :  { %v1212_v47 = vpop.xlane.xlu0 %1211  ;;  %v1242_v56 = vpop.permute.xlu1 %1241 }
 0x802   :  { %9127 = vpow2.f32 %v1218_v44  ;;  %v1215_v48 = vsub.f32 %v1203_v37, %v1212_v47 }
 0x804   :  { %v1220_v49 = vmul.f32 1.442695, %v1215_v48 }
 0x805   :  { %v8961_v58 = vpop.permute.xlu1 %8960 }
 0x806   :  { %9129 = vpow2.f32 %v1220_v49  ;;  %v8963_v14 = vunpack.i.h.bf16 %v8961_v58  ;;  %v8962_v16 = vunpack.i.l.bf16 %v8961_v58 }
 0x808   :  { %v9126_v46 = vpop.eup %9125  ;;  %v8754_v19 = vpack.c.bf16 %v8963_v14, %v8962_v16 }
 0x809   :  { %v1222_v51 = vsel %vm543_vm6, %v9126_v46, 0.0  ;;  %v1438_v59 = vpop.permute.xlu1 %1437 }
 0x80a   :  { %1223 = vadd.xlane.f32.xlu0 %v1222_v51 }
 0x80c   :  { %v9128_v45 = vpop.eup %9127 }
 0x80d   :  { %v1225_v52 = vsel %vm543_vm6, %v9128_v45, 0.0 }
 0x80e   :  { %1226 = vadd.xlane.f32.xlu0 %v1225_v52 }
 0x810   :  { %v9130_v53 = vpop.eup %9129 }
 0x811   :  { %v1228_v55 = vsel %vm543_vm6, %v9130_v53, 0.0 }
 0x812   :  { %1229 = vadd.xlane.f32.xlu1 %v1228_v55 }
 0x823   :  { %1429 = vrot.lane.b32.xlu1 %v9677_v3, %s11416_s27 }
 0x824   :  { %8955 = vrot.lane.b32.xlu0 %v9686_v7, %s11420_s20 }
 0x828   :  { %1427 = vrot.lane.b32.xlu0 %v9680_v5, %s11416_s27 }
 0x82c   :  { %1431 = vrot.lane.b32.xlu0 %v9689_v9, %s11416_s27 }
 0x897   :  { %v1224_v54 = vpop.xlane.xlu0 %1223 }
 0x898   :  { %9131 = vrcp.f32 %v1224_v54 }
 0x89b   :  { %v1227_v60 = vpop.xlane.xlu0 %1226 }
 0x89c   :  { %9133 = vrcp.f32 %v1227_v60 }
 0x89f   :  { %v1230_v61 = vpop.xlane.xlu1 %1229  ;;  %v8956_v63 = vpop.permute.xlu0 %8955 }
 0x8a0   :  { %v8958_v2 = vunpack.i.h.bf16 %v8956_v63  ;;  %v8957_v3 = vunpack.i.l.bf16 %v8956_v63  ;;  %9135 = vrcp.f32 %v1230_v61 }
 0x8a2   :  { %v8751_v8 = vpack.c.bf16 %v8958_v2, %v8957_v3  ;;  %v9132_v11 = vpop.eup %9131 }
 0x8a3   :  { %v1232_v5 = vmul.f32 %v9132_v11, %v9126_v46  ;;  %v1428_v21 = vpop.permute.xlu0 %1427  ;;  %v1430_v23 = vpop.permute.xlu1 %1429 }
 0x8a4   :  { %8752 = vmatpush3.bf16.msra.mxu0 %v8751_v8 }
 0x8a5   :  { %8030 = vmatprep.subr.mxu0 %v9409_v10 }
 0x8a6   :  { %v9134_v13 = vpop.eup %9133 }
 0x8a7   :  { %v1234_v17 = vmul.f32 %v9134_v13, %v9128_v45  ;;  %v1432_v24 = vpop.permute.xlu0 %1431 }
 0x8a8   :  { %8031 = vmatpush3.msra.mxu0 %v1242_v56 }
 0x8a9   :  { %8033 = vmatmul.mubr.msk.f32.vlgmr.msra.gmra.mrb[24].mxu0 %vm543_vm6, %v1232_v5  ;;  %8753 = vmatprep.subr.bf16.mxu0 %v9406_v0 }
 0x8aa   :  { %8035 = vmatprep.mubr.msk.f32.mxu0 %vm9408_vm2, %v9409_v10  ;;  %v9136_v18 = vpop.eup %9135 }
 0x8ab   :  { %v1236_v20 = vmul.f32 %v9136_v18, %v9130_v53 }
 0x8ad   :  { %8036 = vmatmul.mubr.msk.f32.gmra.mrb[26].mxu0 %vm543_vm6, %v1234_v17 }
 0x8ae   :  { %8038 = vmatprep.mubr.msk.f32.mxu0 %vm9408_vm2, %v9409_v10 }
 0x8af   :  { %8756 = vmatpush3.bf16.xpose.msk.msra.mxu0 %vm9711_vm4, %v8754_v19 }
 0x8b0   :  { %8056 = vmatprep.subr.mxu0 %v9409_v10 }
 0x8b1   :  { %8039 = vmatmul.mubr.msk.f32.gmra.mrb[28].mxu0 %vm543_vm6, %v1236_v20 }
 0x8b2   :  { %8058 = vmatprep.mubr.msk.f32.mxu0 %vm9408_vm2, %v9409_v10 }
 0x8b7   :  { %8057 = vmatpush3.xpose.msk.msra.mxu0 %vm444_vm3, %v1438_v59 }
 0x8b8   :  { %8082 = vmatprep.subr.mxu0 %v9409_v10 }
 0x8ba   :  { %8059 = vmatmul.mubr.msk.f32.vlgmr.msra.gmra.mrb[30].mxu0 %vm444_vm3, %v1428_v21  ;;  %v9940_v21 = vadd.f32 %v9674_v1, %v9748_v28 }
 0x8bb   :  { %8061 = vmatprep.mubr.msk.f32.mxu0 %vm9408_vm2, %v9409_v10 }
 0x8be   :  { %8062 = vmatmul.mubr.msk.f32.gmra.mrb[32].mxu0 %vm444_vm3, %v1430_v23  ;;  %v9944_v23 = vadd.f32 %v9682_v6, %v9674_v1 }
 0x8bf   :  { %8064 = vmatprep.mubr.msk.f32.mxu0 %vm9408_vm2, %v9409_v10 }
 0x8c2   :  { %8065 = vmatmul.mubr.msk.f32.gmra.mrb[34].mxu0 %vm444_vm3, %v1432_v24  ;;  %v9948_v24 = vpack.i.bf16 %v9940_v21, %v9944_v23 }
 0x8c3   :  { %8084 = vmatprep.mubr.msk.f32.mxu0 %vm9408_vm2, %v9409_v10 }
 0x97c   :  { %v1321_v33 = vpop.f32.mrb[24].mxu0 }
 0x97d   :  { %v8034_v34 = vpop.f32.mrb[25].mxu0  ;;  %8044 = vmatmul.mubr.msk.f32.vlgmr.msra.gmra.mrb[30].mxu1 %vm444_vm3, %v1321_v33  ;;  %v9954_v33 = vadd.f32 %v9744_v27, %v9674_v1 }
 0x97e   :  { %8046 = vmatprep.mubr.msk.f32.mxu1 %vm9408_vm2, %v9409_v10 }
 0x980   :  { %v1326_v36 = vpop.f32.mrb[26].mxu0 }
 0x981   :  { %v8037_v37 = vpop.f32.mrb[27].mxu0  ;;  %8047 = vmatmul.mubr.msk.f32.gmra.mrb[32].mxu1 %vm444_vm3, %v1326_v36 }
 0x982   :  { %8049 = vmatprep.mubr.msk.f32.mxu1 %vm9408_vm2, %v9409_v10 }
 0x984   :  { %v1331_v39 = vpop.f32.mrb[28].mxu0 }
 0x985   :  { %v8040_v40 = vpop.f32.mrb[29].mxu0  ;;  %8050 = vmatmul.mubr.msk.f32.gmra.mrb[34].mxu1 %vm444_vm3, %v1331_v39 }
 0x986   :  { %8073 = vmatprep.mubr.msk.f32.mxu1 %vm9408_vm2, %v9409_v10 }
 0x98d   :  { %v1517_v41 = vpop.f32.mrb[30].mxu0 }
 0x98e   :  { %v1531_v38 = vmul.f32 0.35355338, %v1517_v41  ;;  %v8060_v42 = vpop.f32.mrb[31].mxu0 }
 0x990   :  { %v1534_v43 = vadd.f32 %v1531_v38, %v9750_v35 }
 0x991   :  { %v1522_v44 = vpop.f32.mrb[32].mxu0 }
 0x992   :  { %v1532_v47 = vmul.f32 0.35355338, %v1522_v44  ;;  %v8063_v48 = vpop.f32.mrb[33].mxu0  ;;  %v1537_v49 = vsel %vm543_vm6, %v1534_v43, -inf }
 0x993   :  { %1538 = vmax.xlane.f32.xlu1 %v1537_v49 }
 0x994   :  { %v1535_v46 = vadd.f32 %v1532_v47, %v9750_v35 }
 0x995   :  { %v1527_v51 = vpop.f32.mrb[34].mxu0 }
 0x996   :  { %v1533_v45 = vmul.f32 0.35355338, %v1527_v51  ;;  %v8066_v52 = vpop.f32.mrb[35].mxu0  ;;  %v1540_v53 = vsel %vm543_vm6, %v1535_v46, -inf }
 0x997   :  { %1541 = vmax.xlane.f32.xlu0 %v1540_v53 }
 0x998   :  { %v1536_v55 = vadd.f32 %v1533_v45, %v9750_v35 }
 0x99a   :  { %v1543_v56 = vsel %vm543_vm6, %v1536_v55, -inf }
 0x99b   :  { %1544 = vmax.xlane.f32.xlu0 %v1543_v56 }
 0x9a4   :  { %8965 = vrot.lane.b32.xlu1 %v9686_v7, %s11414_s0 }
 0xa20   :  { %v1539_v58 = vpop.xlane.xlu1 %1538 }
 0xa21   :  { %v1546_v54 = vsub.f32 %v1534_v43, %v1539_v58 }
 0xa23   :  { %v1549_v59 = vmul.f32 1.442695, %v1546_v54 }
 0xa24   :  { %v8966_v60 = vpop.permute.xlu1 %8965  ;;  %v1542_v61 = vpop.xlane.xlu0 %1541 }
 0xa25   :  { %9137 = vpow2.f32 %v1549_v59  ;;  %v8968_v63 = vunpack.i.h.bf16 %v8966_v60  ;;  %v8967_v2 = vunpack.i.l.bf16 %v8966_v60  ;;  %v1547_v3 = vsub.f32 %v1535_v46, %v1542_v61  ;;  %v10025_v61 = vld [vmem:[%s11397_s7 + $0x18] sm:$0xff] }
 0xa26   :  { %8083 = vmatpush3.msra.mxu0 %v10025_v61 }
 0xa27   :  { %v8758_v8 = vpack.c.bf16 %v8968_v63, %v8967_v2  ;;  %v1551_v11 = vmul.f32 1.442695, %v1547_v3  ;;  %8764 = vmatprep.subr.bf16.mxu0 %v9406_v0 }
 0xa28   :  { %v1545_v5 = vpop.xlane.xlu0 %1544 }
 0xa29   :  { %9139 = vpow2.f32 %v1551_v11  ;;  %v1548_v13 = vsub.f32 %v1536_v55, %v1545_v5  ;;  %8759 = vmatpush3.bf16.msra.mxu1 %v8758_v8 }
 0xa2a   :  { %8071 = vmatprep.subr.mxu1 %v9409_v10 }
 0xa2b   :  { %v1553_v14 = vmul.f32 1.442695, %v1548_v13 }
 0xa2d   :  { %9141 = vpow2.f32 %v1553_v14 }
 0xa2f   :  { %v9138_v7 = vpop.eup %9137 }
 0xa30   :  { %v1555_v16 = vsel %vm543_vm6, %v9138_v7, 0.0 }
 0xa31   :  { %1556 = vadd.xlane.f32.xlu0 %v1555_v16 }
 0xa33   :  { %v9140_v17 = vpop.eup %9139 }
 0xa34   :  { %v1558_v18 = vsel %vm543_vm6, %v9140_v17, 0.0 }
 0xa35   :  { %1559 = vadd.xlane.f32.xlu1 %v1558_v18 }
 0xa37   :  { %v9142_v19 = vpop.eup %9141 }
 0xa38   :  { %v1561_v20 = vsel %vm543_vm6, %v9142_v19, 0.0 }
 0xa39   :  { %1562 = vadd.xlane.f32.xlu0 %v1561_v20 }
 0xa46   :  { %8970 = vrot.lane.b32.xlu1 %v9948_v24, %s9407_s28 }
 0xa4a   :  { %1767 = vrot.lane.b32.xlu1 %v9954_v33, %s9407_s28 }
 0xa4e   :  { %8975 = vrot.lane.b32.xlu1 %v9948_v24, %s9411_s30 }
 0xa4f   :  { %1574 = vrot.lane.b32.xlu0 %v9689_v9, %s11414_s0 }
 0xa50   :  { %v1410_v6 = vpop.f32.mrb[30].mxu1 }
 0xa51   :  { %v9963_v28 = vadd.f32 %v1410_v6, %v9856_v62  ;;  %v8045_v34 = vpop.f32.mrb[31].mxu1 }
 0xa52   :  { %1998 = vrot.lane.b32.xlu1 %v9944_v23, %s9410_s29 }
 0xa53   :  { %2008 = vrot.lane.b32.xlu0 %v9954_v33, %s9411_s30 }
 0xa54   :  { %v1415_v1 = vpop.f32.mrb[32].mxu1 }
 0xa55   :  { %v9970_v27 = vadd.f32 %v1415_v1, %v9858_v4  ;;  %v8048_v36 = vpop.f32.mrb[33].mxu1 }
 0xa56   :  { %2002 = vrot.lane.b32.xlu1 %v9954_v33, %s9410_s29 }
 0xa57   :  { %2000 = vrot.lane.b32.xlu0 %v9940_v21, %s9410_s29 }
 0xa58   :  { %v1420_v9 = vpop.f32.mrb[34].mxu1 }
 0xa59   :  { %v9977_v62 = vadd.f32 %v1420_v9, %v9860_v12  ;;  %v8051_v37 = vpop.f32.mrb[35].mxu1 }
 0xabe   :  { %v1557_v39 = vpop.xlane.xlu0 %1556 }
 0xabf   :  { %9143 = vrcp.f32 %v1557_v39 }
 0xac2   :  { %v1560_v40 = vpop.xlane.xlu1 %1559 }
 0xac3   :  { %9145 = vrcp.f32 %v1560_v40 }
 0xac6   :  { %v1563_v41 = vpop.xlane.xlu0 %1562  ;;  %v8971_v38 = vpop.permute.xlu1 %8970 }
 0xac7   :  { %9147 = vrcp.f32 %v1563_v41  ;;  %v8973_v44 = vunpack.i.h.bf16 %v8971_v38  ;;  %v8972_v47 = vunpack.i.l.bf16 %v8971_v38 }
 0xac9   :  { %v9144_v4 = vpop.eup %9143  ;;  %v8761_v46 = vpack.c.bf16 %v8973_v44, %v8972_v47 }
 0xaca   :  { %v1565_v42 = vmul.f32 %v9144_v4, %v9138_v7  ;;  %v1575_v43 = vpop.permute.xlu0 %1574  ;;  %v1768_v49 = vpop.permute.xlu1 %1767 }
 0xacb   :  { %8072 = vmatpush3.msra.mxu1 %v1575_v43 }
 0xacc   :  { %8074 = vmatmul.mubr.msk.f32.vlgmr.msra.gmra.mrb[36].mxu1 %vm543_vm6, %v1565_v42  ;;  %8760 = vmatprep.subr.bf16.mxu1 %v9406_v0 }
 0xacd   :  { %v9146_v12 = vpop.eup %9145  ;;  %8076 = vmatprep.mubr.msk.f32.mxu1 %vm9408_vm2, %v9409_v10 }
 0xace   :  { %v1567_v48 = vmul.f32 %v9146_v12, %v9140_v17  ;;  %v8976_v52 = vpop.permute.xlu1 %8975  ;;  %v2009_v58 = vpop.permute.xlu0 %2008 }
 0xacf   :  { %v8978_v53 = vunpack.i.h.bf16 %v8976_v52  ;;  %v8977_v55 = vunpack.i.l.bf16 %v8976_v52 }
 0xad0   :  { %8077 = vmatmul.mubr.msk.f32.gmra.mrb[38].mxu1 %vm543_vm6, %v1567_v48 }
 0xad1   :  { %v9148_v51 = vpop.eup %9147  ;;  %8079 = vmatprep.mubr.msk.f32.mxu1 %vm9408_vm2, %v9409_v10  ;;  %v8768_v56 = vpack.c.bf16 %v8978_v53, %v8977_v55 }
 0xad2   :  { %8763 = vmatpush3.bf16.xpose.msk.msra.mxu1 %vm9711_vm4, %v8761_v46  ;;  %v1569_v45 = vmul.f32 %v9148_v51, %v9142_v19  ;;  %v1999_v54 = vpop.permute.xlu1 %1998  ;;  %v2001_v59 = vpop.permute.xlu0 %2000 }
 0xad3   :  { %8097 = vmatprep.subr.mxu1 %v9409_v10 }
 0xad4   :  { %8080 = vmatmul.mubr.msk.f32.gmra.mrb[40].mxu1 %vm543_vm6, %v1569_v45 }
 0xad5   :  { %8099 = vmatprep.mubr.msk.f32.mxu1 %vm9408_vm2, %v9409_v10 }
 0xad6   :  { %v2003_v60 = vpop.permute.xlu1 %2002 }
 0xada   :  { %8098 = vmatpush3.xpose.msk.msra.mxu1 %vm444_vm3, %v1768_v49 }
 0xadb   :  { %8767 = vmatprep.subr.bf16.mxu1 %v9406_v0 }
 0xadd   :  { %8100 = vmatmul.mubr.msk.f32.vlgmr.msra.gmra.mrb[42].mxu1 %vm444_vm3, %v9944_v23 }
 0xade   :  { %8770 = vmatpush3.bf16.xpose.msk.msra.mxu1 %vm9711_vm4, %v8768_v56  ;;  %8102 = vmatprep.mubr.msk.f32.mxu1 %vm9408_vm2, %v9409_v10 }
 0xadf   :  { %8127 = vmatprep.subr.mxu1 %v9409_v10 }
 0xae1   :  { %8103 = vmatmul.mubr.msk.f32.gmra.mrb[44].mxu1 %vm444_vm3, %v9940_v21 }
 0xae2   :  { %8105 = vmatprep.mubr.msk.f32.mxu1 %vm9408_vm2, %v9409_v10 }
 0xae5   :  { %8106 = vmatmul.mubr.msk.f32.gmra.mrb[46].mxu1 %vm444_vm3, %v9954_v33 }
 0xae6   :  { %8128 = vmatpush3.xpose.msk.msra.mxu1 %vm444_vm3, %v2009_v58  ;;  %8129 = vmatprep.mubr.msk.f32.mxu1 %vm9408_vm2, %v9409_v10 }
 0xae7   :  { %8153 = vmatprep.subr.mxu1 %v9409_v10 }
 0xae9   :  { %8130 = vmatmul.mubr.msk.f32.vlgmr.msra.gmra.mrb[48].mxu1 %vm444_vm3, %v1999_v54 }
 0xaea   :  { %8132 = vmatprep.mubr.msk.f32.mxu1 %vm9408_vm2, %v9409_v10  ;;  %8154 = vmatpush3.msra.mxu1 %v9820_v31 }
 0xaeb   :  { %8774 = vmatprep.subr.bf16.mxu1 %v9406_v0 }
 0xaed   :  { %8133 = vmatmul.mubr.msk.f32.gmra.mrb[50].mxu1 %vm444_vm3, %v2001_v59 }
 0xaee   :  { %8135 = vmatprep.mubr.msk.f32.mxu1 %vm9408_vm2, %v9409_v10 }
 0xaf1   :  { %8136 = vmatmul.mubr.msk.f32.gmra.mrb[52].mxu1 %vm444_vm3, %v2003_v60 }
 0xaf2   :  { %8155 = vmatprep.mubr.msk.f32.mxu1 %vm9408_vm2, %v9409_v10 }
 0xb9f   :  { %v1654_v31 = vpop.f32.mrb[36].mxu1 }
 0xba0   :  { %v8075_v63 = vpop.f32.mrb[37].mxu1  ;;  %8085 = vmatmul.mubr.msk.f32.vlgmr.msra.gmra.mrb[36].mxu0 %vm444_vm3, %v1654_v31 }
 0xba1   :  { %8087 = vmatprep.mubr.msk.f32.mxu0 %vm9408_vm2, %v9409_v10 }
 0xba3   :  { %v1659_v2 = vpop.f32.mrb[38].mxu1 }
 0xba4   :  { %v8078_v3 = vpop.f32.mrb[39].mxu1  ;;  %8088 = vmatmul.mubr.msk.f32.gmra.mrb[38].mxu0 %vm444_vm3, %v1659_v2 }
 0xba5   :  { %8090 = vmatprep.mubr.msk.f32.mxu0 %vm9408_vm2, %v9409_v10 }
 0xba7   :  { %v1664_v8 = vpop.f32.mrb[40].mxu1 }
 0xba8   :  { %v8081_v11 = vpop.f32.mrb[41].mxu1  ;;  %8091 = vmatmul.mubr.msk.f32.gmra.mrb[40].mxu0 %vm444_vm3, %v1664_v8 }
 0xba9   :  { %8114 = vmatprep.mubr.msk.f32.mxu0 %vm9408_vm2, %v9409_v10 }
 0xbb0   :  { %v1847_v5 = vpop.f32.mrb[42].mxu1 }
 0xbb1   :  { %v1861_v13 = vmul.f32 0.35355338, %v1847_v5  ;;  %v8101_v14 = vpop.f32.mrb[43].mxu1 }
 0xbb3   :  { %v1864_v7 = vadd.f32 %v1861_v13, %v9750_v35 }
 0xbb4   :  { %v1852_v16 = vpop.f32.mrb[44].mxu1 }
 0xbb5   :  { %v1862_v17 = vmul.f32 0.35355338, %v1852_v16  ;;  %v8104_v18 = vpop.f32.mrb[45].mxu1  ;;  %v1867_v19 = vsel %vm543_vm6, %v1864_v7, -inf }
 0xbb6   :  { %1868 = vmax.xlane.f32.xlu0 %v1867_v19 }
 0xbb7   :  { %v1865_v20 = vadd.f32 %v1862_v17, %v9750_v35 }
 0xbb8   :  { %v1857_v6 = vpop.f32.mrb[46].mxu1 }
 0xbb9   :  { %v1863_v34 = vmul.f32 0.35355338, %v1857_v6  ;;  %v8107_v1 = vpop.f32.mrb[47].mxu1  ;;  %v1870_v36 = vsel %vm543_vm6, %v1865_v20, -inf }
 0xbba   :  { %1871 = vmax.xlane.f32.xlu1 %v1870_v36 }
 0xbbb   :  { %v1866_v9 = vadd.f32 %v1863_v34, %v9750_v35 }
 0xbbc   :  { %v2088_v37 = vpop.f32.mrb[48].mxu1 }
 0xbbd   :  { %v2102_v39 = vmul.f32 0.35355338, %v2088_v37  ;;  %v8131_v40 = vpop.f32.mrb[49].mxu1  ;;  %v1873_v41 = vsel %vm543_vm6, %v1866_v9, -inf }
 0xbbe   :  { %1874 = vmax.xlane.f32.xlu0 %v1873_v41 }
 0xbbf   :  { %v2105_v4 = vadd.f32 %v2102_v39, %v9750_v35 }
 0xbc0   :  { %v2093_v38 = vpop.f32.mrb[50].mxu1 }
 0xbc1   :  { %v2103_v42 = vmul.f32 0.35355338, %v2093_v38  ;;  %v8134_v43 = vpop.f32.mrb[51].mxu1  ;;  %v2108_v44 = vsel %vm543_vm6, %v2105_v4, -inf }
 0xbc2   :  { %2109 = vmax.xlane.f32.xlu0 %v2108_v44 }
 0xbc3   :  { %v2106_v47 = vadd.f32 %v2103_v42, %v9750_v35 }
 0xbc4   :  { %v2098_v12 = vpop.f32.mrb[52].mxu1 }
 0xbc5   :  { %v2104_v48 = vmul.f32 0.35355338, %v2098_v12  ;;  %v8137_v49 = vpop.f32.mrb[53].mxu1  ;;  %v2111_v46 = vsel %vm543_vm6, %v2106_v47, -inf }
 0xbc6   :  { %2112 = vmax.xlane.f32.xlu0 %v2111_v46 }
 0xbc7   :  { %v2107_v51 = vadd.f32 %v2104_v48, %v9750_v35 }
 0xbc9   :  { %v2114_v45 = vsel %vm543_vm6, %v2107_v51, -inf }
 0xbca   :  { %2115 = vmax.xlane.f32.xlu1 %v2114_v45 }
 0xbdb   :  { %8980 = vrot.lane.b32.xlu1 %v9948_v24, %s9413_s21 }
 0xc43   :  { %v1869_v52 = vpop.xlane.xlu0 %1868 }
 0xc44   :  { %v1876_v53 = vsub.f32 %v1864_v7, %v1869_v52 }
 0xc46   :  { %v1879_v55 = vmul.f32 1.442695, %v1876_v53 }
 0xc47   :  { %v1872_v56 = vpop.xlane.xlu1 %1871 }
 0xc48   :  { %9149 = vpow2.f32 %v1879_v55  ;;  %v1877_v58 = vsub.f32 %v1865_v20, %v1872_v56 }
 0xc4a   :  { %v1881_v54 = vmul.f32 1.442695, %v1877_v58 }
 0xc4b   :  { %v1875_v59 = vpop.xlane.xlu0 %1874 }
 0xc4c   :  { %9151 = vpow2.f32 %v1881_v54  ;;  %v1878_v60 = vsub.f32 %v1866_v9, %v1875_v59 }
 0xc4e   :  { %v1883_v31 = vmul.f32 1.442695, %v1878_v60 }
 0xc4f   :  { %v2110_v63 = vpop.xlane.xlu0 %2109 }
 0xc50   :  { %9153 = vpow2.f32 %v1883_v31  ;;  %v2117_v2 = vsub.f32 %v2105_v4, %v2110_v63 }
 0xc52   :  { %v10052_v3 = vpop.eup %9149  ;;  %v2120_v8 = vmul.f32 1.442695, %v2117_v2 }
 0xc53   :  { %v2113_v11 = vpop.xlane.xlu0 %2112  ;;  %v1885_v5 = vsel %vm543_vm6, %v10052_v3, 0.0 }
 0xc54   :  { %9155 = vpow2.f32 %v2120_v8  ;;  %v2118_v13 = vsub.f32 %v2106_v47, %v2113_v11  ;;  %1886 = vadd.xlane.f32.xlu0 %v1885_v5 }
 0xc56   :  { %v10056_v14 = vpop.eup %9151  ;;  %v2122_v7 = vmul.f32 1.442695, %v2118_v13 }
 0xc57   :  { %v2116_v16 = vpop.xlane.xlu1 %2115  ;;  %v1888_v17 = vsel %vm543_vm6, %v10056_v14, 0.0 }
 0xc58   :  { %9157 = vpow2.f32 %v2122_v7  ;;  %v2119_v18 = vsub.f32 %v2107_v51, %v2116_v16  ;;  %1889 = vadd.xlane.f32.xlu1 %v1888_v17 }
 0xc5a   :  { %v10060_v19 = vpop.eup %9153  ;;  %v2124_v20 = vmul.f32 1.442695, %v2119_v18 }
 0xc5b   :  { %v8981_v6 = vpop.permute.xlu1 %8980  ;;  %v1891_v34 = vsel %vm543_vm6, %v10060_v19, 0.0 }
 0xc5c   :  { %9159 = vpow2.f32 %v2124_v20  ;;  %v8983_v1 = vunpack.i.h.bf16 %v8981_v6  ;;  %v8982_v36 = vunpack.i.l.bf16 %v8981_v6  ;;  %1892 = vadd.xlane.f32.xlu0 %v1891_v34 }
 0xc5e   :  { %v10064_v9 = vpop.eup %9155  ;;  %v8765_v37 = vpack.c.bf16 %v8983_v1, %v8982_v36 }
 0xc5f   :  { %v2126_v39 = vsel %vm543_vm6, %v10064_v9, 0.0 }
 0xc60   :  { %2127 = vadd.xlane.f32.xlu1 %v2126_v39  ;;  %8766 = vmatpush3.bf16.msra.mxu0 %v8765_v37 }
 0xc61   :  { %8112 = vmatprep.subr.mxu0 %v9409_v10 }
 0xc62   :  { %v10069_v40 = vpop.eup %9157 }
 0xc63   :  { %v2129_v41 = vsel %vm543_vm6, %v10069_v40, 0.0 }
 0xc64   :  { %2130 = vadd.xlane.f32.xlu0 %v2129_v41 }
 0xc66   :  { %v10073_v4 = vpop.eup %9159 }
 0xc67   :  { %v2132_v38 = vsel %vm543_vm6, %v10073_v4, 0.0 }
 0xc68   :  { %2133 = vadd.xlane.f32.xlu0 %v2132_v38 }
 0xc71   :  { %8985 = vrot.lane.b32.xlu1 %v9948_v24, %s9414_s1 }
 0xc73   :  { %v1743_v42 = vpop.f32.mrb[36].mxu0 }
 0xc74   :  { %v10080_v43 = vadd.f32 %v1743_v42, %v9963_v28  ;;  %v8086_v44 = vpop.f32.mrb[37].mxu0 }
 0xc75   :  { %2145 = vrot.lane.b32.xlu1 %v9954_v33, %s9414_s1 }
 0xc77   :  { %v1748_v47 = vpop.f32.mrb[38].mxu0 }
 0xc78   :  { %v10085_v12 = vadd.f32 %v1748_v47, %v9970_v27  ;;  %v8089_v48 = vpop.f32.mrb[39].mxu0 }
 0xc79   :  { %8990 = vrot.lane.b32.xlu1 %v9948_v24, %s9415_s22 }
 0xc7b   :  { %v1753_v49 = vpop.f32.mrb[40].mxu0 }
 0xc7c   :  { %v10090_v46 = vadd.f32 %v1753_v49, %v9977_v62  ;;  %v8092_v51 = vpop.f32.mrb[41].mxu0 }
 0xc7d   :  { %2427 = vrot.lane.b32.xlu1 %v9954_v33, %s9415_s22 }
 0xc7e   :  { %1904 = vrot.lane.b32.xlu0 %v9954_v33, %s9413_s21 }
 0xc81   :  { %2419 = vrot.lane.b32.xlu1 %v9940_v21, %s11422_s2 }
 0xc82   :  { %2417 = vrot.lane.b32.xlu0 %v9944_v23, %s11422_s2 }
 0xc86   :  { %2421 = vrot.lane.b32.xlu0 %v9954_v33, %s11422_s2  ;;  %s11436_s2 = smov 72  }
 0xce1   :  { %v1887_v28 = vpop.xlane.xlu0 %1886 }
 0xce2   :  { %9161 = vrcp.f32 %v1887_v28 }
 0xce5   :  { %v1890_v27 = vpop.xlane.xlu1 %1889 }
 0xce6   :  { %9163 = vrcp.f32 %v1890_v27 }
 0xce9   :  { %v1893_v62 = vpop.xlane.xlu0 %1892 }
 0xcea   :  { %9165 = vrcp.f32 %v1893_v62 }
 0xcec   :  { %v9162_v56 = vpop.eup %9161 }
 0xced   :  { %v2128_v45 = vpop.xlane.xlu1 %2127  ;;  %v1895_v59 = vmul.f32 %v9162_v56, %v10052_v3 }
 0xcee   :  { %9167 = vrcp.f32 %v2128_v45 }
 0xcf0   :  { %v9164_v31 = vpop.eup %9163 }
 0xcf1   :  { %v2131_v52 = vpop.xlane.xlu0 %2130  ;;  %v8986_v53 = vpop.permute.xlu1 %8985  ;;  %v1897_v2 = vmul.f32 %v9164_v31, %v10056_v14 }
 0xcf2   :  { %v8988_v58 = vunpack.i.h.bf16 %v8986_v53  ;;  %v8987_v54 = vunpack.i.l.bf16 %v8986_v53  ;;  %9169 = vrcp.f32 %v2131_v52 }
 0xcf4   :  { %v8772_v63 = vpack.c.bf16 %v8988_v58, %v8987_v54  ;;  %v9166_v8 = vpop.eup %9165 }
 0xcf5   :  { %v2134_v55 = vpop.xlane.xlu0 %2133  ;;  %v2146_v11 = vpop.permute.xlu1 %2145  ;;  %v1899_v3 = vmul.f32 %v9166_v8, %v10060_v19 }
 0xcf6   :  { %9171 = vrcp.f32 %v2134_v55 }
 0xcf8   :  { %v9168_v5 = vpop.eup %9167 }
 0xcf9   :  { %v1905_v60 = vpop.permute.xlu0 %1904  ;;  %v2136_v13 = vmul.f32 %v9168_v5, %v10064_v9  ;;  %v8991_v20 = vpop.permute.xlu1 %8990 }
 0xcfa   :  { %8113 = vmatpush3.msra.mxu0 %v1905_v60  ;;  %v8993_v34 = vunpack.i.h.bf16 %v8991_v20  ;;  %v8992_v1 = vunpack.i.l.bf16 %v8991_v20 }
 0xcfb   :  { %8115 = vmatmul.mubr.msk.f32.vlgmr.msra.gmra.mrb[42].mxu0 %vm543_vm6, %v1895_v59  ;;  %8771 = vmatprep.subr.bf16.mxu0 %v9406_v0 }
 0xcfc   :  { %8773 = vmatpush3.bf16.msra.mxu0 %v8772_v63  ;;  %8117 = vmatprep.mubr.msk.f32.mxu0 %vm9408_vm2, %v9409_v10  ;;  %v9170_v14 = vpop.eup %9169  ;;  %v8775_v37 = vpack.c.bf16 %v8993_v34, %v8992_v1 }
 0xcfd   :  { %8142 = vmatprep.subr.mxu0 %v9409_v10  ;;  %v2138_v7 = vmul.f32 %v9170_v14, %v10069_v40  ;;  %v2428_v42 = vpop.permute.xlu1 %2427  ;;  %v2418_v47 = vpop.permute.xlu0 %2417 }
 0xcff   :  { %8118 = vmatmul.mubr.msk.f32.gmra.mrb[44].mxu0 %vm543_vm6, %v1897_v2 }
 0xd00   :  { %8143 = vmatpush3.msra.mxu0 %v2146_v11  ;;  %8120 = vmatprep.mubr.msk.f32.mxu0 %vm9408_vm2, %v9409_v10  ;;  %v9172_v16 = vpop.eup %9171 }
 0xd01   :  { %8164 = vmatprep.subr.mxu0 %v9409_v10  ;;  %v2140_v17 = vmul.f32 %v9172_v16, %v10073_v4  ;;  %v2420_v48 = vpop.permute.xlu1 %2419  ;;  %v2422_v49 = vpop.permute.xlu0 %2421 }
 0xd03   :  { %8121 = vmatmul.mubr.msk.f32.gmra.mrb[46].mxu0 %vm543_vm6, %v1899_v3 }
 0xd04   :  { %8144 = vmatprep.mubr.msk.f32.mxu0 %vm9408_vm2, %v9409_v10 }
 0xd07   :  { %8145 = vmatmul.mubr.msk.f32.vlgmr.msra.gmra.mrb[48].mxu0 %vm543_vm6, %v2136_v13 }
 0xd08   :  { %8147 = vmatprep.mubr.msk.f32.mxu0 %vm9408_vm2, %v9409_v10  ;;  %8165 = vmatpush3.msra.mxu0 %v9813_v26 }
 0xd09   :  { %8778 = vmatprep.subr.bf16.mxu0 %v9406_v0 }
 0xd0b   :  { %8148 = vmatmul.mubr.msk.f32.gmra.mrb[50].mxu0 %vm543_vm6, %v2138_v7 }
 0xd0c   :  { %8150 = vmatprep.mubr.msk.f32.mxu0 %vm9408_vm2, %v9409_v10 }
 0xd0f   :  { %8151 = vmatmul.mubr.msk.f32.gmra.mrb[52].mxu0 %vm543_vm6, %v2140_v17 }
 0xd10   :  { %8166 = vmatprep.mubr.msk.f32.mxu0 %vm9408_vm2, %v9409_v10 }
 0xdce   :  { %v1984_v18 = vpop.f32.mrb[42].mxu0 }
 0xdcf   :  { %v8116_v19 = vpop.f32.mrb[43].mxu0  ;;  %8167 = vmatmul.mubr.msk.f32.vlgmr.msra.gmra.mrb[54].mxu0 %vm444_vm3, %v1984_v18 }
 0xdd0   :  { %8169 = vmatprep.mubr.msk.f32.mxu0 %vm9408_vm2, %v9409_v10 }
 0xdd2   :  { %v1989_v26 = vpop.f32.mrb[44].mxu0 }
 0xdd3   :  { %v8119_v6 = vpop.f32.mrb[45].mxu0  ;;  %8170 = vmatmul.mubr.msk.f32.gmra.mrb[56].mxu0 %vm444_vm3, %v1989_v26 }
 0xdd4   :  { %8172 = vmatprep.mubr.msk.f32.mxu0 %vm9408_vm2, %v9409_v10 }
 0xdd6   :  { %v1994_v36 = vpop.f32.mrb[46].mxu0 }
 0xdd7   :  { %v8122_v9 = vpop.f32.mrb[47].mxu0  ;;  %8173 = vmatmul.mubr.msk.f32.gmra.mrb[58].mxu0 %vm444_vm3, %v1994_v36 }
 0xdd8   :  { %8196 = vmatprep.mubr.msk.f32.mxu0 %vm9408_vm2, %v9409_v10 }
 0xdda   :  { %v2225_v39 = vpop.f32.mrb[48].mxu0 }
 0xddb   :  { %v8146_v40 = vpop.f32.mrb[49].mxu0  ;;  %8156 = vmatmul.mubr.msk.f32.vlgmr.msra.gmra.mrb[54].mxu1 %vm444_vm3, %v2225_v39 }
 0xddc   :  { %8777 = vmatpush3.bf16.xpose.msk.msra.mxu1 %vm9711_vm4, %v8775_v37  ;;  %8158 = vmatprep.mubr.msk.f32.mxu1 %vm9408_vm2, %v9409_v10 }
 0xddd   :  { %8179 = vmatprep.subr.mxu1 %v9409_v10 }
 0xdde   :  { %v2230_v41 = vpop.f32.mrb[50].mxu0 }
 0xddf   :  { %v8149_v4 = vpop.f32.mrb[51].mxu0  ;;  %8159 = vmatmul.mubr.msk.f32.gmra.mrb[56].mxu1 %vm444_vm3, %v2230_v41 }
 0xde0   :  { %8161 = vmatprep.mubr.msk.f32.mxu1 %vm9408_vm2, %v9409_v10 }
 0xde2   :  { %v2235_v38 = vpop.f32.mrb[52].mxu0 }
 0xde3   :  { %v8152_v44 = vpop.f32.mrb[53].mxu0  ;;  %8162 = vmatmul.mubr.msk.f32.gmra.mrb[58].mxu1 %vm444_vm3, %v2235_v38 }
 0xde4   :  { %8180 = vmatpush3.xpose.msk.msra.mxu1 %vm444_vm3, %v2428_v42  ;;  %8181 = vmatprep.mubr.msk.f32.mxu1 %vm9408_vm2, %v9409_v10 }
 0xde5   :  { %8205 = vmatprep.subr.mxu1 %v9409_v10 }
 0xde7   :  { %8182 = vmatmul.mubr.msk.f32.vlgmr.msra.gmra.mrb[60].mxu1 %vm444_vm3, %v2418_v47 }
 0xde8   :  { %8184 = vmatprep.mubr.msk.f32.mxu1 %vm9408_vm2, %v9409_v10  ;;  %8206 = vmatpush3.msra.mxu1 %v9913_v32 }
 0xde9   :  { %8785 = vmatprep.subr.bf16.mxu1 %v9406_v0 }
 0xdeb   :  { %8185 = vmatmul.mubr.msk.f32.gmra.mrb[62].mxu1 %vm444_vm3, %v2420_v48 }
 0xdec   :  { %8187 = vmatprep.mubr.msk.f32.mxu1 %vm9408_vm2, %v9409_v10 }
 0xdef   :  { %8188 = vmatmul.mubr.msk.f32.gmra.mrb[64].mxu1 %vm444_vm3, %v2422_v49 }
 0xdf0   :  { %8207 = vmatprep.mubr.msk.f32.mxu1 %vm9408_vm2, %v9409_v10 }
 0xea2   :  { %v2403_v51 = vpop.f32.mrb[54].mxu0 }
 0xea3   :  { %v8168_v28 = vpop.f32.mrb[55].mxu0 }
 0xea6   :  { %v2408_v27 = vpop.f32.mrb[56].mxu0 }
 0xea7   :  { %v8171_v62 = vpop.f32.mrb[57].mxu0 }
 0xeaa   :  { %v2413_v45 = vpop.f32.mrb[58].mxu0 }
 0xeab   :  { %v8174_v32 = vpop.f32.mrb[59].mxu0 }
 0xeae   :  { %v2314_v52 = vpop.f32.mrb[54].mxu1 }
 0xeaf   :  { %v10165_v53 = vadd.f32 %v2403_v51, %v2314_v52  ;;  %v8157_v55 = vpop.f32.mrb[55].mxu1 }
 0xeb2   :  { %v2319_v56 = vpop.f32.mrb[56].mxu1 }
 0xeb3   :  { %v10167_v58 = vadd.f32 %v2408_v27, %v2319_v56  ;;  %v8160_v54 = vpop.f32.mrb[57].mxu1 }
 0xeb6   :  { %v2324_v59 = vpop.f32.mrb[58].mxu1 }
 0xeb7   :  { %v10169_v60 = vadd.f32 %v2413_v45, %v2324_v59  ;;  %v8163_v31 = vpop.f32.mrb[59].mxu1 }
 0xeba   :  { %v2507_v63 = vpop.f32.mrb[60].mxu1 }
 0xebb   :  { %v2521_v2 = vmul.f32 0.35355338, %v2507_v63  ;;  %v8183_v8 = vpop.f32.mrb[61].mxu1 }
 0xebd   :  { %v2524_v11 = vadd.f32 %v2521_v2, %v9750_v35 }
 0xebe   :  { %v2512_v3 = vpop.f32.mrb[62].mxu1 }
 0xebf   :  { %v2522_v5 = vmul.f32 0.35355338, %v2512_v3  ;;  %v8186_v13 = vpop.f32.mrb[63].mxu1  ;;  %v2527_v14 = vsel %vm543_vm6, %v2524_v11, -inf }
 0xec0   :  { %2528 = vmax.xlane.f32.xlu1 %v2527_v14 }
 0xec1   :  { %v2525_v7 = vadd.f32 %v2522_v5, %v9750_v35 }
 0xec2   :  { %v2517_v16 = vpop.f32.mrb[64].mxu1 }
 0xec3   :  { %v2523_v17 = vmul.f32 0.35355338, %v2517_v16  ;;  %v8189_v18 = vpop.f32.mrb[65].mxu1  ;;  %v2530_v19 = vsel %vm543_vm6, %v2525_v7, -inf }
 0xec4   :  { %2531 = vmax.xlane.f32.xlu0 %v2530_v19 }
 0xec5   :  { %v2526_v26 = vadd.f32 %v2523_v17, %v9750_v35 }
 0xec7   :  { %v2533_v20 = vsel %vm543_vm6, %v2526_v26, -inf }
 0xec8   :  { %2534 = vmax.xlane.f32.xlu0 %v2533_v20 }
 0xed1   :  { %8995 = vrot.lane.b32.xlu1 %v9948_v24, %s11420_s20 }
 0xf4d   :  { %v2529_v6 = vpop.xlane.xlu1 %2528 }
 0xf4e   :  { %v2536_v34 = vsub.f32 %v2524_v11, %v2529_v6 }
 0xf50   :  { %v2539_v1 = vmul.f32 1.442695, %v2536_v34 }
 0xf51   :  { %v8996_v36 = vpop.permute.xlu1 %8995  ;;  %v2532_v9 = vpop.xlane.xlu0 %2531 }
 0xf52   :  { %9173 = vpow2.f32 %v2539_v1  ;;  %v8998_v37 = vunpack.i.h.bf16 %v8996_v36  ;;  %v8997_v39 = vunpack.i.l.bf16 %v8996_v36  ;;  %v2537_v40 = vsub.f32 %v2525_v7, %v2532_v9 }
 0xf54   :  { %v8779_v41 = vpack.c.bf16 %v8998_v37, %v8997_v39  ;;  %v2541_v4 = vmul.f32 1.442695, %v2537_v40 }
 0xf55   :  { %v2535_v38 = vpop.xlane.xlu0 %2534 }
 0xf56   :  { %9175 = vpow2.f32 %v2541_v4  ;;  %v2538_v42 = vsub.f32 %v2526_v26, %v2535_v38  ;;  %8780 = vmatpush3.bf16.msra.mxu0 %v8779_v41 }
 0xf57   :  { %8194 = vmatprep.subr.mxu0 %v9409_v10 }
 0xf58   :  { %v2543_v44 = vmul.f32 1.442695, %v2538_v42 }
 0xf5a   :  { %9177 = vpow2.f32 %v2543_v44 }
 0xf5c   :  { %v9174_v47 = vpop.eup %9173 }
 0xf5d   :  { %v2545_v48 = vsel %vm543_vm6, %v9174_v47, 0.0 }
 0xf5e   :  { %2546 = vadd.xlane.f32.xlu0 %v2545_v48 }
 0xf60   :  { %v9176_v49 = vpop.eup %9175 }
 0xf61   :  { %v2548_v51 = vsel %vm543_vm6, %v9176_v49, 0.0 }
 0xf62   :  { %2549 = vadd.xlane.f32.xlu1 %v2548_v51 }
 0xf64   :  { %v9178_v28 = vpop.eup %9177 }
 0xf65   :  { %v2551_v27 = vsel %vm543_vm6, %v9178_v28, 0.0 }
 0xf66   :  { %2552 = vadd.xlane.f32.xlu0 %v2551_v27 }
 0xf73   :  { %9000 = vrot.lane.b32.xlu1 %v9948_v24, %s11418_s26 }
 0xf77   :  { %2760 = vrot.lane.b32.xlu1 %v9954_v33, %s11418_s26 }
 0xf7b   :  { %2750 = vrot.lane.b32.xlu1 %v9944_v23, %s11416_s27 }
 0xf7c   :  { %2564 = vrot.lane.b32.xlu0 %v9954_v33, %s11420_s20  ;;  %s11437_s20 = smov 104  }
 0xfeb   :  { %v2547_v62 = vpop.xlane.xlu0 %2546 }
 0xfec   :  { %9179 = vrcp.f32 %v2547_v62 }
 0xfef   :  { %v2550_v45 = vpop.xlane.xlu1 %2549 }
 0xff0   :  { %9181 = vrcp.f32 %v2550_v45 }
 0xff3   :  { %v2553_v32 = vpop.xlane.xlu0 %2552  ;;  %v9001_v55 = vpop.permute.xlu1 %9000 }
 0xff4   :  { %9183 = vrcp.f32 %v2553_v32  ;;  %v9003_v59 = vunpack.i.h.bf16 %v9001_v55  ;;  %v9002_v31 = vunpack.i.l.bf16 %v9001_v55 }
 0xff6   :  { %v9180_v52 = vpop.eup %9179  ;;  %v8782_v2 = vpack.c.bf16 %v9003_v59, %v9002_v31 }
 0xff7   :  { %v2555_v56 = vmul.f32 %v9180_v52, %v9174_v47  ;;  %v2565_v54 = vpop.permute.xlu0 %2564  ;;  %v2761_v3 = vpop.permute.xlu1 %2760 }
 0xff8   :  { %8195 = vmatpush3.msra.mxu0 %v2565_v54 }
 0xff9   :  { %8197 = vmatmul.mubr.msk.f32.vlgmr.msra.gmra.mrb[60].mxu0 %vm543_vm6, %v2555_v56  ;;  %8781 = vmatprep.subr.bf16.mxu0 %v9406_v0 }
 0xffa   :  { %v9182_v23 = vpop.eup %9181  ;;  %8199 = vmatprep.mubr.msk.f32.mxu0 %vm9408_vm2, %v9409_v10 }
 0xffb   :  { %v2557_v63 = vmul.f32 %v9182_v23, %v9176_v49  ;;  %v2751_v5 = vpop.permute.xlu1 %2750 }
 0xffd   :  { %8200 = vmatmul.mubr.msk.f32.gmra.mrb[62].mxu0 %vm543_vm6, %v2557_v63 }
 0xffe   :  { %v9184_v8 = vpop.eup %9183  ;;  %8202 = vmatprep.mubr.msk.f32.mxu0 %vm9408_vm2, %v9409_v10 }
 0xfff   :  { %8784 = vmatpush3.bf16.xpose.msk.msra.mxu0 %vm9711_vm4, %v8782_v2  ;;  %v2559_v11 = vmul.f32 %v9184_v8, %v9178_v28 }
0x1000   :  { %8220 = vmatprep.subr.mxu0 %v9409_v10 }
0x1001   :  { %8203 = vmatmul.mubr.msk.f32.gmra.mrb[64].mxu0 %vm543_vm6, %v2559_v11 }
0x1002   :  { %8222 = vmatprep.mubr.msk.f32.mxu0 %vm9408_vm2, %v9409_v10 }
0x1007   :  { %8221 = vmatpush3.xpose.msk.msra.mxu0 %vm444_vm3, %v2761_v3 }
0x1008   :  { %8246 = vmatprep.subr.mxu0 %v9409_v10 }
0x100a   :  { %8223 = vmatmul.mubr.msk.f32.vlgmr.msra.gmra.mrb[66].mxu0 %vm444_vm3, %v2751_v5 }
0x100b   :  { %8225 = vmatprep.mubr.msk.f32.mxu0 %vm9408_vm2, %v9409_v10  ;;  %8247 = vmatpush3.msra.mxu0 %v10025_v61 }
0x10cc   :  { %v2644_v13 = vpop.f32.mrb[60].mxu0 }
0x10cd   :  { %v8198_v14 = vpop.f32.mrb[61].mxu0  ;;  %8208 = vmatmul.mubr.msk.f32.vlgmr.msra.gmra.mrb[66].mxu1 %vm444_vm3, %v2644_v13 }
0x10ce   :  { %8210 = vmatprep.mubr.msk.f32.mxu1 %vm9408_vm2, %v9409_v10 }
0x10d0   :  { %v2649_v7 = vpop.f32.mrb[62].mxu0 }
0x10d1   :  { %v8201_v16 = vpop.f32.mrb[63].mxu0  ;;  %8211 = vmatmul.mubr.msk.f32.gmra.mrb[68].mxu1 %vm444_vm3, %v2649_v7 }
0x10d2   :  { %8213 = vmatprep.mubr.msk.f32.mxu1 %vm9408_vm2, %v9409_v10 }
0x10d4   :  { %v2654_v17 = vpop.f32.mrb[64].mxu0 }
0x10d5   :  { %v8204_v18 = vpop.f32.mrb[65].mxu0  ;;  %8214 = vmatmul.mubr.msk.f32.gmra.mrb[70].mxu1 %vm444_vm3, %v2654_v17 }
0x10d6   :  { %8237 = vmatprep.mubr.msk.f32.mxu1 %vm9408_vm2, %v9409_v10 }
0x10dd   :  { %v2840_v61 = vpop.f32.mrb[66].mxu0 }
0x10de   :  { %v2854_v19 = vmul.f32 0.35355338, %v2840_v61  ;;  %v8224_v26 = vpop.f32.mrb[67].mxu0 }
0x10e0   :  { %v2857_v20 = vadd.f32 %v2854_v19, %v9750_v35 }
0x10e2   :  { %v2860_v6 = vsel %vm543_vm6, %v2857_v20, -inf }
0x10e3   :  { %2861 = vmax.xlane.f32.xlu0 %v2860_v6 }
0x10f9   :  { %9005 = vrot.lane.b32.xlu0 %v9948_v24, %s11414_s0 }
0x10fd   :  { %2752 = vrot.lane.b32.xlu0 %v9940_v21, %s11416_s27 }
0x1170   :  { %v2862_v34 = vpop.xlane.xlu0 %2861 }
0x1171   :  { %v2869_v1 = vsub.f32 %v2857_v20, %v2862_v34 }
0x1173   :  { %v2872_v36 = vmul.f32 1.442695, %v2869_v1 }
0x1174   :  { %v9006_v9 = vpop.permute.xlu0 %9005 }
0x1175   :  { %9185 = vpow2.f32 %v2872_v36  ;;  %v9008_v37 = vunpack.i.h.bf16 %v9006_v9  ;;  %v9007_v39 = vunpack.i.l.bf16 %v9006_v9 }
0x1177   :  { %v8786_v40 = vpack.c.bf16 %v9008_v37, %v9007_v39 }
0x1178   :  { %v2753_v41 = vpop.permute.xlu0 %2752 }
0x1179   :  { %8226 = vmatmul.mubr.msk.f32.gmra.mrb[68].mxu0 %vm444_vm3, %v2753_v41  ;;  %8787 = vmatpush3.bf16.msra.mxu1 %v8786_v40 }
0x117a   :  { %8235 = vmatprep.subr.mxu1 %v9409_v10  ;;  %8228 = vmatprep.mubr.msk.f32.mxu0 %vm9408_vm2, %v9409_v10 }
0x117f   :  { %v9186_v24 = vpop.eup %9185 }
0x1180   :  { %v2878_v21 = vsel %vm543_vm6, %v9186_v24, 0.0 }
0x1181   :  { %2879 = vadd.xlane.f32.xlu1 %v2878_v21 }
0x1192   :  { %2897 = vrot.lane.b32.xlu1 %v9954_v33, %s11414_s0 }
0x1196   :  { %2754 = vrot.lane.b32.xlu1 %v9954_v33, %s11416_s27  ;;  %s11434_s27 = smov 112  }
0x11a0   :  { %v2733_v4 = vpop.f32.mrb[66].mxu1 }
0x11a1   :  { %v10235_v38 = vadd.f32 %v2733_v4, %v10165_v53  ;;  %v8209_v42 = vpop.f32.mrb[67].mxu1 }
0x11a4   :  { %v2738_v44 = vpop.f32.mrb[68].mxu1 }
0x11a5   :  { %v10238_v47 = vadd.f32 %v2738_v44, %v10167_v58  ;;  %v8212_v48 = vpop.f32.mrb[69].mxu1  ;;  %v10252_v58 = vld [vmem:[%s11398_s8] ss:$0 sm:$0xff] }
0x11a6   :  { %v3090_v32 = vadd.f32 %v10252_v58, %v10080_v43  ;;  %v3091_v59 = vadd.f32 %v10252_v58, %v10085_v12  ;;  %v3092_v63 = vadd.f32 %v10252_v58, %v10090_v46 }
0x11a8   :  { %v2743_v49 = vpop.f32.mrb[70].mxu1  ;;  %v10258_v54 = vadd.f32 %v3090_v32, %v9577_v22  ;;  %v10264_v23 = vadd.f32 %v3091_v59, %v9585_v25  ;;  %v10271_v2 = vadd.f32 %v3092_v63, %v9591_v30  ;;  %v3209_v32 = vld [vmem:[%s11401_s11 + $0x18] sm:$0xff] }
0x11a9   :  { %v10241_v51 = vadd.f32 %v2743_v49, %v10169_v60  ;;  %v8215_v28 = vpop.f32.mrb[71].mxu1 }
0x11aa   :  { %v3104_v43 = vsel %vm203_vm1, %v10258_v54, 0.0  ;;  %v3107_v22 = vsel %vm203_vm1, %v10264_v23, 0.0  ;;  %v3110_v12 = vsel %vm203_vm1, %v10271_v2, 0.0 }
0x120e   :  { %v2880_v27 = vpop.xlane.xlu1 %2879 }
0x120f   :  { %9187 = vrcp.f32 %v2880_v27 }
0x1212   :  { %v2898_v62 = vpop.permute.xlu1 %2897 }
0x1213   :  { %8236 = vmatpush3.msra.mxu1 %v2898_v62 }
0x1216   :  { %v2755_v33 = vpop.permute.xlu1 %2754 }
0x1217   :  { %8229 = vmatmul.mubr.msk.f32.gmra.mrb[70].mxu0 %vm444_vm3, %v2755_v33 }
0x1218   :  { %8248 = vmatprep.mubr.msk.f32.mxu0 %vm9408_vm2, %v9409_v10 }
0x1219   :  { %v9188_v53 = vpop.eup %9187 }
0x121a   :  { %v2888_v45 = vmul.f32 %v9188_v53, %v9186_v24 }
0x121c   :  { %8238 = vmatmul.mubr.msk.f32.vlgmr.msra.gmra.mrb[72].mxu1 %vm543_vm6, %v2888_v45 }
0x121d   :  { %8240 = vmatprep.mubr.msk.f32.mxu1 %vm9408_vm2, %v9409_v10 }
0x124c   :  { %v2845_v60 = vpop.f32.mrb[68].mxu0 }
0x124d   :  { %v2855_v52 = vmul.f32 0.35355338, %v2845_v60  ;;  %v8227_v55 = vpop.f32.mrb[69].mxu0  ;;  %v3208_v60 = vld [vmem:[%s11401_s11 + $0x10] sm:$0xff] }
0x124f   :  { %v2858_v56 = vadd.f32 %v2855_v52, %v9750_v35  ;;  %v8792_v52 = vpack.c.bf16 %v3209_v32, %v3208_v60 }
0x1251   :  { %v2863_v31 = vsel %vm543_vm6, %v2858_v56, -inf }
0x1252   :  { %2864 = vmax.xlane.f32.xlu0 %v2863_v31 }
0x1256   :  { %3105 = vadd.xlane.f32.xlu0 %v3104_v43 }
0x125a   :  { %3108 = vadd.xlane.f32.xlu0 %v3107_v22 }
0x125e   :  { %3111 = vadd.xlane.f32.xlu0 %v3110_v12 }
0x12df   :  { %v2865_v25 = vpop.xlane.xlu0 %2864 }
0x12e0   :  { %v2870_v39 = vsub.f32 %v2858_v56, %v2865_v25 }
0x12e2   :  { %v2874_v41 = vmul.f32 1.442695, %v2870_v39 }
0x12e3   :  { %v3106_v8 = vpop.xlane.xlu0 %3105 }
0x12e4   :  { %v3122_v11 = vmul.f32 0.03125, %v3106_v8  ;;  %9189 = vpow2.f32 %v2874_v41 }
0x12e6   :  { %v10278_v46 = vsub.f32 %v10258_v54, %v3122_v11 }
0x12e7   :  { %v3109_v3 = vpop.xlane.xlu0 %3108 }
0x12e8   :  { %v3123_v5 = vmul.f32 0.03125, %v3109_v3  ;;  %v3134_v30 = vmul.f32 %v10278_v46, %v10278_v46 }
0x12ea   :  { %v10283_v13 = vsub.f32 %v10264_v23, %v3123_v5  ;;  %v2850_v14 = vpop.f32.mrb[70].mxu0  ;;  %v3140_v7 = vsel %vm203_vm1, %v3134_v30, 0.0 }
0x12eb   :  { %v2856_v16 = vmul.f32 0.35355338, %v2850_v14  ;;  %3141 = vadd.xlane.f32.xlu0 %v3140_v7  ;;  %v3112_v17 = vpop.xlane.xlu0 %3111  ;;  %v8230_v18 = vpop.f32.mrb[71].mxu0 }
0x12ec   :  { %v3124_v61 = vmul.f32 0.03125, %v3112_v17  ;;  %v3135_v19 = vmul.f32 %v10283_v13, %v10283_v13 }
0x12ed   :  { %v2859_v26 = vadd.f32 %v2856_v16, %v9750_v35 }
0x12ee   :  { %v10290_v20 = vsub.f32 %v10271_v2, %v3124_v61  ;;  %v3143_v6 = vsel %vm203_vm1, %v3135_v19, 0.0  ;;  %v9190_v27 = vpop.eup %9189  ;;  %v10327_v19 = vld [vmem:[%s11399_s9] ss:$0 sm:$0xff] }
0x12ef   :  { %3144 = vadd.xlane.f32.xlu0 %v3143_v6  ;;  %v2977_v34 = vpop.f32.mrb[72].mxu1  ;;  %v2866_v1 = vsel %vm543_vm6, %v2859_v26, -inf  ;;  %v2881_v62 = vsel %vm543_vm6, %v9190_v27, 0.0 }
0x12f0   :  { %2867 = vmax.xlane.f32.xlu1 %v2866_v1  ;;  %v8239_v36 = vpop.f32.mrb[73].mxu1  ;;  %8249 = vmatmul.mubr.msk.f32.vlgmr.msra.gmra.mrb[72].mxu0 %vm444_vm3, %v2977_v34  ;;  %v3136_v9 = vmul.f32 %v10290_v20, %v10290_v20 }
0x12f1   :  { %8251 = vmatprep.mubr.msk.f32.mxu0 %vm9408_vm2, %v9409_v10 }
0x12f2   :  { %v3146_v37 = vsel %vm203_vm1, %v3136_v9, 0.0 }
0x12f3   :  { %3147 = vadd.xlane.f32.xlu0 %v3146_v37 }
0x1378   :  { %v3142_v55 = vpop.xlane.xlu0 %3141 }
0x1379   :  { %v3158_v59 = vmul.f32 0.03125, %v3142_v55 }
0x137b   :  { %v3164_v43 = vadd.f32 1e-06, %v3158_v59 }
0x137c   :  { %v3145_v56 = vpop.xlane.xlu0 %3144 }
0x137d   :  { %v2868_v40 = vpop.xlane.xlu1 %2867  ;;  %v3159_v63 = vmul.f32 0.03125, %v3145_v56 }
0x137e   :  { %v2871_v24 = vsub.f32 %v2859_v26, %v2868_v40 }
0x137f   :  { %v3165_v12 = vadd.f32 1e-06, %v3159_v63 }
0x1380   :  { %v2876_v21 = vmul.f32 1.442695, %v2871_v24  ;;  %v3148_v31 = vpop.xlane.xlu0 %3147  ;;  %v3492_v24 = vld [vmem:[%s11403_s13] sm:$0xff] }
0x1381   :  { %v3160_v22 = vmul.f32 0.03125, %v3148_v31 }
0x1382   :  { %9191 = vpow2.f32 %v2876_v21  ;;  %v3493_v21 = vld [vmem:[%s11403_s13 + $0x8] sm:$0xff] }
0x1383   :  { %9193 = vrsqrt.f32 %v3164_v43  ;;  %v3166_v25 = vadd.f32 1e-06, %v3160_v22  ;;  %v10384_v22 = vld [vmem:[%s11402_s12] ss:$0 sm:$0xff] }
0x1384   :  { %9195 = vrsqrt.f32 %v3165_v12 }
0x1385   :  { %9197 = vrsqrt.f32 %v3166_v25 }
0x138c   :  { %v9192_v33 = vpop.eup %9191 }
0x138d   :  { %v2884_v53 = vsel %vm543_vm6, %v9192_v33, 0.0  ;;  %v9194_v16 = vpop.eup %9193 }
0x138e   :  { %v9196_v17 = vpop.eup %9195  ;;  %v3176_v18 = vmul.f32 %v9194_v16, %v10278_v46  ;;  %v10336_v46 = vld [vmem:[%s11400_s10] ss:$0 sm:$0xff] }
0x138f   :  { %v9198_v61 = vpop.eup %9197  ;;  %v3177_v6 = vmul.f32 %v9196_v17, %v10283_v13 }
0x1390   :  { %v3188_v1 = vmul.f32 %v10327_v19, %v3176_v18  ;;  %v3178_v36 = vmul.f32 %v9198_v61, %v10290_v20 }
0x1391   :  { %v3189_v37 = vmul.f32 %v10327_v19, %v3177_v6 }
0x1392   :  { %v3200_v13 = vadd.f32 %v10336_v46, %v3188_v1  ;;  %v3190_v40 = vmul.f32 %v10327_v19, %v3178_v36 }
0x1393   :  { %v3201_v20 = vadd.f32 %v10336_v46, %v3189_v37 }
0x1394   :  { %v3202_v41 = vadd.f32 %v10336_v46, %v3190_v40 }
0x13c3   :  { %v3066_v4 = vpop.f32.mrb[72].mxu0 }
0x13c4   :  { %v3080_v42 = vadd.f32 %v3066_v4, %v10235_v38  ;;  %v8250_v44 = vpop.f32.mrb[73].mxu0  ;;  %v3206_v38 = vld [vmem:[%s11401_s11] sm:$0xff]  ;;  %v8796_v4 = vpack.c.bf16 %v3493_v21, %v3492_v24 }
0x13c5   :  { %v3495_v44 = vld [vmem:[%s11403_s13 + $0x18] sm:$0xff] }
0x13c6   :  { %v3093_v48 = vadd.f32 %v10252_v58, %v3080_v42  ;;  %8797 = vmatprep.subr.bf16.mxu0 %v8796_v4  ;;  %v3494_v42 = vld [vmem:[%s11403_s13 + $0x10] sm:$0xff] }
0x13c7   :  { %8799 = vmatpush3.bf16.msra.mxu0 %v8796_v4 }
0x13c8   :  { %v10303_v49 = vadd.f32 %v3093_v48, %v9589_v29  ;;  %v3207_v29 = vld [vmem:[%s11401_s11 + $0x8] sm:$0xff] }
0x13c9   :  { %v8788_v45 = vpack.c.bf16 %v3207_v29, %v3206_v38  ;;  %v3498_v29 = vld [vmem:[%s11403_s13 + $0x30] sm:$0xff] }
0x13ca   :  { %v3113_v28 = vsel %vm203_vm1, %v10303_v49, 0.0 }
0x13cb   :  { %3114 = vadd.xlane.f32.xlu1 %v3113_v28  ;;  %8789 = vmatprep.subr.bf16.mxu1 %v8788_v45  ;;  %v8800_v28 = vpack.c.bf16 %v3495_v44, %v3494_v42 }
0x13cc   :  { %8791 = vmatpush3.bf16.msra.mxu1 %v8788_v45  ;;  %v3499_v45 = vld [vmem:[%s11403_s13 + $0x38] sm:$0xff] }
0x13cd   :  { %8793 = vmatprep.subr.bf16.mxu1 %v8792_v52  ;;  %8801 = vmatprep.subr.bf16.mxu0 %v8800_v28  ;;  %v8808_v60 = vpack.c.bf16 %v3499_v45, %v3498_v29 }
0x13ce   :  { %8803 = vmatpush3.bf16.msra.mxu0 %v8800_v28 }
0x13cf   :  { %2882 = vadd.xlane.f32.xlu1 %v2881_v62 }
0x13d0   :  { %8795 = vmatpush3.bf16.msra.mxu1 %v8792_v52 }
0x13d3   :  { %2885 = vadd.xlane.f32.xlu1 %v2884_v53  ;;  %v3497_v53 = vld [vmem:[%s11403_s13 + $0x28] sm:$0xff] }
0x1458   :  { %v3115_v8 = vpop.xlane.xlu1 %3114 }
0x1459   :  { %v3125_v11 = vmul.f32 0.03125, %v3115_v8 }
0x145b   :  { %v3131_v3 = vsub.f32 %v10303_v49, %v3125_v11 }
0x145c   :  { %v2883_v5 = vpop.xlane.xlu1 %2882 }
0x145d   :  { %9199 = vrcp.f32 %v2883_v5  ;;  %v3137_v30 = vmul.f32 %v3131_v3, %v3131_v3 }
0x145f   :  { %v3149_v14 = vsel %vm203_vm1, %v3137_v30, 0.0 }
0x1460   :  { %3150 = vadd.xlane.f32.xlu1 %v3149_v14  ;;  %v2886_v7 = vpop.xlane.xlu1 %2885 }
0x1461   :  { %9201 = vrcp.f32 %v2886_v7 }
0x1467   :  { %v9200_v26 = vpop.eup %9199 }
0x1468   :  { %v2890_v34 = vmul.f32 %v9200_v26, %v9190_v27 }
0x146a   :  { %8241 = vmatmul.mubr.msk.f32.gmra.mrb[74].mxu1 %vm543_vm6, %v2890_v34 }
0x146b   :  { %v9202_v9 = vpop.eup %9201  ;;  %8243 = vmatprep.mubr.msk.f32.mxu1 %vm9408_vm2, %v9409_v10 }
0x146c   :  { %v2892_v39 = vmul.f32 %v9202_v9, %v9192_v33  ;;  %v3496_v33 = vld [vmem:[%s11403_s13 + $0x20] sm:$0xff] }
0x146d   :  { %v8804_v38 = vpack.c.bf16 %v3497_v53, %v3496_v33 }
0x146e   :  { %8244 = vmatmul.mubr.msk.f32.gmra.mrb[76].mxu1 %vm543_vm6, %v2892_v39 }
0x146f   :  { %8265 = vmatprep.mubr.msk.f32.mxu1 %vm203_vm1, %v3200_v13  ;;  %8805 = vmatprep.subr.bf16.mxu0 %v8804_v38 }
0x1470   :  { %8807 = vmatpush3.bf16.msra.mxu0 %v8804_v38 }
0x1471   :  { %8809 = vmatprep.subr.bf16.mxu0 %v8808_v60 }
0x1472   :  { %8266 = vmatmul.mubr.msk.f32.vlgmr.msra.gmra.mrb[78].mxu1 %vm203_vm1, %v3201_v20 }
0x1473   :  { %8268 = vmatprep.mubr.msk.f32.mxu1 %vm203_vm1, %v3202_v41 }
0x1474   :  { %8811 = vmatpush3.bf16.msra.mxu0 %v8808_v60 }
0x1475   :  { %8820 = vmatprep.subr.bf16.mxu0 %v9406_v0 }
0x14ed   :  { %v3151_v48 = vpop.xlane.xlu1 %3150 }
0x14ee   :  { %v3161_v27 = vmul.f32 0.03125, %v3151_v48 }
0x14f0   :  { %v3167_v62 = vadd.f32 1e-06, %v3161_v27 }
0x14f2   :  { %9203 = vrsqrt.f32 %v3167_v62 }
0x14fc   :  { %v9204_v32 = vpop.eup %9203 }
0x14fd   :  { %v3179_v52 = vmul.f32 %v9204_v32, %v3131_v3 }
0x14ff   :  { %v3191_v55 = vmul.f32 %v10327_v19, %v3179_v52 }
0x1501   :  { %v3203_v56 = vadd.f32 %v10336_v46, %v3191_v55 }
0x1503   :  { %8269 = vmatmul.mubr.msk.f32.gmra.mrb[80].mxu1 %vm203_vm1, %v3203_v56  ;;  %v9421_v56 = vmov -1.0  }
0x153d   :  { %v2982_v59 = vpop.f32.mrb[74].mxu1 }
0x153e   :  { %v8242_v31 = vpop.f32.mrb[75].mxu1  ;;  %8252 = vmatmul.mubr.msk.f32.gmra.mrb[74].mxu0 %vm444_vm3, %v2982_v59 }
0x153f   :  { %8254 = vmatprep.mubr.msk.f32.mxu0 %vm9408_vm2, %v9409_v10 }
0x1541   :  { %v2987_v63 = vpop.f32.mrb[76].mxu1 }
0x1542   :  { %v8245_v43 = vpop.f32.mrb[77].mxu1  ;;  %8255 = vmatmul.mubr.msk.f32.gmra.mrb[76].mxu0 %vm444_vm3, %v2987_v63 }
0x1545   :  { %v8267_v12 = vpop.f32.mrb[78].mxu1 }
0x1546   :  { %v3307_v25 = vadd.f32 %v8267_v12, %v10384_v22  ;;  %v3301_v8 = vpop.f32.mrb[79].mxu1 }
0x1547   :  { %v3302_v11 = vadd.f32 %v10384_v22, %v3301_v8 }
0x1548   :  { %v3337_v3 = vmul.f32 0.70710677, %v3307_v25 }
0x1549   :  { %v3336_v5 = vmul.f32 0.70710677, %v3302_v11 }
0x154a   :  { %v3355_v30 = vand.u32 2147483647, %v3337_v3  ;;  %vm3343_vm7 = vcmp.ge.f32.partialorder %v3337_v3, 0.0 }
0x154b   :  { %v3354_v14 = vand.u32 2147483647, %v3336_v5  ;;  %vm3342_vm8 = vcmp.ge.f32.partialorder %v3336_v5, 0.0  ;;  %v3349_v59 = vsel %vm3343_vm7, 1.0, %v9421_v56 }
0x154c   :  { %v3361_v7 = vmul.f32 0.3275911, %v3355_v30  ;;  %v3439_v61 = vsub.f32 0.0, %v3355_v30  ;;  %v3348_v43 = vsel %vm3342_vm8, 1.0, %v9421_v56 }
0x154d   :  { %v3360_v16 = vmul.f32 0.3275911, %v3354_v14  ;;  %v3438_v26 = vsub.f32 0.0, %v3354_v14 }
0x154e   :  { %v3367_v17 = vadd.f32 1.0, %v3361_v7  ;;  %v3445_v34 = vmul.f32 %v3439_v61, %v3355_v30  ;;  %v3330_v30 = vmul.f32 0.5, %v3302_v11  ;;  %v3331_v7 = vmul.f32 0.5, %v3307_v25 }
0x154f   :  { %v3366_v18 = vadd.f32 1.0, %v3360_v16  ;;  %v3444_v9 = vmul.f32 %v3438_v26, %v3354_v14 }
0x1550   :  { %9205 = vrcp.f32 %v3367_v17  ;;  %v3452_v13 = vmul.f32 1.442695, %v3445_v34 }
0x1551   :  { %9207 = vrcp.f32 %v3366_v18  ;;  %v3450_v41 = vmul.f32 1.442695, %v3444_v9 }
0x1552   :  { %9209 = vpow2.f32 %v3452_v13 }
0x1553   :  { %9211 = vpow2.f32 %v3450_v41 }
0x155a   :  { %v9206_v6 = vpop.eup %9205 }
0x155b   :  { %v9208_v1 = vpop.eup %9207  ;;  %v3385_v36 = vmul.f32 1.0614054, %v9206_v6 }
0x155c   :  { %v3384_v37 = vmul.f32 1.0614054, %v9208_v1  ;;  %v9210_v29 = vpop.eup %9209 }
0x155d   :  { %v3391_v39 = vadd.f32 -1.4531521, %v3385_v36  ;;  %v9212_v60 = vpop.eup %9211 }
0x155e   :  { %v3390_v40 = vadd.f32 -1.4531521, %v3384_v37 }
0x155f   :  { %v3397_v20 = vmul.f32 %v9206_v6, %v3391_v39 }
0x1560   :  { %v3396_v24 = vmul.f32 %v9208_v1, %v3390_v40 }
0x1561   :  { %v3403_v21 = vadd.f32 1.4214138, %v3397_v20 }
0x1562   :  { %v3402_v4 = vadd.f32 1.4214138, %v3396_v24 }
0x1563   :  { %v3409_v42 = vmul.f32 %v9206_v6, %v3403_v21 }
0x1564   :  { %v3408_v44 = vmul.f32 %v9208_v1, %v3402_v4 }
0x1565   :  { %v3415_v48 = vadd.f32 -0.28449672, %v3409_v42 }
0x1566   :  { %v3414_v28 = vadd.f32 -0.28449672, %v3408_v44 }
0x1567   :  { %v3421_v27 = vmul.f32 %v9206_v6, %v3415_v48 }
0x1568   :  { %v3420_v62 = vmul.f32 %v9208_v1, %v3414_v28 }
0x1569   :  { %v3427_v33 = vadd.f32 0.2548296, %v3421_v27 }
0x156a   :  { %v3426_v53 = vadd.f32 0.2548296, %v3420_v62 }
0x156b   :  { %v3433_v38 = vmul.f32 %v9206_v6, %v3427_v33 }
0x156c   :  { %v3432_v45 = vmul.f32 %v9208_v1, %v3426_v53 }
0x156d   :  { %v3463_v32 = vmul.f32 %v9210_v29, %v3433_v38 }
0x156e   :  { %v3462_v52 = vmul.f32 %v9212_v60, %v3432_v45 }
0x156f   :  { %v3469_v55 = vsub.f32 1.0, %v3463_v32 }
0x1570   :  { %v3468_v31 = vsub.f32 1.0, %v3462_v52 }
0x1571   :  { %v3475_v63 = vmul.f32 %v3469_v55, %v3349_v59 }
0x1572   :  { %v3474_v12 = vmul.f32 %v3468_v31, %v3348_v43 }
0x1573   :  { %v3481_v8 = vadd.f32 1.0, %v3475_v63 }
0x1574   :  { %v3480_v14 = vadd.f32 1.0, %v3474_v12 }
0x1575   :  { %v3487_v17 = vmul.f32 %v3481_v8, %v3331_v7 }
0x1576   :  { %v3486_v16 = vmul.f32 %v3480_v14, %v3330_v30 }
0x1578   :  { %8290 = vmatprep.mubr.msk.f32.mxu0 %vm83_vm0, %v3486_v16 }
0x1579   :  { %8291 = vmatmul.mubr.msk.f32.vlgmr.msra.gmra.mrb[78].mxu0 %vm83_vm0, %v3487_v17 }
0x15d6   :  { %v8270_v3 = vpop.f32.mrb[80].mxu1 }
0x15d7   :  { %v3317_v5 = vadd.f32 %v8270_v3, %v10384_v22  ;;  %v3311_v18 = vpop.f32.mrb[81].mxu1 }
0x15d8   :  { %v3312_v61 = vadd.f32 %v10384_v22, %v3311_v18 }
0x15d9   :  { %v3339_v26 = vmul.f32 0.70710677, %v3317_v5 }
0x15da   :  { %v3338_v6 = vmul.f32 0.70710677, %v3312_v61 }
0x15db   :  { %v3357_v34 = vand.u32 2147483647, %v3339_v26  ;;  %vm3345_vm9 = vcmp.ge.f32.partialorder %v3339_v26, 0.0 }
0x15dc   :  { %v3356_v1 = vand.u32 2147483647, %v3338_v6  ;;  %vm3344_vm10 = vcmp.ge.f32.partialorder %v3338_v6, 0.0  ;;  %v3351_v14 = vsel %vm3345_vm9, 1.0, %v9421_v56 }
0x15dd   :  { %v3363_v36 = vmul.f32 0.3275911, %v3357_v34  ;;  %v3441_v37 = vsub.f32 0.0, %v3357_v34  ;;  %v3350_v17 = vsel %vm3344_vm10, 1.0, %v9421_v56 }
0x15de   :  { %v3362_v11 = vmul.f32 0.3275911, %v3356_v1  ;;  %v3440_v39 = vsub.f32 0.0, %v3356_v1 }
0x15df   :  { %v3369_v9 = vadd.f32 1.0, %v3363_v36  ;;  %v3447_v40 = vmul.f32 %v3441_v37, %v3357_v34  ;;  %v3332_v34 = vmul.f32 0.5, %v3312_v61  ;;  %v3333_v36 = vmul.f32 0.5, %v3317_v5 }
0x15e0   :  { %v3368_v25 = vadd.f32 1.0, %v3362_v11  ;;  %v3446_v24 = vmul.f32 %v3440_v39, %v3356_v1 }
0x15e1   :  { %9213 = vrcp.f32 %v3369_v9  ;;  %v3456_v42 = vmul.f32 1.442695, %v3447_v40 }
0x15e2   :  { %9215 = vrcp.f32 %v3368_v25  ;;  %v3454_v28 = vmul.f32 1.442695, %v3446_v24 }
0x15e3   :  { %9217 = vpow2.f32 %v3456_v42 }
0x15e4   :  { %9219 = vpow2.f32 %v3454_v28 }
0x15eb   :  { %v9214_v13 = vpop.eup %9213 }
0x15ec   :  { %v9216_v20 = vpop.eup %9215  ;;  %v3387_v41 = vmul.f32 1.0614054, %v9214_v13 }
0x15ed   :  { %v3386_v21 = vmul.f32 1.0614054, %v9216_v20  ;;  %v9218_v31 = vpop.eup %9217 }
0x15ee   :  { %v3393_v4 = vadd.f32 -1.4531521, %v3387_v41  ;;  %v9220_v43 = vpop.eup %9219 }
0x15ef   :  { %v3392_v44 = vadd.f32 -1.4531521, %v3386_v21 }
0x15f0   :  { %v3399_v48 = vmul.f32 %v9214_v13, %v3393_v4 }
0x15f1   :  { %v3398_v27 = vmul.f32 %v9216_v20, %v3392_v44 }
0x15f2   :  { %v3405_v62 = vadd.f32 1.4214138, %v3399_v48 }
0x15f3   :  { %v3404_v33 = vadd.f32 1.4214138, %v3398_v27 }
0x15f4   :  { %v3411_v53 = vmul.f32 %v9214_v13, %v3405_v62 }
0x15f5   :  { %v3410_v38 = vmul.f32 %v9216_v20, %v3404_v33 }
0x15f6   :  { %v3417_v29 = vadd.f32 -0.28449672, %v3411_v53 }
0x15f7   :  { %v3416_v45 = vadd.f32 -0.28449672, %v3410_v38 }
0x15f8   :  { %v3423_v60 = vmul.f32 %v9214_v13, %v3417_v29 }
0x15f9   :  { %v3422_v32 = vmul.f32 %v9216_v20, %v3416_v45 }
0x15fa   :  { %v3429_v52 = vadd.f32 0.2548296, %v3423_v60 }
0x15fb   :  { %v3428_v55 = vadd.f32 0.2548296, %v3422_v32 }
0x15fc   :  { %v3435_v59 = vmul.f32 %v9214_v13, %v3429_v52 }
0x15fd   :  { %v3434_v63 = vmul.f32 %v9216_v20, %v3428_v55 }
0x15fe   :  { %v3465_v12 = vmul.f32 %v9218_v31, %v3435_v59 }
0x15ff   :  { %v3464_v8 = vmul.f32 %v9220_v43, %v3434_v63 }
0x1600   :  { %v3471_v30 = vsub.f32 1.0, %v3465_v12 }
0x1601   :  { %v3470_v7 = vsub.f32 1.0, %v3464_v8 }
0x1602   :  { %v3477_v16 = vmul.f32 %v3471_v30, %v3351_v14 }
0x1603   :  { %v3476_v3 = vmul.f32 %v3470_v7, %v3350_v17 }
0x1604   :  { %v3483_v18 = vadd.f32 1.0, %v3477_v16 }
0x1605   :  { %v3482_v1 = vadd.f32 1.0, %v3476_v3  ;;  %v7391_v3 = vld [vmem:[%s11395_s5 + $0x20] sm:$0xff] }
0x1606   :  { %v3489_v9 = vmul.f32 %v3483_v18, %v3333_v36  ;;  %v7392_v18 = vld [vmem:[%s11395_s5 + $0x28] sm:$0xff]  ;;  %v7394_v36 = vld [vmem:[%s11395_s5 + $0x38] sm:$0xff] }
0x1607   :  { %v3488_v11 = vmul.f32 %v3482_v1, %v3332_v34  ;;  %v8812_v34 = vpack.c.bf16 %v7392_v18, %v7391_v3  ;;  %v7393_v1 = vld [vmem:[%s11395_s5 + $0x30] sm:$0xff]  ;;  %s11435_s5 = smov 48  }
0x1609   :  { %8293 = vmatprep.mubr.msk.f32.mxu0 %vm83_vm0, %v3488_v11  ;;  %8813 = vmatprep.subr.bf16.mxu1 %v8812_v34  ;;  %v8816_v11 = vpack.c.bf16 %v7394_v36, %v7393_v1 }
0x160a   :  { %8294 = vmatmul.mubr.msk.f32.gmra.mrb[80].mxu0 %vm83_vm0, %v3489_v9  ;;  %8815 = vmatpush3.bf16.msra.mxu1 %v8812_v34 }
0x160b   :  { %8817 = vmatprep.subr.bf16.mxu1 %v8816_v11 }
0x160e   :  { %8819 = vmatpush3.bf16.msra.mxu1 %v8816_v11 }
0x160f   :  { %8824 = vmatprep.subr.bf16.mxu1 %v9406_v0 }
0x1611   :  { %v3071_v26 = vpop.f32.mrb[74].mxu0 }
0x1612   :  { %v3081_v6 = vadd.f32 %v3071_v26, %v10238_v47  ;;  %v8253_v25 = vpop.f32.mrb[75].mxu0 }
0x1614   :  { %v3094_v37 = vadd.f32 %v10252_v58, %v3081_v6 }
0x1615   :  { %v3076_v39 = vpop.f32.mrb[76].mxu0 }
0x1616   :  { %v10401_v13 = vadd.f32 %v3094_v37, %v9614_v50  ;;  %v3082_v61 = vadd.f32 %v3076_v39, %v10241_v51  ;;  %v8256_v40 = vpop.f32.mrb[77].mxu0  ;;  %v10415_v50 = vld [vmem:[%s11404_s14] ss:$0 sm:$0xff] }
0x1618   :  { %v3095_v5 = vadd.f32 %v10252_v58, %v3082_v61  ;;  %v3116_v20 = vsel %vm203_vm1, %v10401_v13, 0.0 }
0x1619   :  { %3117 = vadd.xlane.f32.xlu0 %v3116_v20 }
0x161a   :  { %v10408_v41 = vadd.f32 %v3095_v5, %v9628_v57 }
0x161c   :  { %v3119_v47 = vsel %vm203_vm1, %v10408_v41, 0.0 }
0x161d   :  { %3120 = vadd.xlane.f32.xlu1 %v3119_v47 }
0x164c   :  { %v8292_v51 = vpop.f32.mrb[78].mxu0 }
0x164d   :  { %v3597_v24 = vadd.f32 %v8292_v51, %v10415_v50  ;;  %v3591_v58 = vpop.f32.mrb[79].mxu0 }
0x164e   :  { %v3592_v21 = vadd.f32 %v10415_v50, %v3591_v58 }
0x164f   :  { %v10420_v4 = vadd.f32 %v3597_v24, %v10264_v23 }
0x1650   :  { %v10423_v57 = vadd.f32 %v3592_v21, %v10258_v54 }
0x1651   :  { %v3633_v42 = vsel %vm203_vm1, %v10420_v4, 0.0 }
0x1652   :  { %3634 = vadd.xlane.f32.xlu1 %v3633_v42  ;;  %v3630_v44 = vsel %vm203_vm1, %v10423_v57, 0.0 }
0x1653   :  { %3631 = vadd.xlane.f32.xlu0 %v3630_v44 }
0x16a6   :  { %v3118_v28 = vpop.xlane.xlu0 %3117 }
0x16a7   :  { %v3126_v62 = vmul.f32 0.03125, %v3118_v28 }
0x16a9   :  { %v10434_v38 = vsub.f32 %v10401_v13, %v3126_v62 }
0x16aa   :  { %v3121_v48 = vpop.xlane.xlu1 %3120 }
0x16ab   :  { %v3127_v27 = vmul.f32 0.03125, %v3121_v48 }
0x16ad   :  { %v10430_v53 = vsub.f32 %v10408_v41, %v3127_v27 }
0x16af   :  { %v3139_v43 = vmul.f32 %v10430_v53, %v10430_v53 }
0x16b1   :  { %v3155_v8 = vsel %vm203_vm1, %v3139_v43, 0.0 }
0x16dd   :  { %v8295_v33 = vpop.f32.mrb[80].mxu0 }
0x16de   :  { %v3607_v23 = vadd.f32 %v8295_v33, %v10415_v50  ;;  %v3601_v54 = vpop.f32.mrb[81].mxu0 }
0x16df   :  { %v3602_v29 = vadd.f32 %v10415_v50, %v3601_v54  ;;  %v3635_v45 = vpop.xlane.xlu1 %3634 }
0x16e0   :  { %v10438_v60 = vadd.f32 %v3607_v23, %v10303_v49  ;;  %v3649_v32 = vmul.f32 0.03125, %v3635_v45  ;;  %v3632_v52 = vpop.xlane.xlu0 %3631 }
0x16e1   :  { %v10441_v55 = vadd.f32 %v3602_v29, %v10271_v2  ;;  %v3648_v59 = vmul.f32 0.03125, %v3632_v52  ;;  %v3138_v2 = vmul.f32 %v10434_v38, %v10434_v38 }
0x16e2   :  { %v10444_v31 = vsub.f32 %v10420_v4, %v3649_v32  ;;  %v3639_v63 = vsel %vm203_vm1, %v10438_v60, 0.0 }
0x16e3   :  { %v10451_v12 = vsub.f32 %v10423_v57, %v3648_v59  ;;  %3640 = vadd.xlane.f32.xlu1 %v3639_v63  ;;  %v3636_v49 = vsel %vm203_vm1, %v10441_v55, 0.0  ;;  %v3152_v14 = vsel %vm203_vm1, %v3138_v2, 0.0  ;;  %v10488_v59 = vld [vmem:[%s11431_s25 + $0x1] ss:$0 sm:$0xff]  ;;  %s11438_s25 = smov 40  }
0x16e4   :  { %3637 = vadd.xlane.f32.xlu0 %v3636_v49  ;;  %v3661_v30 = vmul.f32 %v10444_v31, %v10444_v31 }
0x16e5   :  { %v3660_v7 = vmul.f32 %v10451_v12, %v10451_v12 }
0x16e6   :  { %v3669_v16 = vsel %vm203_vm1, %v3661_v30, 0.0  ;;  %v10499_v30 = vld [vmem:[%s11394_s4 + $0x1] ss:$0 sm:$0xff] }
0x16e7   :  { %3156 = vadd.xlane.f32.xlu1 %v3155_v8  ;;  %v3666_v17 = vsel %vm203_vm1, %v3660_v7, 0.0 }
0x16e8   :  { %3153 = vadd.xlane.f32.xlu0 %v3152_v14 }
0x16eb   :  { %3670 = vadd.xlane.f32.xlu1 %v3669_v16 }
0x16ec   :  { %3667 = vadd.xlane.f32.xlu0 %v3666_v17 }
0x1770   :  { %v3641_v9 = vpop.xlane.xlu1 %3640 }
0x1771   :  { %v3651_v26 = vmul.f32 0.03125, %v3641_v9  ;;  %v3638_v6 = vpop.xlane.xlu0 %3637 }
0x1772   :  { %v3650_v25 = vmul.f32 0.03125, %v3638_v6 }
0x1773   :  { %v3657_v37 = vsub.f32 %v10438_v60, %v3651_v26 }
0x1774   :  { %v3656_v39 = vsub.f32 %v10441_v55, %v3650_v25  ;;  %v3157_v61 = vpop.xlane.xlu1 %3156 }
0x1775   :  { %v3163_v40 = vmul.f32 0.03125, %v3157_v61  ;;  %v3154_v5 = vpop.xlane.xlu0 %3153  ;;  %v3663_v20 = vmul.f32 %v3657_v37, %v3657_v37 }
0x1776   :  { %v3162_v47 = vmul.f32 0.03125, %v3154_v5  ;;  %v3662_v51 = vmul.f32 %v3656_v39, %v3656_v39 }
0x1777   :  { %v3169_v24 = vadd.f32 1e-06, %v3163_v40  ;;  %v3675_v58 = vsel %vm203_vm1, %v3663_v20, 0.0 }
0x1778   :  { %v3168_v21 = vadd.f32 1e-06, %v3162_v47  ;;  %3676 = vadd.xlane.f32.xlu1 %v3675_v58  ;;  %v3671_v42 = vpop.xlane.xlu1 %3670  ;;  %v3672_v44 = vsel %vm203_vm1, %v3662_v51, 0.0 }
0x1779   :  { %9221 = vrsqrt.f32 %v3169_v24  ;;  %v3685_v48 = vmul.f32 0.03125, %v3671_v42  ;;  %3673 = vadd.xlane.f32.xlu0 %v3672_v44  ;;  %v3668_v28 = vpop.xlane.xlu0 %3667 }
0x177a   :  { %9223 = vrsqrt.f32 %v3168_v21  ;;  %v3684_v27 = vmul.f32 0.03125, %v3668_v28 }
0x177b   :  { %v3691_v62 = vadd.f32 1e-06, %v3685_v48 }
0x177c   :  { %v3690_v33 = vadd.f32 1e-06, %v3684_v27 }
0x177d   :  { %9225 = vrsqrt.f32 %v3691_v62 }
0x177e   :  { %9227 = vrsqrt.f32 %v3690_v33 }
0x1783   :  { %v9222_v23 = vpop.eup %9221 }
0x1784   :  { %v9224_v54 = vpop.eup %9223  ;;  %v3181_v29 = vmul.f32 %v9222_v23, %v10430_v53 }
0x1785   :  { %v3180_v45 = vmul.f32 %v9224_v54, %v10434_v38 }
0x1786   :  { %v3193_v32 = vmul.f32 %v10327_v19, %v3181_v29 }
0x1787   :  { %v9226_v52 = vpop.eup %9225  ;;  %v3192_v63 = vmul.f32 %v10327_v19, %v3180_v45 }
0x1788   :  { %v9228_v43 = vpop.eup %9227  ;;  %v3703_v49 = vmul.f32 %v9226_v52, %v10444_v31  ;;  %v3205_v38 = vadd.f32 %v10336_v46, %v3193_v32 }
0x1789   :  { %v3204_v2 = vadd.f32 %v10336_v46, %v3192_v63  ;;  %v3702_v8 = vmul.f32 %v9228_v43, %v10451_v12 }
0x178a   :  { %v3715_v53 = vmul.f32 %v10488_v59, %v3703_v49 }
0x178b   :  { %8271 = vmatprep.mubr.msk.f32.mxu1 %vm203_vm1, %v3204_v2  ;;  %v3714_v19 = vmul.f32 %v10488_v59, %v3702_v8 }
0x178c   :  { %8272 = vmatmul.mubr.msk.f32.gmra.mrb[82].mxu1 %vm203_vm1, %v3205_v38  ;;  %v3727_v14 = vadd.f32 %v10499_v30, %v3715_v53 }
0x178d   :  { %v3726_v31 = vadd.f32 %v10499_v30, %v3714_v19 }
0x178f   :  { %8307 = vmatprep.mubr.msk.f32.mxu1 %vm203_vm1, %v3726_v31 }
0x1790   :  { %8308 = vmatmul.mubr.msk.f32.vlgmr.msra.gmra.mrb[84].mxu1 %vm203_vm1, %v3727_v14 }
0x1805   :  { %v3677_v46 = vpop.xlane.xlu1 %3676 }
0x1806   :  { %v3687_v12 = vmul.f32 0.03125, %v3677_v46  ;;  %v3674_v7 = vpop.xlane.xlu0 %3673 }
0x1807   :  { %v3686_v16 = vmul.f32 0.03125, %v3674_v7 }
0x1808   :  { %v3693_v17 = vadd.f32 1e-06, %v3687_v12 }
0x1809   :  { %v3692_v3 = vadd.f32 1e-06, %v3686_v16 }
0x180a   :  { %9229 = vrsqrt.f32 %v3693_v17 }
0x180b   :  { %9231 = vrsqrt.f32 %v3692_v3 }
0x1814   :  { %v9230_v18 = vpop.eup %9229 }
0x1815   :  { %v9232_v34 = vpop.eup %9231  ;;  %v3705_v1 = vmul.f32 %v9230_v18, %v3657_v37 }
0x1816   :  { %v3704_v36 = vmul.f32 %v9232_v34, %v3656_v39  ;;  %v10521_v39 = vld [vmem:[%s11396_s6 + $0x1] ss:$0 sm:$0xff] }
0x1817   :  { %v3717_v11 = vmul.f32 %v10488_v59, %v3705_v1 }
0x1818   :  { %v3716_v9 = vmul.f32 %v10488_v59, %v3704_v36 }
0x1819   :  { %v3729_v6 = vadd.f32 %v10499_v30, %v3717_v11 }
0x181a   :  { %v3728_v26 = vadd.f32 %v10499_v30, %v3716_v9 }
0x181c   :  { %8310 = vmatprep.mubr.msk.f32.mxu1 %vm203_vm1, %v3728_v26 }
0x181d   :  { %8311 = vmatmul.mubr.msk.f32.gmra.mrb[86].mxu1 %vm203_vm1, %v3729_v6 }
0x185f   :  { %v8273_v25 = vpop.f32.mrb[82].mxu1 }
0x1860   :  { %v10515_v61 = vadd.f32 %v8273_v25, %v10384_v22  ;;  %v3321_v40 = vpop.f32.mrb[83].mxu1 }
0x1861   :  { %v3322_v37 = vadd.f32 %v10384_v22, %v3321_v40 }
0x1862   :  { %v3341_v5 = vmul.f32 0.70710677, %v10515_v61 }
0x1863   :  { %v3340_v20 = vmul.f32 0.70710677, %v3322_v37  ;;  %v8309_v47 = vpop.f32.mrb[84].mxu1 }
0x1864   :  { %v3359_v51 = vand.u32 2147483647, %v3341_v5  ;;  %v10525_v24 = vadd.f32 %v8309_v47, %v10521_v39  ;;  %v3829_v58 = vpop.f32.mrb[85].mxu1  ;;  %vm3347_vm11 = vcmp.ge.f32.partialorder %v3341_v5, 0.0 }
0x1865   :  { %v3358_v21 = vand.u32 2147483647, %v3340_v20  ;;  %v10528_v42 = vadd.f32 %v10521_v39, %v3829_v58  ;;  %vm3346_vm12 = vcmp.ge.f32.partialorder %v3340_v20, 0.0  ;;  %v3353_v6 = vsel %vm3347_vm11, 1.0, %v9421_v56 }
0x1866   :  { %v3365_v44 = vmul.f32 0.3275911, %v3359_v51  ;;  %v3443_v62 = vsub.f32 0.0, %v3359_v51  ;;  %v3352_v47 = vsel %vm3346_vm12, 1.0, %v9421_v56 }
0x1867   :  { %v3364_v22 = vmul.f32 0.3275911, %v3358_v21  ;;  %v10532_v48 = vpack.i.bf16 %v10525_v24, %v10528_v42  ;;  %v3442_v33 = vsub.f32 0.0, %v3358_v21 }
0x1868   :  { %v3371_v28 = vadd.f32 1.0, %v3365_v44  ;;  %v3449_v54 = vmul.f32 %v3443_v62, %v3359_v51 }
0x1869   :  { %v3370_v27 = vadd.f32 1.0, %v3364_v22  ;;  %9010 = vrot.lane.b32.xlu0 %v10532_v48, %s9407_s28  ;;  %v3448_v32 = vmul.f32 %v3442_v33, %v3358_v21  ;;  %v3334_v21 = vmul.f32 0.5, %v3322_v37  ;;  %v3335_v22 = vmul.f32 0.5, %v10515_v61 }
0x186a   :  { %9233 = vrcp.f32 %v3371_v28  ;;  %v3460_v43 = vmul.f32 1.442695, %v3449_v54 }
0x186b   :  { %9235 = vrcp.f32 %v3370_v27  ;;  %v3458_v8 = vmul.f32 1.442695, %v3448_v32 }
0x186c   :  { %9237 = vpow2.f32 %v3460_v43 }
0x186d   :  { %4101 = vrot.lane.b32.xlu0 %v10528_v42, %s9410_s29  ;;  %9239 = vpow2.f32 %v3458_v8 }
0x1874   :  { %v9234_v23 = vpop.eup %9233 }
0x1875   :  { %v9236_v29 = vpop.eup %9235  ;;  %v3389_v45 = vmul.f32 1.0614054, %v9234_v23 }
0x1876   :  { %v3388_v52 = vmul.f32 1.0614054, %v9236_v29  ;;  %v9238_v34 = vpop.eup %9237 }
0x1877   :  { %v3395_v63 = vadd.f32 -1.4531521, %v3389_v45  ;;  %v9240_v36 = vpop.eup %9239 }
0x1878   :  { %v3394_v49 = vadd.f32 -1.4531521, %v3388_v52 }
0x1879   :  { %v3401_v2 = vmul.f32 %v9234_v23, %v3395_v63 }
0x187a   :  { %v3400_v53 = vmul.f32 %v9236_v29, %v3394_v49 }
0x187b   :  { %v3407_v38 = vadd.f32 1.4214138, %v3401_v2 }
0x187c   :  { %v3406_v19 = vadd.f32 1.4214138, %v3400_v53 }
0x187d   :  { %v3413_v31 = vmul.f32 %v9234_v23, %v3407_v38 }
0x187e   :  { %v3412_v14 = vmul.f32 %v9236_v29, %v3406_v19 }
0x187f   :  { %v3419_v46 = vadd.f32 -0.28449672, %v3413_v31 }
0x1880   :  { %v3418_v12 = vadd.f32 -0.28449672, %v3412_v14 }
0x1881   :  { %v3425_v7 = vmul.f32 %v9234_v23, %v3419_v46 }
0x1882   :  { %v3424_v16 = vmul.f32 %v9236_v29, %v3418_v12 }
0x1883   :  { %v3431_v17 = vadd.f32 0.2548296, %v3425_v7 }
0x1884   :  { %v3430_v3 = vadd.f32 0.2548296, %v3424_v16 }
0x1885   :  { %v3437_v18 = vmul.f32 %v9234_v23, %v3431_v17 }
0x1886   :  { %v3436_v1 = vmul.f32 %v9236_v29, %v3430_v3 }
0x1887   :  { %v3467_v11 = vmul.f32 %v9238_v34, %v3437_v18 }
0x1888   :  { %v3466_v9 = vmul.f32 %v9240_v36, %v3436_v1 }
0x1889   :  { %v3473_v26 = vsub.f32 1.0, %v3467_v11 }
0x188a   :  { %v3472_v25 = vsub.f32 1.0, %v3466_v9 }
0x188b   :  { %v3479_v40 = vmul.f32 %v3473_v26, %v3353_v6 }
0x188c   :  { %v3478_v51 = vmul.f32 %v3472_v25, %v3352_v47 }
0x188d   :  { %v3485_v58 = vadd.f32 1.0, %v3479_v40 }
0x188e   :  { %v3484_v44 = vadd.f32 1.0, %v3478_v51 }
0x188f   :  { %v3491_v27 = vmul.f32 %v3485_v58, %v3335_v22 }
0x1890   :  { %v3490_v28 = vmul.f32 %v3484_v44, %v3334_v21 }
0x1892   :  { %8296 = vmatprep.mubr.msk.f32.mxu0 %vm83_vm0, %v3490_v28 }
0x1893   :  { %8297 = vmatmul.mubr.msk.f32.gmra.mrb[82].mxu0 %vm83_vm0, %v3491_v27 }
0x1894   :  { %8322 = vmatprep.mubr.msk.f32.mxu0 %vm9408_vm2, %v9409_v10 }
0x18db   :  { %v9011_v5 = vpop.permute.xlu0 %9010 }
0x18dc   :  { %v9013_v20 = vunpack.i.h.bf16 %v9011_v5  ;;  %v9012_v62 = vunpack.i.l.bf16 %v9011_v5 }
0x18de   :  { %v8821_v33 = vpack.c.bf16 %v9013_v20, %v9012_v62 }
0x18df   :  { %v4102_v53 = vpop.permute.xlu0 %4101 }
0x18e0   :  { %8823 = vmatpush3.bf16.xpose.msk.msra.mxu0 %vm9711_vm4, %v8821_v33 }
0x18e1   :  { %8320 = vmatprep.subr.mxu0 %v9409_v10 }
0x18f0   :  { %v10548_v37 = vpop.f32.mrb[86].mxu1 }
0x18f1   :  { %v3839_v61 = vpop.f32.mrb[87].mxu1 }
0x18f2   :  { %v10551_v23 = vadd.f32 %v10521_v39, %v3839_v61 }
0x18f4   :  { %4105 = vrot.lane.b32.xlu0 %v10551_v23, %s9410_s29  ;;  %3870 = vrot.lane.b32.xlu1 %v10551_v23, %s9407_s28 }
0x18f8   :  { %9015 = vrot.lane.b32.xlu1 %v10532_v48, %s9411_s30 }
0x18fc   :  { %4111 = vrot.lane.b32.xlu1 %v10551_v23, %s9411_s30 }
0x1900   :  { %4103 = vrot.lane.b32.xlu1 %v10525_v24, %s9410_s29 }
0x1966   :  { %v8298_v54 = vpop.f32.mrb[82].mxu0  ;;  %v3871_v29 = vpop.permute.xlu1 %3870 }
0x1967   :  { %v3617_v39 = vadd.f32 %v8298_v54, %v10415_v50  ;;  %v3611_v45 = vpop.f32.mrb[83].mxu0  ;;  %8321 = vmatpush3.xpose.msk.msra.mxu0 %vm444_vm3, %v3871_v29  ;;  %v4106_v19 = vpop.permute.xlu0 %4105 }
0x1968   :  { %v3612_v32 = vadd.f32 %v10415_v50, %v3611_v45  ;;  %8827 = vmatprep.subr.bf16.mxu0 %v9406_v0 }
0x1969   :  { %v10568_v52 = vadd.f32 %v3617_v39, %v10408_v41 }
0x196a   :  { %v10571_v63 = vadd.f32 %v3612_v32, %v10401_v13  ;;  %v9016_v43 = vpop.permute.xlu1 %9015  ;;  %8323 = vmatmul.mubr.msk.f32.vlgmr.msra.gmra.mrb[84].mxu0 %vm444_vm3, %v10528_v42 }
0x196b   :  { %v9018_v49 = vunpack.i.h.bf16 %v9016_v43  ;;  %v9017_v2 = vunpack.i.l.bf16 %v9016_v43  ;;  %v3645_v8 = vsel %vm203_vm1, %v10568_v52, 0.0  ;;  %8325 = vmatprep.mubr.msk.f32.mxu0 %vm9408_vm2, %v9409_v10 }
0x196c   :  { %3646 = vadd.xlane.f32.xlu0 %v3645_v8  ;;  %v3642_v41 = vsel %vm203_vm1, %v10571_v63, 0.0 }
0x196d   :  { %v8828_v50 = vpack.c.bf16 %v9018_v49, %v9017_v2  ;;  %3643 = vadd.xlane.f32.xlu1 %v3642_v41 }
0x196e   :  { %8326 = vmatmul.mubr.msk.f32.gmra.mrb[86].mxu0 %vm444_vm3, %v10525_v24  ;;  %v4112_v13 = vpop.permute.xlu1 %4111 }
0x196f   :  { %8830 = vmatpush3.bf16.xpose.msk.msra.mxu0 %vm9711_vm4, %v8828_v50  ;;  %8328 = vmatprep.mubr.msk.f32.mxu0 %vm9408_vm2, %v9409_v10 }
0x1970   :  { %8350 = vmatprep.subr.mxu0 %v9409_v10 }
0x1972   :  { %8329 = vmatmul.mubr.msk.f32.gmra.mrb[88].mxu0 %vm444_vm3, %v10551_v23  ;;  %v4104_v38 = vpop.permute.xlu1 %4103 }
0x1973   :  { %8352 = vmatprep.mubr.msk.f32.mxu0 %vm9408_vm2, %v9409_v10 }
0x1977   :  { %8351 = vmatpush3.xpose.msk.msra.mxu0 %vm444_vm3, %v4112_v13 }
0x1978   :  { %8376 = vmatprep.subr.mxu0 %v9409_v10 }
0x197a   :  { %8353 = vmatmul.mubr.msk.f32.vlgmr.msra.gmra.mrb[90].mxu0 %vm444_vm3, %v4102_v53 }
0x197b   :  { %8355 = vmatprep.mubr.msk.f32.mxu0 %vm9408_vm2, %v9409_v10 }
0x197e   :  { %8356 = vmatmul.mubr.msk.f32.gmra.mrb[92].mxu0 %vm444_vm3, %v4104_v38 }
0x197f   :  { %8358 = vmatprep.mubr.msk.f32.mxu0 %vm9408_vm2, %v9409_v10 }
0x1982   :  { %8359 = vmatmul.mubr.msk.f32.gmra.mrb[94].mxu0 %vm444_vm3, %v4106_v19 }
0x1983   :  { %8378 = vmatprep.mubr.msk.f32.mxu0 %vm9408_vm2, %v9409_v10 }
0x19f9   :  { %v3647_v58 = vpop.xlane.xlu0 %3646 }
0x19fa   :  { %v3644_v6 = vpop.xlane.xlu1 %3643  ;;  %v3653_v22 = vmul.f32 0.03125, %v3647_v58 }
0x19fb   :  { %v3652_v40 = vmul.f32 0.03125, %v3644_v6 }
0x19fc   :  { %v10616_v61 = vsub.f32 %v10568_v52, %v3653_v22 }
0x19fd   :  { %v10611_v28 = vsub.f32 %v10571_v63, %v3652_v40 }
0x19fe   :  { %v3665_v2 = vmul.f32 %v10616_v61, %v10616_v61 }
0x19ff   :  { %v3664_v45 = vmul.f32 %v10611_v28, %v10611_v28 }
0x1a00   :  { %v3681_v8 = vsel %vm203_vm1, %v3665_v2, 0.0 }
0x1a01   :  { %v3678_v43 = vsel %vm203_vm1, %v3664_v45, 0.0 }
0x1a3d   :  { %v3950_v31 = vpop.f32.mrb[84].mxu0 }
0x1a3e   :  { %v3964_v14 = vmul.f32 0.35355338, %v3950_v31  ;;  %v8324_v46 = vpop.f32.mrb[85].mxu0 }
0x1a40   :  { %v3967_v12 = vadd.f32 %v3964_v14, %v9750_v35 }
0x1a41   :  { %v3955_v7 = vpop.f32.mrb[86].mxu0 }
0x1a42   :  { %v3965_v16 = vmul.f32 0.35355338, %v3955_v7  ;;  %v8327_v17 = vpop.f32.mrb[87].mxu0  ;;  %v3970_v3 = vsel %vm543_vm6, %v3967_v12, -inf }
0x1a43   :  { %3971 = vmax.xlane.f32.xlu0 %v3970_v3 }
0x1a44   :  { %v3968_v18 = vadd.f32 %v3965_v16, %v9750_v35 }
0x1a45   :  { %v3960_v34 = vpop.f32.mrb[88].mxu0 }
0x1a46   :  { %v3966_v1 = vmul.f32 0.35355338, %v3960_v34  ;;  %v8330_v36 = vpop.f32.mrb[89].mxu0  ;;  %v3973_v11 = vsel %vm543_vm6, %v3968_v18, -inf }
0x1a47   :  { %3974 = vmax.xlane.f32.xlu0 %v3973_v11 }
0x1a48   :  { %v3969_v9 = vadd.f32 %v3966_v1, %v9750_v35 }
0x1a4a   :  { %v3976_v26 = vsel %vm543_vm6, %v3969_v9, -inf }
0x1a4b   :  { %3977 = vmax.xlane.f32.xlu1 %v3976_v26 }
0x1a4d   :  { %v4191_v25 = vpop.f32.mrb[90].mxu0 }
0x1a4e   :  { %v4205_v47 = vmul.f32 0.35355338, %v4191_v25  ;;  %v8354_v51 = vpop.f32.mrb[91].mxu0 }
0x1a50   :  { %v4208_v21 = vadd.f32 %v4205_v47, %v9750_v35 }
0x1a51   :  { %v4196_v44 = vpop.f32.mrb[92].mxu0 }
0x1a52   :  { %v4206_v27 = vmul.f32 0.35355338, %v4196_v44  ;;  %v8357_v5 = vpop.f32.mrb[93].mxu0  ;;  %v4211_v20 = vsel %vm543_vm6, %v4208_v21, -inf }
0x1a53   :  { %4212 = vmax.xlane.f32.xlu0 %v4211_v20 }
0x1a54   :  { %v4209_v62 = vadd.f32 %v4206_v27, %v9750_v35 }
0x1a55   :  { %v4201_v33 = vpop.f32.mrb[94].mxu0 }
0x1a56   :  { %v4207_v54 = vmul.f32 0.35355338, %v4201_v33  ;;  %v8360_v29 = vpop.f32.mrb[95].mxu0  ;;  %v4214_v39 = vsel %vm543_vm6, %v4209_v62, -inf }
0x1a57   :  { %4215 = vmax.xlane.f32.xlu1 %v4214_v39 }
0x1a58   :  { %v4210_v32 = vadd.f32 %v4207_v54, %v9750_v35 }
0x1a5a   :  { %v4217_v49 = vsel %vm543_vm6, %v4210_v32, -inf }
0x1a5b   :  { %3679 = vadd.xlane.f32.xlu1 %v3678_v43  ;;  %4218 = vmax.xlane.f32.xlu0 %v4217_v49 }
0x1a5f   :  { %3682 = vadd.xlane.f32.xlu0 %v3681_v8 }
0x1a6c   :  { %4007 = vrot.lane.b32.xlu1 %v10551_v23, %s9413_s21 }
0x1a75   :  { %9020 = vrot.lane.b32.xlu0 %v10532_v48, %s9413_s21 }
0x1ad0   :  { %v3972_v41 = vpop.xlane.xlu0 %3971 }
0x1ad1   :  { %v3979_v50 = vsub.f32 %v3967_v12, %v3972_v41 }
0x1ad3   :  { %v3982_v13 = vmul.f32 1.442695, %v3979_v50 }
0x1ad4   :  { %v3975_v53 = vpop.xlane.xlu0 %3974 }
0x1ad5   :  { %9241 = vpow2.f32 %v3982_v13  ;;  %v3980_v38 = vsub.f32 %v3968_v18, %v3975_v53 }
0x1ad7   :  { %v3984_v19 = vmul.f32 1.442695, %v3980_v38 }
0x1ad8   :  { %v3978_v31 = vpop.xlane.xlu1 %3977 }
0x1ad9   :  { %9243 = vpow2.f32 %v3984_v19  ;;  %v3981_v14 = vsub.f32 %v3969_v9, %v3978_v31 }
0x1adb   :  { %v3986_v46 = vmul.f32 1.442695, %v3981_v14 }
0x1add   :  { %9245 = vpow2.f32 %v3986_v46 }
0x1adf   :  { %v10631_v7 = vpop.eup %9241 }
0x1ae0   :  { %v4213_v16 = vpop.xlane.xlu0 %4212  ;;  %v3988_v17 = vsel %vm543_vm6, %v10631_v7, 0.0 }
0x1ae1   :  { %v4220_v3 = vsub.f32 %v4208_v21, %v4213_v16  ;;  %3989 = vadd.xlane.f32.xlu1 %v3988_v17 }
0x1ae3   :  { %v10635_v34 = vpop.eup %9243  ;;  %v4223_v12 = vmul.f32 1.442695, %v4220_v3 }
0x1ae4   :  { %v4216_v1 = vpop.xlane.xlu1 %4215  ;;  %v3991_v18 = vsel %vm543_vm6, %v10635_v34, 0.0 }
0x1ae5   :  { %9247 = vpow2.f32 %v4223_v12  ;;  %v4221_v36 = vsub.f32 %v4209_v62, %v4216_v1  ;;  %3992 = vadd.xlane.f32.xlu0 %v3991_v18 }
0x1ae7   :  { %v10639_v11 = vpop.eup %9245  ;;  %v4225_v9 = vmul.f32 1.442695, %v4221_v36 }
0x1ae8   :  { %v3680_v26 = vpop.xlane.xlu1 %3679  ;;  %v4219_v6 = vpop.xlane.xlu0 %4218  ;;  %v3994_v25 = vsel %vm543_vm6, %v10639_v11, 0.0 }
0x1ae9   :  { %9249 = vpow2.f32 %v4225_v9  ;;  %v3688_v40 = vmul.f32 0.03125, %v3680_v26  ;;  %v4222_v47 = vsub.f32 %v4210_v32, %v4219_v6  ;;  %3995 = vadd.xlane.f32.xlu1 %v3994_v25 }
0x1aeb   :  { %v3694_v51 = vadd.f32 1e-06, %v3688_v40  ;;  %v4227_v58 = vmul.f32 1.442695, %v4222_v47  ;;  %v10710_v47 = vld [vmem:[%s11397_s7 + $0x20] sm:$0xff] }
0x1aec   :  { %v3683_v21 = vpop.xlane.xlu0 %3682  ;;  %v4008_v43 = vpop.permute.xlu1 %4007 }
0x1aed   :  { %9251 = vrsqrt.f32 %v3694_v51  ;;  %v3689_v44 = vmul.f32 0.03125, %v3683_v21  ;;  %v10721_v21 = vld [vmem:[%s11397_s7 + $0x28] sm:$0xff] }
0x1aee   :  { %9253 = vpow2.f32 %v4227_v58  ;;  %8377 = vmatpush3.msra.mxu0 %v10721_v21 }
0x1aef   :  { %v10643_v22 = vpop.eup %9247  ;;  %v3695_v27 = vadd.f32 1e-06, %v3689_v44  ;;  %8834 = vmatprep.subr.bf16.mxu0 %v9406_v0 }
0x1af0   :  { %v9021_v5 = vpop.permute.xlu0 %9020  ;;  %v4229_v20 = vsel %vm543_vm6, %v10643_v22, 0.0 }
0x1af1   :  { %9255 = vrsqrt.f32 %v3695_v27  ;;  %v9023_v62 = vunpack.i.h.bf16 %v9021_v5  ;;  %v9022_v33 = vunpack.i.l.bf16 %v9021_v5  ;;  %4230 = vadd.xlane.f32.xlu0 %v4229_v20 }
0x1af3   :  { %v10647_v54 = vpop.eup %9249  ;;  %v8825_v29 = vpack.c.bf16 %v9023_v62, %v9022_v33 }
0x1af4   :  { %v4232_v39 = vsel %vm543_vm6, %v10647_v54, 0.0 }
0x1af5   :  { %4233 = vadd.xlane.f32.xlu1 %v4232_v39  ;;  %8826 = vmatpush3.bf16.msra.mxu1 %v8825_v29 }
0x1af6   :  { %8335 = vmatprep.subr.mxu1 %v9409_v10 }
0x1af7   :  { %v9252_v45 = vpop.eup %9251 }
0x1af8   :  { %v10652_v32 = vpop.eup %9253  ;;  %v3706_v49 = vmul.f32 %v9252_v45, %v10611_v28 }
0x1af9   :  { %v4235_v2 = vsel %vm543_vm6, %v10652_v32, 0.0  ;;  %8336 = vmatpush3.msra.mxu1 %v4008_v43 }
0x1afa   :  { %4236 = vadd.xlane.f32.xlu1 %v4235_v2  ;;  %v3718_v8 = vmul.f32 %v10488_v59, %v3706_v49  ;;  %8831 = vmatprep.subr.bf16.mxu1 %v9406_v0 }
0x1afb   :  { %v9256_v41 = vpop.eup %9255 }
0x1afc   :  { %v3730_v50 = vadd.f32 %v10499_v30, %v3718_v8  ;;  %v3707_v13 = vmul.f32 %v9256_v41, %v10616_v61 }
0x1afe   :  { %8313 = vmatprep.mubr.msk.f32.mxu1 %vm203_vm1, %v3730_v50  ;;  %v3719_v53 = vmul.f32 %v10488_v59, %v3707_v13 }
0x1b00   :  { %v3731_v28 = vadd.f32 %v10499_v30, %v3719_v53 }
0x1b02   :  { %8314 = vmatmul.mubr.msk.f32.gmra.mrb[88].mxu1 %vm203_vm1, %v3731_v28 }
0x1b03   :  { %8337 = vmatprep.mubr.msk.f32.mxu1 %vm9408_vm2, %v9409_v10 }
0x1b07   :  { %4248 = vrot.lane.b32.xlu0 %v10551_v23, %s9414_s1 }
0x1b0b   :  { %9025 = vrot.lane.b32.xlu1 %v10532_v48, %s9414_s1  ;;  %4530 = vrot.lane.b32.xlu0 %v10551_v23, %s9415_s22 }
0x1b0f   :  { %9030 = vrot.lane.b32.xlu1 %v10532_v48, %s9415_s22  ;;  %4522 = vrot.lane.b32.xlu0 %v10525_v24, %s11434_s27 }
0x1b13   :  { %4520 = vrot.lane.b32.xlu1 %v10528_v42, %s11434_s27 }
0x1b17   :  { %4524 = vrot.lane.b32.xlu1 %v10551_v23, %s11434_s27 }
0x1b6e   :  { %v3990_v59 = vpop.xlane.xlu1 %3989 }
0x1b6f   :  { %9257 = vrcp.f32 %v3990_v59 }
0x1b72   :  { %v3993_v30 = vpop.xlane.xlu0 %3992 }
0x1b73   :  { %9259 = vrcp.f32 %v3993_v30 }
0x1b76   :  { %v3996_v61 = vpop.xlane.xlu1 %3995 }
0x1b77   :  { %9261 = vrcp.f32 %v3996_v61 }
0x1b79   :  { %v9258_v38 = vpop.eup %9257 }
0x1b7a   :  { %v3998_v19 = vmul.f32 %v9258_v38, %v10631_v7 }
0x1b7c   :  { %8338 = vmatmul.mubr.msk.f32.vlgmr.msra.gmra.mrb[90].mxu1 %vm543_vm6, %v3998_v19 }
0x1b7d   :  { %v9260_v31 = vpop.eup %9259  ;;  %8340 = vmatprep.mubr.msk.f32.mxu1 %vm9408_vm2, %v9409_v10 }
0x1b7e   :  { %v4000_v14 = vmul.f32 %v9260_v31, %v10635_v34  ;;  %v4231_v3 = vpop.xlane.xlu0 %4230 }
0x1b7f   :  { %9263 = vrcp.f32 %v4231_v3 }
0x1b80   :  { %8341 = vmatmul.mubr.msk.f32.gmra.mrb[92].mxu1 %vm543_vm6, %v4000_v14 }
0x1b81   :  { %v9262_v46 = vpop.eup %9261  ;;  %8343 = vmatprep.mubr.msk.f32.mxu1 %vm9408_vm2, %v9409_v10 }
0x1b82   :  { %v4234_v16 = vpop.xlane.xlu1 %4233  ;;  %v4002_v17 = vmul.f32 %v9262_v46, %v10639_v11  ;;  %v4249_v9 = vpop.permute.xlu0 %4248 }
0x1b83   :  { %9265 = vrcp.f32 %v4234_v16 }
0x1b84   :  { %8344 = vmatmul.mubr.msk.f32.gmra.mrb[94].mxu1 %vm543_vm6, %v4002_v17 }
0x1b85   :  { %8367 = vmatprep.mubr.msk.f32.mxu1 %vm9408_vm2, %v9409_v10 }
0x1b86   :  { %v4531_v8 = vpop.permute.xlu0 %4530 }
0x1b87   :  { %v4237_v7 = vpop.xlane.xlu1 %4236 }
0x1b88   :  { %9267 = vrcp.f32 %v4237_v7 }
0x1b89   :  { %v9264_v36 = vpop.eup %9263 }
0x1b8a   :  { %v4239_v11 = vmul.f32 %v9264_v36, %v10643_v22  ;;  %v4523_v13 = vpop.permute.xlu0 %4522 }
0x1b8b   :  { %v9026_v12 = vpop.permute.xlu1 %9025 }
0x1b8c   :  { %v9028_v34 = vunpack.i.h.bf16 %v9026_v12  ;;  %v9027_v1 = vunpack.i.l.bf16 %v9026_v12 }
0x1b8d   :  { %v9266_v26 = vpop.eup %9265 }
0x1b8e   :  { %v8832_v18 = vpack.c.bf16 %v9028_v34, %v9027_v1  ;;  %v4241_v6 = vmul.f32 %v9266_v26, %v10647_v54 }
0x1b8f   :  { %v9031_v33 = vpop.permute.xlu1 %9030 }
0x1b90   :  { %8833 = vmatpush3.bf16.msra.mxu1 %v8832_v18  ;;  %v9033_v54 = vunpack.i.h.bf16 %v9031_v33  ;;  %v9032_v29 = vunpack.i.l.bf16 %v9031_v33 }
0x1b91   :  { %8365 = vmatprep.subr.mxu1 %v9409_v10 }
0x1b92   :  { %v9268_v25 = vpop.eup %9267  ;;  %v8835_v39 = vpack.c.bf16 %v9033_v54, %v9032_v29 }
0x1b93   :  { %v4243_v40 = vmul.f32 %v9268_v25, %v10652_v32  ;;  %v4521_v50 = vpop.permute.xlu1 %4520 }
0x1b94   :  { %8366 = vmatpush3.msra.mxu1 %v4249_v9 }
0x1b95   :  { %8368 = vmatmul.mubr.msk.f32.vlgmr.msra.gmra.mrb[96].mxu1 %vm543_vm6, %v4239_v11  ;;  %8387 = vmatprep.subr.mxu1 %v9409_v10 }
0x1b96   :  { %8370 = vmatprep.mubr.msk.f32.mxu1 %vm9408_vm2, %v9409_v10  ;;  %8388 = vmatpush3.msra.mxu1 %v10710_v47 }
0x1b97   :  { %8838 = vmatprep.subr.bf16.mxu1 %v9406_v0  ;;  %v4525_v53 = vpop.permute.xlu1 %4524 }
0x1b99   :  { %8371 = vmatmul.mubr.msk.f32.gmra.mrb[98].mxu1 %vm543_vm6, %v4241_v6 }
0x1b9a   :  { %8373 = vmatprep.mubr.msk.f32.mxu1 %vm9408_vm2, %v9409_v10 }
0x1b9d   :  { %8374 = vmatmul.mubr.msk.f32.gmra.mrb[100].mxu1 %vm543_vm6, %v4243_v40 }
0x1b9e   :  { %8389 = vmatprep.mubr.msk.f32.mxu1 %vm9408_vm2, %v9409_v10 }
0x1bd5   :  { %v10714_v51 = vpop.f32.mrb[88].mxu1 }
0x1bd6   :  { %v10716_v58 = vpop.f32.mrb[89].mxu1 }
0x1c4f   :  { %v4087_v44 = vpop.f32.mrb[90].mxu1 }
0x1c50   :  { %v8339_v22 = vpop.f32.mrb[91].mxu1  ;;  %8390 = vmatmul.mubr.msk.f32.vlgmr.msra.gmra.mrb[102].mxu1 %vm444_vm3, %v4087_v44 }
0x1c51   :  { %8392 = vmatprep.mubr.msk.f32.mxu1 %vm9408_vm2, %v9409_v10 }
0x1c53   :  { %v4092_v27 = vpop.f32.mrb[92].mxu1 }
0x1c54   :  { %v8342_v5 = vpop.f32.mrb[93].mxu1  ;;  %8393 = vmatmul.mubr.msk.f32.gmra.mrb[104].mxu1 %vm444_vm3, %v4092_v27 }
0x1c55   :  { %8395 = vmatprep.mubr.msk.f32.mxu1 %vm9408_vm2, %v9409_v10 }
0x1c57   :  { %v4097_v20 = vpop.f32.mrb[94].mxu1 }
0x1c58   :  { %v8345_v62 = vpop.f32.mrb[95].mxu1  ;;  %8396 = vmatmul.mubr.msk.f32.gmra.mrb[106].mxu1 %vm444_vm3, %v4097_v20 }
0x1c59   :  { %8419 = vmatprep.mubr.msk.f32.mxu1 %vm9408_vm2, %v9409_v10 }
0x1c68   :  { %v4328_v45 = vpop.f32.mrb[96].mxu1 }
0x1c69   :  { %v8369_v32 = vpop.f32.mrb[97].mxu1  ;;  %8379 = vmatmul.mubr.msk.f32.vlgmr.msra.gmra.mrb[96].mxu0 %vm444_vm3, %v4328_v45 }
0x1c6a   :  { %8837 = vmatpush3.bf16.xpose.msk.msra.mxu0 %vm9711_vm4, %v8835_v39  ;;  %8381 = vmatprep.mubr.msk.f32.mxu0 %vm9408_vm2, %v9409_v10 }
0x1c6b   :  { %8402 = vmatprep.subr.mxu0 %v9409_v10 }
0x1c6c   :  { %v4333_v43 = vpop.f32.mrb[98].mxu1 }
0x1c6d   :  { %v8372_v49 = vpop.f32.mrb[99].mxu1  ;;  %8382 = vmatmul.mubr.msk.f32.gmra.mrb[98].mxu0 %vm444_vm3, %v4333_v43 }
0x1c6e   :  { %8384 = vmatprep.mubr.msk.f32.mxu0 %vm9408_vm2, %v9409_v10 }
0x1c70   :  { %v4338_v2 = vpop.f32.mrb[100].mxu1 }
0x1c71   :  { %v8375_v41 = vpop.f32.mrb[101].mxu1  ;;  %8385 = vmatmul.mubr.msk.f32.gmra.mrb[100].mxu0 %vm444_vm3, %v4338_v2 }
0x1c72   :  { %8403 = vmatpush3.xpose.msk.msra.mxu0 %vm444_vm3, %v4531_v8  ;;  %8404 = vmatprep.mubr.msk.f32.mxu0 %vm9408_vm2, %v9409_v10 }
0x1c73   :  { %8428 = vmatprep.subr.mxu0 %v9409_v10 }
0x1c75   :  { %8405 = vmatmul.mubr.msk.f32.vlgmr.msra.gmra.mrb[102].mxu0 %vm444_vm3, %v4521_v50 }
0x1c76   :  { %8407 = vmatprep.mubr.msk.f32.mxu0 %vm9408_vm2, %v9409_v10 }
0x1c79   :  { %8408 = vmatmul.mubr.msk.f32.gmra.mrb[104].mxu0 %vm444_vm3, %v4523_v13 }
0x1c7a   :  { %8410 = vmatprep.mubr.msk.f32.mxu0 %vm9408_vm2, %v9409_v10 }
0x1c7d   :  { %8411 = vmatmul.mubr.msk.f32.gmra.mrb[106].mxu0 %vm444_vm3, %v4525_v53 }
0x1c7e   :  { %8430 = vmatprep.mubr.msk.f32.mxu0 %vm9408_vm2, %v9409_v10 }
0x1d23   :  { %v4506_v28 = vpop.f32.mrb[102].mxu1 }
0x1d24   :  { %v8391_v59 = vpop.f32.mrb[103].mxu1 }
0x1d27   :  { %v4511_v30 = vpop.f32.mrb[104].mxu1 }
0x1d28   :  { %v8394_v61 = vpop.f32.mrb[105].mxu1 }
0x1d2b   :  { %v4516_v38 = vpop.f32.mrb[106].mxu1 }
0x1d2c   :  { %v8397_v19 = vpop.f32.mrb[107].mxu1 }
0x1d3c   :  { %v4417_v31 = vpop.f32.mrb[96].mxu0 }
0x1d3d   :  { %v10757_v14 = vadd.f32 %v4506_v28, %v4417_v31  ;;  %v8380_v46 = vpop.f32.mrb[97].mxu0 }
0x1d40   :  { %v4422_v16 = vpop.f32.mrb[98].mxu0 }
0x1d41   :  { %v10759_v17 = vadd.f32 %v4511_v30, %v4422_v16  ;;  %v8383_v3 = vpop.f32.mrb[99].mxu0 }
0x1d44   :  { %v4427_v7 = vpop.f32.mrb[100].mxu0 }
0x1d45   :  { %v10761_v12 = vadd.f32 %v4516_v38, %v4427_v7  ;;  %v8386_v34 = vpop.f32.mrb[101].mxu0 }
0x1d48   :  { %v4610_v1 = vpop.f32.mrb[102].mxu0 }
0x1d49   :  { %v4624_v18 = vmul.f32 0.35355338, %v4610_v1  ;;  %v8406_v36 = vpop.f32.mrb[103].mxu0 }
0x1d4b   :  { %v4627_v11 = vadd.f32 %v4624_v18, %v9750_v35 }
0x1d4c   :  { %v4615_v9 = vpop.f32.mrb[104].mxu0 }
0x1d4d   :  { %v4625_v26 = vmul.f32 0.35355338, %v4615_v9  ;;  %v8409_v6 = vpop.f32.mrb[105].mxu0  ;;  %v4630_v25 = vsel %vm543_vm6, %v4627_v11, -inf }
0x1d4e   :  { %4631 = vmax.xlane.f32.xlu0 %v4630_v25 }
0x1d4f   :  { %v4628_v40 = vadd.f32 %v4625_v26, %v9750_v35 }
0x1d50   :  { %v4620_v44 = vpop.f32.mrb[106].mxu0 }
0x1d51   :  { %v4626_v22 = vmul.f32 0.35355338, %v4620_v44  ;;  %v8412_v27 = vpop.f32.mrb[107].mxu0  ;;  %v4633_v5 = vsel %vm543_vm6, %v4628_v40, -inf  ;;  %v10814_v44 = vld [vmem:[%s11397_s7 + $0x30] sm:$0xff] }
0x1d52   :  { %4634 = vmax.xlane.f32.xlu1 %v4633_v5  ;;  %8429 = vmatpush3.msra.mxu0 %v10814_v44 }
0x1d53   :  { %v4629_v20 = vadd.f32 %v4626_v22, %v9750_v35  ;;  %8845 = vmatprep.subr.bf16.mxu0 %v9406_v0 }
0x1d55   :  { %v4636_v62 = vsel %vm543_vm6, %v4629_v20, -inf }
0x1d56   :  { %4637 = vmax.xlane.f32.xlu0 %v4636_v62 }
0x1d63   :  { %4667 = vrot.lane.b32.xlu1 %v10551_v23, %s11435_s5 }
0x1d67   :  { %9040 = vrot.lane.b32.xlu1 %v10532_v48, %s11436_s2 }
0x1d6b   :  { %4863 = vrot.lane.b32.xlu1 %v10551_v23, %s11436_s2 }
0x1ddb   :  { %v4632_v33 = vpop.xlane.xlu0 %4631 }
0x1ddc   :  { %v4639_v54 = vsub.f32 %v4627_v11, %v4632_v33 }
0x1dde   :  { %v4642_v29 = vmul.f32 1.442695, %v4639_v54 }
0x1ddf   :  { %v4635_v39 = vpop.xlane.xlu1 %4634 }
0x1de0   :  { %9269 = vpow2.f32 %v4642_v29  ;;  %v4640_v45 = vsub.f32 %v4628_v40, %v4635_v39 }
0x1de2   :  { %v4644_v32 = vmul.f32 1.442695, %v4640_v45 }
0x1de3   :  { %v4638_v43 = vpop.xlane.xlu0 %4637  ;;  %v4668_v59 = vpop.permute.xlu1 %4667 }
0x1de4   :  { %9271 = vpow2.f32 %v4644_v32  ;;  %v4641_v49 = vsub.f32 %v4629_v20, %v4638_v43 }
0x1de6   :  { %v4646_v2 = vmul.f32 1.442695, %v4641_v49 }
0x1de7   :  { %v9041_v30 = vpop.permute.xlu1 %9040 }
0x1de8   :  { %9273 = vpow2.f32 %v4646_v2  ;;  %v9043_v1 = vunpack.i.h.bf16 %v9041_v30  ;;  %v9042_v18 = vunpack.i.l.bf16 %v9041_v30 }
0x1dea   :  { %v9270_v8 = vpop.eup %9269  ;;  %v8842_v9 = vpack.c.bf16 %v9043_v1, %v9042_v18 }
0x1deb   :  { %v4648_v41 = vsel %vm543_vm6, %v9270_v8, 0.0  ;;  %v4864_v38 = vpop.permute.xlu1 %4863 }
0x1dec   :  { %4649 = vadd.xlane.f32.xlu0 %v4648_v41 }
0x1dee   :  { %v9272_v50 = vpop.eup %9271 }
0x1def   :  { %v4651_v13 = vsel %vm543_vm6, %v9272_v50, 0.0 }
0x1df0   :  { %4652 = vadd.xlane.f32.xlu0 %v4651_v13 }
0x1df2   :  { %v9274_v53 = vpop.eup %9273 }
0x1df3   :  { %v4654_v28 = vsel %vm543_vm6, %v9274_v53, 0.0 }
0x1df4   :  { %4655 = vadd.xlane.f32.xlu1 %v4654_v28 }
0x1e05   :  { %4855 = vrot.lane.b32.xlu1 %v10525_v24, %s11437_s20 }
0x1e06   :  { %9035 = vrot.lane.b32.xlu0 %v10532_v48, %s11435_s5 }
0x1e0a   :  { %4853 = vrot.lane.b32.xlu0 %v10528_v42, %s11437_s20 }
0x1e0e   :  { %4857 = vrot.lane.b32.xlu0 %v10551_v23, %s11437_s20 }
0x1e79   :  { %v4650_v61 = vpop.xlane.xlu0 %4649 }
0x1e7a   :  { %9275 = vrcp.f32 %v4650_v61 }
0x1e7d   :  { %v4653_v19 = vpop.xlane.xlu0 %4652 }
0x1e7e   :  { %9277 = vrcp.f32 %v4653_v19 }
0x1e81   :  { %v4656_v31 = vpop.xlane.xlu1 %4655  ;;  %v9036_v46 = vpop.permute.xlu0 %9035 }
0x1e82   :  { %v9038_v16 = vunpack.i.h.bf16 %v9036_v46  ;;  %v9037_v24 = vunpack.i.l.bf16 %v9036_v46  ;;  %9279 = vrcp.f32 %v4656_v31 }
0x1e84   :  { %v8839_v3 = vpack.c.bf16 %v9038_v16, %v9037_v24  ;;  %v9276_v7 = vpop.eup %9275 }
0x1e85   :  { %v4658_v42 = vmul.f32 %v9276_v7, %v9270_v8  ;;  %v4854_v6 = vpop.permute.xlu0 %4853  ;;  %v4856_v25 = vpop.permute.xlu1 %4855 }
0x1e86   :  { %8840 = vmatpush3.bf16.msra.mxu1 %v8839_v3 }
0x1e87   :  { %8417 = vmatprep.subr.mxu1 %v9409_v10 }
0x1e88   :  { %v9278_v34 = vpop.eup %9277 }
0x1e89   :  { %v4660_v36 = vmul.f32 %v9278_v34, %v9272_v50  ;;  %v4858_v40 = vpop.permute.xlu0 %4857 }
0x1e8a   :  { %8418 = vmatpush3.msra.mxu1 %v4668_v59 }
0x1e8b   :  { %8420 = vmatmul.mubr.msk.f32.vlgmr.msra.gmra.mrb[108].mxu1 %vm543_vm6, %v4658_v42  ;;  %8841 = vmatprep.subr.bf16.mxu1 %v9406_v0 }
0x1e8c   :  { %8422 = vmatprep.mubr.msk.f32.mxu1 %vm9408_vm2, %v9409_v10  ;;  %v9280_v11 = vpop.eup %9279 }
0x1e8d   :  { %v4662_v26 = vmul.f32 %v9280_v11, %v9274_v53 }
0x1e8f   :  { %8423 = vmatmul.mubr.msk.f32.gmra.mrb[110].mxu1 %vm543_vm6, %v4660_v36 }
0x1e90   :  { %8425 = vmatprep.mubr.msk.f32.mxu1 %vm9408_vm2, %v9409_v10 }
0x1e91   :  { %8844 = vmatpush3.bf16.xpose.msk.msra.mxu1 %vm9711_vm4, %v8842_v9 }
0x1e92   :  { %8443 = vmatprep.subr.mxu1 %v9409_v10 }
0x1e93   :  { %8426 = vmatmul.mubr.msk.f32.gmra.mrb[112].mxu1 %vm543_vm6, %v4662_v26 }
0x1e94   :  { %8445 = vmatprep.mubr.msk.f32.mxu1 %vm9408_vm2, %v9409_v10 }
0x1e99   :  { %8444 = vmatpush3.xpose.msk.msra.mxu1 %vm444_vm3, %v4864_v38 }
0x1e9a   :  { %8469 = vmatprep.subr.mxu1 %v9409_v10 }
0x1e9c   :  { %8446 = vmatmul.mubr.msk.f32.vlgmr.msra.gmra.mrb[114].mxu1 %vm444_vm3, %v4854_v6  ;;  %v9381_v6 = vld [vmem:[%s11396_s6 + $0x1] ss:$0 sm:$0xff] }
0x1e9d   :  { %8448 = vmatprep.mubr.msk.f32.mxu1 %vm9408_vm2, %v9409_v10 }
0x1ea0   :  { %8449 = vmatmul.mubr.msk.f32.gmra.mrb[116].mxu1 %vm444_vm3, %v4856_v25  ;;  %v10843_v25 = vadd.f32 %v9381_v6, %v10716_v58 }
0x1ea1   :  { %8451 = vmatprep.mubr.msk.f32.mxu1 %vm9408_vm2, %v9409_v10 }
0x1ea4   :  { %8452 = vmatmul.mubr.msk.f32.gmra.mrb[118].mxu1 %vm444_vm3, %v4858_v40  ;;  %v10846_v40 = vadd.f32 %v9381_v6, %v10548_v37 }
0x1ea5   :  { %8471 = vmatprep.mubr.msk.f32.mxu1 %vm9408_vm2, %v9409_v10 }
0x1f5e   :  { %v4747_v22 = vpop.f32.mrb[108].mxu1 }
0x1f5f   :  { %v8421_v27 = vpop.f32.mrb[109].mxu1  ;;  %8431 = vmatmul.mubr.msk.f32.vlgmr.msra.gmra.mrb[108].mxu0 %vm444_vm3, %v4747_v22  ;;  %v10850_v22 = vpack.i.bf16 %v10843_v25, %v10846_v40 }
0x1f60   :  { %8433 = vmatprep.mubr.msk.f32.mxu0 %vm9408_vm2, %v9409_v10  ;;  %v10855_v27 = vadd.f32 %v9381_v6, %v10714_v51 }
0x1f62   :  { %v4752_v5 = vpop.f32.mrb[110].mxu1 }
0x1f63   :  { %v8424_v20 = vpop.f32.mrb[111].mxu1  ;;  %8434 = vmatmul.mubr.msk.f32.gmra.mrb[110].mxu0 %vm444_vm3, %v4752_v5 }
0x1f64   :  { %8436 = vmatprep.mubr.msk.f32.mxu0 %vm9408_vm2, %v9409_v10 }
0x1f66   :  { %v4757_v62 = vpop.f32.mrb[112].mxu1 }
0x1f67   :  { %v8427_v33 = vpop.f32.mrb[113].mxu1  ;;  %8437 = vmatmul.mubr.msk.f32.gmra.mrb[112].mxu0 %vm444_vm3, %v4757_v62 }
0x1f68   :  { %8460 = vmatprep.mubr.msk.f32.mxu0 %vm9408_vm2, %v9409_v10 }
0x1f6f   :  { %v4943_v54 = vpop.f32.mrb[114].mxu1 }
0x1f70   :  { %v4957_v29 = vmul.f32 0.35355338, %v4943_v54  ;;  %v8447_v39 = vpop.f32.mrb[115].mxu1 }
0x1f72   :  { %v4960_v45 = vadd.f32 %v4957_v29, %v9750_v35 }
0x1f73   :  { %v4948_v32 = vpop.f32.mrb[116].mxu1 }
0x1f74   :  { %v4958_v43 = vmul.f32 0.35355338, %v4948_v32  ;;  %v8450_v49 = vpop.f32.mrb[117].mxu1  ;;  %v4963_v2 = vsel %vm543_vm6, %v4960_v45, -inf }
0x1f75   :  { %4964 = vmax.xlane.f32.xlu1 %v4963_v2 }
0x1f76   :  { %v4961_v8 = vadd.f32 %v4958_v43, %v9750_v35 }
0x1f77   :  { %v4953_v41 = vpop.f32.mrb[118].mxu1 }
0x1f78   :  { %v4959_v50 = vmul.f32 0.35355338, %v4953_v41  ;;  %v8453_v13 = vpop.f32.mrb[119].mxu1  ;;  %v4966_v53 = vsel %vm543_vm6, %v4961_v8, -inf }
0x1f79   :  { %4967 = vmax.xlane.f32.xlu0 %v4966_v53 }
0x1f7a   :  { %v4962_v28 = vadd.f32 %v4959_v50, %v9750_v35 }
0x1f7c   :  { %v4969_v59 = vsel %vm543_vm6, %v4962_v28, -inf }
0x1f7d   :  { %4970 = vmax.xlane.f32.xlu0 %v4969_v59 }
0x1f86   :  { %9045 = vrot.lane.b32.xlu1 %v10532_v48, %s11438_s25 }
0x2002   :  { %v4965_v30 = vpop.xlane.xlu1 %4964 }
0x2003   :  { %v4972_v61 = vsub.f32 %v4960_v45, %v4965_v30 }
0x2005   :  { %v4975_v38 = vmul.f32 1.442695, %v4972_v61 }
0x2006   :  { %v9046_v19 = vpop.permute.xlu1 %9045  ;;  %v4968_v31 = vpop.xlane.xlu0 %4967 }
0x2007   :  { %9281 = vpow2.f32 %v4975_v38  ;;  %v9048_v46 = vunpack.i.h.bf16 %v9046_v19  ;;  %v9047_v16 = vunpack.i.l.bf16 %v9046_v19  ;;  %v4973_v24 = vsub.f32 %v4961_v8, %v4968_v31 }
0x2009   :  { %v8846_v3 = vpack.c.bf16 %v9048_v46, %v9047_v16  ;;  %v4977_v7 = vmul.f32 1.442695, %v4973_v24  ;;  %v10926_v16 = vld [vmem:[%s11397_s7 + $0x38] sm:$0xff] }
0x200a   :  { %v4971_v42 = vpop.xlane.xlu0 %4970  ;;  %8470 = vmatpush3.msra.mxu1 %v10926_v16 }
0x200b   :  { %9283 = vpow2.f32 %v4977_v7  ;;  %v4974_v34 = vsub.f32 %v4962_v28, %v4971_v42  ;;  %8847 = vmatpush3.bf16.msra.mxu0 %v8846_v3  ;;  %8852 = vmatprep.subr.bf16.mxu1 %v9406_v0 }
0x200c   :  { %8458 = vmatprep.subr.mxu0 %v9409_v10 }
0x200d   :  { %v4979_v1 = vmul.f32 1.442695, %v4974_v34 }
0x200f   :  { %9285 = vpow2.f32 %v4979_v1 }
0x2011   :  { %v9282_v48 = vpop.eup %9281 }
0x2012   :  { %v4981_v18 = vsel %vm543_vm6, %v9282_v48, 0.0 }
0x2013   :  { %4982 = vadd.xlane.f32.xlu0 %v4981_v18 }
0x2015   :  { %v9284_v36 = vpop.eup %9283 }
0x2016   :  { %v4984_v11 = vsel %vm543_vm6, %v9284_v36, 0.0 }
0x2017   :  { %4985 = vadd.xlane.f32.xlu1 %v4984_v11 }
0x2019   :  { %v9286_v9 = vpop.eup %9285 }
0x201a   :  { %v4987_v26 = vsel %vm543_vm6, %v9286_v9, 0.0 }
0x201b   :  { %4988 = vadd.xlane.f32.xlu0 %v4987_v26 }
0x2028   :  { %9050 = vrot.lane.b32.xlu1 %v10850_v22, %s9407_s28 }
0x202c   :  { %5193 = vrot.lane.b32.xlu1 %v10855_v27, %s9407_s28 }
0x2030   :  { %9055 = vrot.lane.b32.xlu1 %v10850_v22, %s9411_s30 }
0x2031   :  { %5000 = vrot.lane.b32.xlu0 %v10551_v23, %s11438_s25 }
0x2032   :  { %v4836_v37 = vpop.f32.mrb[108].mxu0 }
0x2033   :  { %v10864_v58 = vadd.f32 %v4836_v37, %v10757_v14  ;;  %v8432_v5 = vpop.f32.mrb[109].mxu0 }
0x2034   :  { %5424 = vrot.lane.b32.xlu1 %v10846_v40, %s9410_s29 }
0x2035   :  { %5434 = vrot.lane.b32.xlu0 %v10855_v27, %s9411_s30 }
0x2036   :  { %v4841_v51 = vpop.f32.mrb[110].mxu0 }
0x2037   :  { %v10871_v20 = vadd.f32 %v4841_v51, %v10759_v17  ;;  %v8435_v62 = vpop.f32.mrb[111].mxu0 }
0x2038   :  { %5428 = vrot.lane.b32.xlu1 %v10855_v27, %s9410_s29 }
0x2039   :  { %5426 = vrot.lane.b32.xlu0 %v10843_v25, %s9410_s29 }
0x203a   :  { %v4846_v23 = vpop.f32.mrb[112].mxu0 }
0x203b   :  { %v10878_v14 = vadd.f32 %v4846_v23, %v10761_v12  ;;  %v8438_v33 = vpop.f32.mrb[113].mxu0 }
0x20a0   :  { %v4983_v54 = vpop.xlane.xlu0 %4982 }
0x20a1   :  { %9287 = vrcp.f32 %v4983_v54 }
0x20a4   :  { %v4986_v29 = vpop.xlane.xlu1 %4985 }
0x20a5   :  { %9289 = vrcp.f32 %v4986_v29 }
0x20a8   :  { %v4989_v39 = vpop.xlane.xlu0 %4988  ;;  %v9051_v45 = vpop.permute.xlu1 %9050 }
0x20a9   :  { %9291 = vrcp.f32 %v4989_v39  ;;  %v9053_v49 = vunpack.i.h.bf16 %v9051_v45  ;;  %v9052_v2 = vunpack.i.l.bf16 %v9051_v45 }
0x20ab   :  { %v9288_v17 = vpop.eup %9287  ;;  %v8849_v50 = vpack.c.bf16 %v9053_v49, %v9052_v2 }
0x20ac   :  { %v4991_v32 = vmul.f32 %v9288_v17, %v9282_v48  ;;  %v5001_v43 = vpop.permute.xlu0 %5000  ;;  %v5194_v41 = vpop.permute.xlu1 %5193 }
0x20ad   :  { %8459 = vmatpush3.msra.mxu0 %v5001_v43 }
0x20ae   :  { %8461 = vmatmul.mubr.msk.f32.vlgmr.msra.gmra.mrb[114].mxu0 %vm543_vm6, %v4991_v32  ;;  %8848 = vmatprep.subr.bf16.mxu0 %v9406_v0 }
0x20af   :  { %v9290_v12 = vpop.eup %9289  ;;  %8463 = vmatprep.mubr.msk.f32.mxu0 %vm9408_vm2, %v9409_v10 }
0x20b0   :  { %v4993_v8 = vmul.f32 %v9290_v12, %v9284_v36  ;;  %v9056_v28 = vpop.permute.xlu1 %9055  ;;  %v5435_v38 = vpop.permute.xlu0 %5434 }
0x20b1   :  { %v9058_v59 = vunpack.i.h.bf16 %v9056_v28  ;;  %v9057_v30 = vunpack.i.l.bf16 %v9056_v28 }
0x20b2   :  { %8464 = vmatmul.mubr.msk.f32.gmra.mrb[116].mxu0 %vm543_vm6, %v4993_v8 }
0x20b3   :  { %v9292_v13 = vpop.eup %9291  ;;  %8466 = vmatprep.mubr.msk.f32.mxu0 %vm9408_vm2, %v9409_v10  ;;  %v8856_v61 = vpack.c.bf16 %v9058_v59, %v9057_v30 }
0x20b4   :  { %8851 = vmatpush3.bf16.xpose.msk.msra.mxu0 %vm9711_vm4, %v8849_v50  ;;  %v4995_v53 = vmul.f32 %v9292_v13, %v9286_v9  ;;  %v5425_v19 = vpop.permute.xlu1 %5424  ;;  %v5427_v31 = vpop.permute.xlu0 %5426 }
0x20b5   :  { %8484 = vmatprep.subr.mxu0 %v9409_v10 }
0x20b6   :  { %8467 = vmatmul.mubr.msk.f32.gmra.mrb[118].mxu0 %vm543_vm6, %v4995_v53 }
0x20b7   :  { %8486 = vmatprep.mubr.msk.f32.mxu0 %vm9408_vm2, %v9409_v10 }
0x20b8   :  { %v5429_v46 = vpop.permute.xlu1 %5428 }
0x20bc   :  { %8485 = vmatpush3.xpose.msk.msra.mxu0 %vm444_vm3, %v5194_v41 }
0x20bd   :  { %8855 = vmatprep.subr.bf16.mxu0 %v9406_v0 }
0x20bf   :  { %8487 = vmatmul.mubr.msk.f32.vlgmr.msra.gmra.mrb[120].mxu0 %vm444_vm3, %v10846_v40 }
0x20c0   :  { %8858 = vmatpush3.bf16.xpose.msk.msra.mxu0 %vm9711_vm4, %v8856_v61  ;;  %8489 = vmatprep.mubr.msk.f32.mxu0 %vm9408_vm2, %v9409_v10 }
0x20c1   :  { %8514 = vmatprep.subr.mxu0 %v9409_v10 }
0x20c3   :  { %8490 = vmatmul.mubr.msk.f32.gmra.mrb[122].mxu0 %vm444_vm3, %v10843_v25 }
0x20c4   :  { %8492 = vmatprep.mubr.msk.f32.mxu0 %vm9408_vm2, %v9409_v10 }
0x20c7   :  { %8493 = vmatmul.mubr.msk.f32.gmra.mrb[124].mxu0 %vm444_vm3, %v10855_v27 }
0x20c8   :  { %8515 = vmatpush3.xpose.msk.msra.mxu0 %vm444_vm3, %v5435_v38  ;;  %8516 = vmatprep.mubr.msk.f32.mxu0 %vm9408_vm2, %v9409_v10 }
0x20c9   :  { %8540 = vmatprep.subr.mxu0 %v9409_v10 }
0x20cb   :  { %8517 = vmatmul.mubr.msk.f32.vlgmr.msra.gmra.mrb[126].mxu0 %vm444_vm3, %v5425_v19 }
0x20cc   :  { %8519 = vmatprep.mubr.msk.f32.mxu0 %vm9408_vm2, %v9409_v10  ;;  %8541 = vmatpush3.msra.mxu0 %v10721_v21 }
0x20cd   :  { %8862 = vmatprep.subr.bf16.mxu0 %v9406_v0 }
0x20cf   :  { %8520 = vmatmul.mubr.msk.f32.gmra.mrb[128].mxu0 %vm444_vm3, %v5427_v31 }
0x20d0   :  { %8522 = vmatprep.mubr.msk.f32.mxu0 %vm9408_vm2, %v9409_v10 }
0x20d3   :  { %8523 = vmatmul.mubr.msk.f32.gmra.mrb[130].mxu0 %vm444_vm3, %v5429_v46 }
0x20d4   :  { %8542 = vmatprep.mubr.msk.f32.mxu0 %vm9408_vm2, %v9409_v10 }
0x2181   :  { %v5080_v21 = vpop.f32.mrb[114].mxu0 }
0x2182   :  { %v8462_v24 = vpop.f32.mrb[115].mxu0  ;;  %8472 = vmatmul.mubr.msk.f32.vlgmr.msra.gmra.mrb[120].mxu1 %vm444_vm3, %v5080_v21 }
0x2183   :  { %8474 = vmatprep.mubr.msk.f32.mxu1 %vm9408_vm2, %v9409_v10 }
0x2185   :  { %v5085_v3 = vpop.f32.mrb[116].mxu0 }
0x2186   :  { %v8465_v7 = vpop.f32.mrb[117].mxu0  ;;  %8475 = vmatmul.mubr.msk.f32.gmra.mrb[122].mxu1 %vm444_vm3, %v5085_v3 }
0x2187   :  { %8477 = vmatprep.mubr.msk.f32.mxu1 %vm9408_vm2, %v9409_v10 }
0x2189   :  { %v5090_v42 = vpop.f32.mrb[118].mxu0 }
0x218a   :  { %v8468_v34 = vpop.f32.mrb[119].mxu0  ;;  %8478 = vmatmul.mubr.msk.f32.gmra.mrb[124].mxu1 %vm444_vm3, %v5090_v42 }
0x218b   :  { %8501 = vmatprep.mubr.msk.f32.mxu1 %vm9408_vm2, %v9409_v10 }
0x2192   :  { %v5273_v1 = vpop.f32.mrb[120].mxu0 }
0x2193   :  { %v5287_v48 = vmul.f32 0.35355338, %v5273_v1  ;;  %v8488_v18 = vpop.f32.mrb[121].mxu0 }
0x2195   :  { %v5290_v36 = vadd.f32 %v5287_v48, %v9750_v35 }
0x2196   :  { %v5278_v11 = vpop.f32.mrb[122].mxu0 }
0x2197   :  { %v5288_v9 = vmul.f32 0.35355338, %v5278_v11  ;;  %v8491_v26 = vpop.f32.mrb[123].mxu0  ;;  %v5293_v6 = vsel %vm543_vm6, %v5290_v36, -inf }
0x2198   :  { %5294 = vmax.xlane.f32.xlu0 %v5293_v6 }
0x2199   :  { %v5291_v37 = vadd.f32 %v5288_v9, %v9750_v35 }
0x219a   :  { %v5283_v5 = vpop.f32.mrb[124].mxu0 }
0x219b   :  { %v5289_v51 = vmul.f32 0.35355338, %v5283_v5  ;;  %v8494_v62 = vpop.f32.mrb[125].mxu0  ;;  %v5296_v23 = vsel %vm543_vm6, %v5291_v37, -inf }
0x219c   :  { %5297 = vmax.xlane.f32.xlu1 %v5296_v23 }
0x219d   :  { %v5292_v33 = vadd.f32 %v5289_v51, %v9750_v35 }
0x219e   :  { %v5514_v54 = vpop.f32.mrb[126].mxu0 }
0x219f   :  { %v5528_v29 = vmul.f32 0.35355338, %v5514_v54  ;;  %v8518_v39 = vpop.f32.mrb[127].mxu0  ;;  %v5299_v17 = vsel %vm543_vm6, %v5292_v33, -inf }
0x21a0   :  { %5300 = vmax.xlane.f32.xlu0 %v5299_v17 }
0x21a1   :  { %v5531_v45 = vadd.f32 %v5528_v29, %v9750_v35 }
0x21a2   :  { %v5519_v32 = vpop.f32.mrb[128].mxu0 }
0x21a3   :  { %v5529_v43 = vmul.f32 0.35355338, %v5519_v32  ;;  %v8521_v49 = vpop.f32.mrb[129].mxu0  ;;  %v5534_v2 = vsel %vm543_vm6, %v5531_v45, -inf }
0x21a4   :  { %5535 = vmax.xlane.f32.xlu0 %v5534_v2 }
0x21a5   :  { %v5532_v12 = vadd.f32 %v5529_v43, %v9750_v35 }
0x21a6   :  { %v5524_v8 = vpop.f32.mrb[130].mxu0 }
0x21a7   :  { %v5530_v41 = vmul.f32 0.35355338, %v5524_v8  ;;  %v8524_v50 = vpop.f32.mrb[131].mxu0  ;;  %v5537_v13 = vsel %vm543_vm6, %v5532_v12, -inf }
0x21a8   :  { %5538 = vmax.xlane.f32.xlu0 %v5537_v13 }
0x21a9   :  { %v5533_v53 = vadd.f32 %v5530_v41, %v9750_v35 }
0x21ab   :  { %v5540_v28 = vsel %vm543_vm6, %v5533_v53, -inf }
0x21ac   :  { %5541 = vmax.xlane.f32.xlu1 %v5540_v28 }
0x21bd   :  { %9060 = vrot.lane.b32.xlu1 %v10850_v22, %s9413_s21 }
0x2225   :  { %v5295_v59 = vpop.xlane.xlu0 %5294 }
0x2226   :  { %v5302_v30 = vsub.f32 %v5290_v36, %v5295_v59 }
0x2228   :  { %v5305_v61 = vmul.f32 1.442695, %v5302_v30 }
0x2229   :  { %v5298_v38 = vpop.xlane.xlu1 %5297 }
0x222a   :  { %9293 = vpow2.f32 %v5305_v61  ;;  %v5303_v19 = vsub.f32 %v5291_v37, %v5298_v38 }
0x222c   :  { %v5307_v31 = vmul.f32 1.442695, %v5303_v19 }
0x222d   :  { %v5301_v46 = vpop.xlane.xlu0 %5300 }
0x222e   :  { %9295 = vpow2.f32 %v5307_v31  ;;  %v5304_v21 = vsub.f32 %v5292_v33, %v5301_v46 }
0x2230   :  { %v5309_v24 = vmul.f32 1.442695, %v5304_v21 }
0x2231   :  { %v5536_v3 = vpop.xlane.xlu0 %5535 }
0x2232   :  { %9297 = vpow2.f32 %v5309_v24  ;;  %v5543_v7 = vsub.f32 %v5531_v45, %v5536_v3 }
0x2234   :  { %v10953_v42 = vpop.eup %9293  ;;  %v5546_v34 = vmul.f32 1.442695, %v5543_v7 }
0x2235   :  { %v5539_v1 = vpop.xlane.xlu0 %5538  ;;  %v5311_v48 = vsel %vm543_vm6, %v10953_v42, 0.0 }
0x2236   :  { %9299 = vpow2.f32 %v5546_v34  ;;  %v5544_v18 = vsub.f32 %v5532_v12, %v5539_v1  ;;  %5312 = vadd.xlane.f32.xlu0 %v5311_v48 }
0x2238   :  { %v10957_v36 = vpop.eup %9295  ;;  %v5548_v11 = vmul.f32 1.442695, %v5544_v18 }
0x2239   :  { %v5542_v9 = vpop.xlane.xlu1 %5541  ;;  %v5314_v26 = vsel %vm543_vm6, %v10957_v36, 0.0 }
0x223a   :  { %9301 = vpow2.f32 %v5548_v11  ;;  %v5545_v6 = vsub.f32 %v5533_v53, %v5542_v9  ;;  %5315 = vadd.xlane.f32.xlu1 %v5314_v26 }
0x223c   :  { %v10961_v37 = vpop.eup %9297  ;;  %v5550_v5 = vmul.f32 1.442695, %v5545_v6 }
0x223d   :  { %v9061_v51 = vpop.permute.xlu1 %9060  ;;  %v5317_v62 = vsel %vm543_vm6, %v10961_v37, 0.0 }
0x223e   :  { %9303 = vpow2.f32 %v5550_v5  ;;  %v9063_v23 = vunpack.i.h.bf16 %v9061_v51  ;;  %v9062_v33 = vunpack.i.l.bf16 %v9061_v51  ;;  %5318 = vadd.xlane.f32.xlu0 %v5317_v62 }
0x2240   :  { %v10965_v54 = vpop.eup %9299  ;;  %v8853_v29 = vpack.c.bf16 %v9063_v23, %v9062_v33 }
0x2241   :  { %v5552_v39 = vsel %vm543_vm6, %v10965_v54, 0.0 }
0x2242   :  { %5553 = vadd.xlane.f32.xlu1 %v5552_v39  ;;  %8854 = vmatpush3.bf16.msra.mxu1 %v8853_v29 }
0x2243   :  { %8499 = vmatprep.subr.mxu1 %v9409_v10 }
0x2244   :  { %v10970_v17 = vpop.eup %9301 }
0x2245   :  { %v5555_v45 = vsel %vm543_vm6, %v10970_v17, 0.0 }
0x2246   :  { %5556 = vadd.xlane.f32.xlu0 %v5555_v45 }
0x2248   :  { %v10974_v32 = vpop.eup %9303 }
0x2249   :  { %v5558_v43 = vsel %vm543_vm6, %v10974_v32, 0.0 }
0x224a   :  { %5559 = vadd.xlane.f32.xlu0 %v5558_v43 }
0x2253   :  { %9065 = vrot.lane.b32.xlu1 %v10850_v22, %s9414_s1 }
0x2255   :  { %v5169_v49 = vpop.f32.mrb[120].mxu1 }
0x2256   :  { %v10981_v2 = vadd.f32 %v5169_v49, %v10864_v58  ;;  %v8473_v12 = vpop.f32.mrb[121].mxu1 }
0x2257   :  { %5571 = vrot.lane.b32.xlu1 %v10855_v27, %s9414_s1 }
0x2259   :  { %v5174_v8 = vpop.f32.mrb[122].mxu1 }
0x225a   :  { %v10986_v41 = vadd.f32 %v5174_v8, %v10871_v20  ;;  %v8476_v50 = vpop.f32.mrb[123].mxu1 }
0x225b   :  { %9070 = vrot.lane.b32.xlu1 %v10850_v22, %s9415_s22 }
0x225d   :  { %v5179_v13 = vpop.f32.mrb[124].mxu1 }
0x225e   :  { %v10991_v53 = vadd.f32 %v5179_v13, %v10878_v14  ;;  %v8479_v28 = vpop.f32.mrb[125].mxu1 }
0x225f   :  { %5853 = vrot.lane.b32.xlu1 %v10855_v27, %s9415_s22 }
0x2260   :  { %5330 = vrot.lane.b32.xlu0 %v10855_v27, %s9413_s21 }
0x2263   :  { %5845 = vrot.lane.b32.xlu1 %v10843_v25, %s11434_s27 }
0x2264   :  { %5843 = vrot.lane.b32.xlu0 %v10846_v40, %s11434_s27 }
0x2268   :  { %5847 = vrot.lane.b32.xlu0 %v10855_v27, %s11434_s27 }
0x22c3   :  { %v5313_v58 = vpop.xlane.xlu0 %5312 }
0x22c4   :  { %9305 = vrcp.f32 %v5313_v58 }
0x22c7   :  { %v5316_v20 = vpop.xlane.xlu1 %5315 }
0x22c8   :  { %9307 = vrcp.f32 %v5316_v20 }
0x22cb   :  { %v5319_v14 = vpop.xlane.xlu0 %5318 }
0x22cc   :  { %9309 = vrcp.f32 %v5319_v14 }
0x22ce   :  { %v9306_v19 = vpop.eup %9305 }
0x22cf   :  { %v5554_v59 = vpop.xlane.xlu1 %5553  ;;  %v5321_v21 = vmul.f32 %v9306_v19, %v10953_v42 }
0x22d0   :  { %9311 = vrcp.f32 %v5554_v59 }
0x22d2   :  { %v9308_v3 = vpop.eup %9307 }
0x22d3   :  { %v5557_v30 = vpop.xlane.xlu0 %5556  ;;  %v9066_v61 = vpop.permute.xlu1 %9065  ;;  %v5323_v34 = vmul.f32 %v9308_v3, %v10957_v36 }
0x22d4   :  { %v9068_v31 = vunpack.i.h.bf16 %v9066_v61  ;;  %v9067_v46 = vunpack.i.l.bf16 %v9066_v61  ;;  %9313 = vrcp.f32 %v5557_v30 }
0x22d6   :  { %v8860_v7 = vpack.c.bf16 %v9068_v31, %v9067_v46  ;;  %v9310_v1 = vpop.eup %9309 }
0x22d7   :  { %v5560_v38 = vpop.xlane.xlu0 %5559  ;;  %v5572_v48 = vpop.permute.xlu1 %5571  ;;  %v5325_v42 = vmul.f32 %v9310_v1, %v10961_v37 }
0x22d8   :  { %9315 = vrcp.f32 %v5560_v38 }
0x22da   :  { %v9312_v18 = vpop.eup %9311 }
0x22db   :  { %v5331_v24 = vpop.permute.xlu0 %5330  ;;  %v5562_v36 = vmul.f32 %v9312_v18, %v10965_v54  ;;  %v9071_v51 = vpop.permute.xlu1 %9070 }
0x22dc   :  { %8500 = vmatpush3.msra.mxu1 %v5331_v24  ;;  %v9073_v23 = vunpack.i.h.bf16 %v9071_v51  ;;  %v9072_v33 = vunpack.i.l.bf16 %v9071_v51 }
0x22dd   :  { %8502 = vmatmul.mubr.msk.f32.vlgmr.msra.gmra.mrb[126].mxu1 %vm543_vm6, %v5321_v21  ;;  %8859 = vmatprep.subr.bf16.mxu1 %v9406_v0 }
0x22de   :  { %8861 = vmatpush3.bf16.msra.mxu1 %v8860_v7  ;;  %8504 = vmatprep.mubr.msk.f32.mxu1 %vm9408_vm2, %v9409_v10  ;;  %v9314_v11 = vpop.eup %9313  ;;  %v8863_v39 = vpack.c.bf16 %v9073_v23, %v9072_v33 }
0x22df   :  { %8529 = vmatprep.subr.mxu1 %v9409_v10  ;;  %v5564_v9 = vmul.f32 %v9314_v11, %v10970_v17  ;;  %v5854_v12 = vpop.permute.xlu1 %5853  ;;  %v5844_v50 = vpop.permute.xlu0 %5843 }
0x22e1   :  { %8505 = vmatmul.mubr.msk.f32.gmra.mrb[128].mxu1 %vm543_vm6, %v5323_v34 }
0x22e2   :  { %8530 = vmatpush3.msra.mxu1 %v5572_v48  ;;  %8507 = vmatprep.mubr.msk.f32.mxu1 %vm9408_vm2, %v9409_v10  ;;  %v9316_v26 = vpop.eup %9315 }
0x22e3   :  { %8551 = vmatprep.subr.mxu1 %v9409_v10  ;;  %v5566_v6 = vmul.f32 %v9316_v26, %v10974_v32  ;;  %v5846_v13 = vpop.permute.xlu1 %5845  ;;  %v5848_v28 = vpop.permute.xlu0 %5847 }
0x22e5   :  { %8508 = vmatmul.mubr.msk.f32.gmra.mrb[130].mxu1 %vm543_vm6, %v5325_v42 }
0x22e6   :  { %8531 = vmatprep.mubr.msk.f32.mxu1 %vm9408_vm2, %v9409_v10 }
0x22e9   :  { %8532 = vmatmul.mubr.msk.f32.vlgmr.msra.gmra.mrb[132].mxu1 %vm543_vm6, %v5562_v36 }
0x22ea   :  { %8534 = vmatprep.mubr.msk.f32.mxu1 %vm9408_vm2, %v9409_v10  ;;  %8552 = vmatpush3.msra.mxu1 %v10710_v47 }
0x22eb   :  { %8866 = vmatprep.subr.bf16.mxu1 %v9406_v0 }
0x22ed   :  { %8535 = vmatmul.mubr.msk.f32.gmra.mrb[134].mxu1 %vm543_vm6, %v5564_v9 }
0x22ee   :  { %8537 = vmatprep.mubr.msk.f32.mxu1 %vm9408_vm2, %v9409_v10 }
0x22f1   :  { %8538 = vmatmul.mubr.msk.f32.gmra.mrb[136].mxu1 %vm543_vm6, %v5566_v6 }
0x22f2   :  { %8553 = vmatprep.mubr.msk.f32.mxu1 %vm9408_vm2, %v9409_v10 }
0x23b0   :  { %v5410_v37 = vpop.f32.mrb[126].mxu1 }
0x23b1   :  { %v8503_v5 = vpop.f32.mrb[127].mxu1  ;;  %8554 = vmatmul.mubr.msk.f32.vlgmr.msra.gmra.mrb[138].mxu1 %vm444_vm3, %v5410_v37 }
0x23b2   :  { %8556 = vmatprep.mubr.msk.f32.mxu1 %vm9408_vm2, %v9409_v10 }
0x23b4   :  { %v5415_v47 = vpop.f32.mrb[128].mxu1 }
0x23b5   :  { %v8506_v62 = vpop.f32.mrb[129].mxu1  ;;  %8557 = vmatmul.mubr.msk.f32.gmra.mrb[140].mxu1 %vm444_vm3, %v5415_v47 }
0x23b6   :  { %8559 = vmatprep.mubr.msk.f32.mxu1 %vm9408_vm2, %v9409_v10 }
0x23b8   :  { %v5420_v54 = vpop.f32.mrb[130].mxu1 }
0x23b9   :  { %v8509_v29 = vpop.f32.mrb[131].mxu1  ;;  %8560 = vmatmul.mubr.msk.f32.gmra.mrb[142].mxu1 %vm444_vm3, %v5420_v54 }
0x23ba   :  { %8583 = vmatprep.mubr.msk.f32.mxu1 %vm9408_vm2, %v9409_v10 }
0x23bc   :  { %v5651_v17 = vpop.f32.mrb[132].mxu1 }
0x23bd   :  { %v8533_v45 = vpop.f32.mrb[133].mxu1  ;;  %8543 = vmatmul.mubr.msk.f32.vlgmr.msra.gmra.mrb[132].mxu0 %vm444_vm3, %v5651_v17 }
0x23be   :  { %8865 = vmatpush3.bf16.xpose.msk.msra.mxu0 %vm9711_vm4, %v8863_v39  ;;  %8545 = vmatprep.mubr.msk.f32.mxu0 %vm9408_vm2, %v9409_v10 }
0x23bf   :  { %8566 = vmatprep.subr.mxu0 %v9409_v10 }
0x23c0   :  { %v5656_v32 = vpop.f32.mrb[134].mxu1 }
0x23c1   :  { %v8536_v43 = vpop.f32.mrb[135].mxu1  ;;  %8546 = vmatmul.mubr.msk.f32.gmra.mrb[134].mxu0 %vm444_vm3, %v5656_v32 }
0x23c2   :  { %8548 = vmatprep.mubr.msk.f32.mxu0 %vm9408_vm2, %v9409_v10 }
0x23c4   :  { %v5661_v49 = vpop.f32.mrb[136].mxu1 }
0x23c5   :  { %v8539_v8 = vpop.f32.mrb[137].mxu1  ;;  %8549 = vmatmul.mubr.msk.f32.gmra.mrb[136].mxu0 %vm444_vm3, %v5661_v49 }
0x23c6   :  { %8567 = vmatpush3.xpose.msk.msra.mxu0 %vm444_vm3, %v5854_v12  ;;  %8568 = vmatprep.mubr.msk.f32.mxu0 %vm9408_vm2, %v9409_v10 }
0x23c7   :  { %8592 = vmatprep.subr.mxu0 %v9409_v10 }
0x23c9   :  { %8569 = vmatmul.mubr.msk.f32.vlgmr.msra.gmra.mrb[138].mxu0 %vm444_vm3, %v5844_v50 }
0x23ca   :  { %8571 = vmatprep.mubr.msk.f32.mxu0 %vm9408_vm2, %v9409_v10  ;;  %8593 = vmatpush3.msra.mxu0 %v10814_v44 }
0x23cb   :  { %8873 = vmatprep.subr.bf16.mxu0 %v9406_v0 }
0x23cd   :  { %8572 = vmatmul.mubr.msk.f32.gmra.mrb[140].mxu0 %vm444_vm3, %v5846_v13 }
0x23ce   :  { %8574 = vmatprep.mubr.msk.f32.mxu0 %vm9408_vm2, %v9409_v10 }
0x23d1   :  { %8575 = vmatmul.mubr.msk.f32.gmra.mrb[142].mxu0 %vm444_vm3, %v5848_v28 }
0x23d2   :  { %8594 = vmatprep.mubr.msk.f32.mxu0 %vm9408_vm2, %v9409_v10 }
0x2484   :  { %v5829_v58 = vpop.f32.mrb[138].mxu1 }
0x2485   :  { %v8555_v20 = vpop.f32.mrb[139].mxu1 }
0x2488   :  { %v5834_v14 = vpop.f32.mrb[140].mxu1 }
0x2489   :  { %v8558_v59 = vpop.f32.mrb[141].mxu1 }
0x248c   :  { %v5839_v30 = vpop.f32.mrb[142].mxu1 }
0x248d   :  { %v8561_v44 = vpop.f32.mrb[143].mxu1 }
0x2490   :  { %v5740_v61 = vpop.f32.mrb[132].mxu0 }
0x2491   :  { %v11066_v38 = vadd.f32 %v5829_v58, %v5740_v61  ;;  %v8544_v19 = vpop.f32.mrb[133].mxu0 }
0x2494   :  { %v5745_v31 = vpop.f32.mrb[134].mxu0 }
0x2495   :  { %v11068_v46 = vadd.f32 %v5834_v14, %v5745_v31  ;;  %v8547_v21 = vpop.f32.mrb[135].mxu0 }
0x2498   :  { %v5750_v24 = vpop.f32.mrb[136].mxu0 }
0x2499   :  { %v11070_v3 = vadd.f32 %v5839_v30, %v5750_v24  ;;  %v8550_v7 = vpop.f32.mrb[137].mxu0 }
0x249c   :  { %v5933_v34 = vpop.f32.mrb[138].mxu0 }
0x249d   :  { %v5947_v1 = vmul.f32 0.35355338, %v5933_v34  ;;  %v8570_v48 = vpop.f32.mrb[139].mxu0 }
0x249f   :  { %v5950_v42 = vadd.f32 %v5947_v1, %v9750_v35 }
0x24a0   :  { %v5938_v18 = vpop.f32.mrb[140].mxu0 }
0x24a1   :  { %v5948_v36 = vmul.f32 0.35355338, %v5938_v18  ;;  %v8573_v11 = vpop.f32.mrb[141].mxu0  ;;  %v5953_v9 = vsel %vm543_vm6, %v5950_v42, -inf }
0x24a2   :  { %5954 = vmax.xlane.f32.xlu1 %v5953_v9 }
0x24a3   :  { %v5951_v26 = vadd.f32 %v5948_v36, %v9750_v35 }
0x24a4   :  { %v5943_v6 = vpop.f32.mrb[142].mxu0 }
0x24a5   :  { %v5949_v37 = vmul.f32 0.35355338, %v5943_v6  ;;  %v8576_v5 = vpop.f32.mrb[143].mxu0  ;;  %v5956_v47 = vsel %vm543_vm6, %v5951_v26, -inf }
0x24a6   :  { %5957 = vmax.xlane.f32.xlu0 %v5956_v47 }
0x24a7   :  { %v5952_v51 = vadd.f32 %v5949_v37, %v9750_v35 }
0x24a9   :  { %v5959_v62 = vsel %vm543_vm6, %v5952_v51, -inf }
0x24aa   :  { %5960 = vmax.xlane.f32.xlu0 %v5959_v62 }
0x24b3   :  { %9075 = vrot.lane.b32.xlu1 %v10850_v22, %s11435_s5 }
0x252f   :  { %v5955_v23 = vpop.xlane.xlu1 %5954 }
0x2530   :  { %v5962_v33 = vsub.f32 %v5950_v42, %v5955_v23 }
0x2532   :  { %v5965_v54 = vmul.f32 1.442695, %v5962_v33 }
0x2533   :  { %v9076_v29 = vpop.permute.xlu1 %9075  ;;  %v5958_v39 = vpop.xlane.xlu0 %5957 }
0x2534   :  { %9317 = vpow2.f32 %v5965_v54  ;;  %v9078_v17 = vunpack.i.h.bf16 %v9076_v29  ;;  %v9077_v45 = vunpack.i.l.bf16 %v9076_v29  ;;  %v5963_v32 = vsub.f32 %v5951_v26, %v5958_v39 }
0x2536   :  { %v8867_v43 = vpack.c.bf16 %v9078_v17, %v9077_v45  ;;  %v5967_v49 = vmul.f32 1.442695, %v5963_v32 }
0x2537   :  { %v5961_v12 = vpop.xlane.xlu0 %5960 }
0x2538   :  { %9319 = vpow2.f32 %v5967_v49  ;;  %v5964_v8 = vsub.f32 %v5952_v51, %v5961_v12  ;;  %8868 = vmatpush3.bf16.msra.mxu1 %v8867_v43 }
0x2539   :  { %8581 = vmatprep.subr.mxu1 %v9409_v10 }
0x253a   :  { %v5969_v50 = vmul.f32 1.442695, %v5964_v8 }
0x253c   :  { %9321 = vpow2.f32 %v5969_v50 }
0x253e   :  { %v9318_v13 = vpop.eup %9317 }
0x253f   :  { %v5971_v28 = vsel %vm543_vm6, %v9318_v13, 0.0 }
0x2540   :  { %5972 = vadd.xlane.f32.xlu0 %v5971_v28 }
0x2542   :  { %v9320_v58 = vpop.eup %9319 }
0x2543   :  { %v5974_v20 = vsel %vm543_vm6, %v9320_v58, 0.0 }
0x2544   :  { %5975 = vadd.xlane.f32.xlu1 %v5974_v20 }
0x2546   :  { %v9322_v14 = vpop.eup %9321 }
0x2547   :  { %v5977_v59 = vsel %vm543_vm6, %v9322_v14, 0.0 }
0x2548   :  { %5978 = vadd.xlane.f32.xlu0 %v5977_v59 }
0x2555   :  { %9080 = vrot.lane.b32.xlu1 %v10850_v22, %s11436_s2 }
0x2559   :  { %6186 = vrot.lane.b32.xlu1 %v10855_v27, %s11436_s2 }
0x255d   :  { %6176 = vrot.lane.b32.xlu1 %v10846_v40, %s11437_s20 }
0x255e   :  { %5990 = vrot.lane.b32.xlu0 %v10855_v27, %s11435_s5 }
0x2561   :  { %9085 = vrot.lane.b32.xlu1 %v10850_v22, %s11438_s25 }
0x25cd   :  { %v5973_v30 = vpop.xlane.xlu0 %5972 }
0x25ce   :  { %9323 = vrcp.f32 %v5973_v30 }
0x25d1   :  { %v5976_v44 = vpop.xlane.xlu1 %5975 }
0x25d2   :  { %9325 = vrcp.f32 %v5976_v44 }
0x25d5   :  { %v5979_v61 = vpop.xlane.xlu0 %5978  ;;  %v9081_v31 = vpop.permute.xlu1 %9080 }
0x25d6   :  { %9327 = vrcp.f32 %v5979_v61  ;;  %v9083_v7 = vunpack.i.h.bf16 %v9081_v31  ;;  %v9082_v34 = vunpack.i.l.bf16 %v9081_v31 }
0x25d8   :  { %v9324_v19 = vpop.eup %9323  ;;  %v8870_v1 = vpack.c.bf16 %v9083_v7, %v9082_v34 }
0x25d9   :  { %v5981_v21 = vmul.f32 %v9324_v19, %v9318_v13  ;;  %v5991_v24 = vpop.permute.xlu0 %5990  ;;  %v6187_v18 = vpop.permute.xlu1 %6186 }
0x25da   :  { %8582 = vmatpush3.msra.mxu1 %v5991_v24 }
0x25db   :  { %8584 = vmatmul.mubr.msk.f32.vlgmr.msra.gmra.mrb[144].mxu1 %vm543_vm6, %v5981_v21  ;;  %8869 = vmatprep.subr.bf16.mxu1 %v9406_v0 }
0x25dc   :  { %v9326_v40 = vpop.eup %9325  ;;  %8586 = vmatprep.mubr.msk.f32.mxu1 %vm9408_vm2, %v9409_v10 }
0x25dd   :  { %v5983_v22 = vmul.f32 %v9326_v40, %v9320_v58  ;;  %v6177_v36 = vpop.permute.xlu1 %6176 }
0x25df   :  { %8587 = vmatmul.mubr.msk.f32.gmra.mrb[146].mxu1 %vm543_vm6, %v5983_v22 }
0x25e0   :  { %v9328_v48 = vpop.eup %9327  ;;  %8589 = vmatprep.mubr.msk.f32.mxu1 %vm9408_vm2, %v9409_v10 }
0x25e1   :  { %8872 = vmatpush3.bf16.xpose.msk.msra.mxu1 %vm9711_vm4, %v8870_v1  ;;  %v5985_v42 = vmul.f32 %v9328_v48, %v9322_v14  ;;  %v9086_v15 = vpop.permute.xlu1 %9085  ;;  %vm7053_vm4 = vcmask 253952  }
0x25e2   :  { %8607 = vmatprep.subr.mxu1 %v9409_v10  ;;  %v9088_v11 = vunpack.i.h.bf16 %v9086_v15  ;;  %v9087_v9 = vunpack.i.l.bf16 %v9086_v15 }
0x25e3   :  { %8590 = vmatmul.mubr.msk.f32.gmra.mrb[148].mxu1 %vm543_vm6, %v5985_v42 }
0x25e4   :  { %8609 = vmatprep.mubr.msk.f32.mxu1 %vm9408_vm2, %v9409_v10  ;;  %v8874_v26 = vpack.c.bf16 %v9088_v11, %v9087_v9 }
0x25e9   :  { %8608 = vmatpush3.xpose.msk.msra.mxu1 %vm444_vm3, %v6187_v18 }
0x25ea   :  { %8633 = vmatprep.subr.mxu1 %v9409_v10 }
0x25ec   :  { %8610 = vmatmul.mubr.msk.f32.vlgmr.msra.gmra.mrb[150].mxu1 %vm444_vm3, %v6177_v36 }
0x25ed   :  { %8612 = vmatprep.mubr.msk.f32.mxu1 %vm9408_vm2, %v9409_v10  ;;  %8634 = vmatpush3.msra.mxu1 %v10926_v16 }
0x26ae   :  { %v6070_v6 = vpop.f32.mrb[144].mxu1 }
0x26af   :  { %v8585_v37 = vpop.f32.mrb[145].mxu1  ;;  %8595 = vmatmul.mubr.msk.f32.vlgmr.msra.gmra.mrb[144].mxu0 %vm444_vm3, %v6070_v6 }
0x26b0   :  { %8875 = vmatpush3.bf16.msra.mxu0 %v8874_v26  ;;  %8597 = vmatprep.mubr.msk.f32.mxu0 %vm9408_vm2, %v9409_v10 }
0x26b1   :  { %8622 = vmatprep.subr.mxu0 %v9409_v10 }
0x26b2   :  { %v6075_v5 = vpop.f32.mrb[146].mxu1 }
0x26b3   :  { %v8588_v47 = vpop.f32.mrb[147].mxu1  ;;  %8598 = vmatmul.mubr.msk.f32.gmra.mrb[146].mxu0 %vm444_vm3, %v6075_v5 }
0x26b4   :  { %8600 = vmatprep.mubr.msk.f32.mxu0 %vm9408_vm2, %v9409_v10 }
0x26b6   :  { %v6080_v16 = vpop.f32.mrb[148].mxu1 }
0x26b7   :  { %v8591_v51 = vpop.f32.mrb[149].mxu1  ;;  %8601 = vmatmul.mubr.msk.f32.gmra.mrb[148].mxu0 %vm444_vm3, %v6080_v16 }
0x26b8   :  { %8624 = vmatprep.mubr.msk.f32.mxu0 %vm9408_vm2, %v9409_v10 }
0x26bf   :  { %v6266_v62 = vpop.f32.mrb[150].mxu1 }
0x26c0   :  { %v6280_v23 = vmul.f32 0.35355338, %v6266_v62  ;;  %v8611_v33 = vpop.f32.mrb[151].mxu1 }
0x26c2   :  { %v6283_v54 = vadd.f32 %v6280_v23, %v9750_v35 }
0x26c4   :  { %v6286_v29 = vsel %vm543_vm6, %v6283_v54, -inf }
0x26c5   :  { %6287 = vmax.xlane.f32.xlu0 %v6286_v29 }
0x26db   :  { %6178 = vrot.lane.b32.xlu0 %v10843_v25, %s11437_s20 }
0x26df   :  { %6180 = vrot.lane.b32.xlu0 %v10855_v27, %s11437_s20 }
0x2752   :  { %v6288_v39 = vpop.xlane.xlu0 %6287 }
0x2753   :  { %v6295_v17 = vsub.f32 %v6283_v54, %v6288_v39 }
0x2755   :  { %v6298_v45 = vmul.f32 1.442695, %v6295_v17 }
0x2756   :  { %v6179_v32 = vpop.permute.xlu0 %6178 }
0x2757   :  { %9329 = vpow2.f32 %v6298_v45  ;;  %8613 = vmatmul.mubr.msk.f32.gmra.mrb[152].mxu1 %vm444_vm3, %v6179_v32 }
0x2758   :  { %8615 = vmatprep.mubr.msk.f32.mxu1 %vm9408_vm2, %v9409_v10 }
0x275a   :  { %v6181_v43 = vpop.permute.xlu0 %6180 }
0x275b   :  { %8616 = vmatmul.mubr.msk.f32.gmra.mrb[154].mxu1 %vm444_vm3, %v6181_v43 }
0x275c   :  { %8635 = vmatprep.mubr.msk.f32.mxu1 %vm9408_vm2, %v9409_v10 }
0x2761   :  { %v9330_v25 = vpop.eup %9329 }
0x2762   :  { %v6304_v49 = vsel %vm543_vm6, %v9330_v25, 0.0 }
0x2763   :  { %6305 = vadd.xlane.f32.xlu1 %v6304_v49 }
0x2774   :  { %6323 = vrot.lane.b32.xlu1 %v10855_v27, %s11438_s25 }
0x2782   :  { %v6159_v12 = vpop.f32.mrb[144].mxu0 }
0x2783   :  { %v11139_v8 = vadd.f32 %v6159_v12, %v11066_v38  ;;  %v8596_v50 = vpop.f32.mrb[145].mxu0 }
0x2786   :  { %v6164_v13 = vpop.f32.mrb[146].mxu0 }
0x2787   :  { %v11142_v28 = vadd.f32 %v6164_v13, %v11068_v46  ;;  %v8599_v58 = vpop.f32.mrb[147].mxu0 }
0x278a   :  { %v6169_v20 = vpop.f32.mrb[148].mxu0 }
0x278b   :  { %v11145_v14 = vadd.f32 %v6169_v20, %v11070_v3  ;;  %v8602_v59 = vpop.f32.mrb[149].mxu0  ;;  %v11154_v3 = vld [vmem:[%s11398_s8 + $0x1] ss:$0 sm:$0xff] }
0x278c   :  { %v6518_v24 = vadd.f32 %v11154_v3, %v10986_v41  ;;  %v6519_v5 = vadd.f32 %v11154_v3, %v10991_v53 }
0x278e   :  { %v6524_v48 = vadd.f32 %v6518_v24, %v10420_v4  ;;  %v6525_v62 = vadd.f32 %v6519_v5, %v10441_v55 }
0x2790   :  { %v6536_v42 = vsel %vm203_vm1, %v6524_v48, 0.0 }
0x27f0   :  { %v6306_v30 = vpop.xlane.xlu1 %6305 }
0x27f1   :  { %9331 = vrcp.f32 %v6306_v30 }
0x27f4   :  { %v6324_v44 = vpop.permute.xlu1 %6323 }
0x27f5   :  { %8623 = vmatpush3.msra.mxu0 %v6324_v44 }
0x27fb   :  { %v9332_v27 = vpop.eup %9331 }
0x27fc   :  { %v6314_v61 = vmul.f32 %v9332_v27, %v9330_v25 }
0x27fe   :  { %8625 = vmatmul.mubr.msk.f32.vlgmr.msra.gmra.mrb[150].mxu0 %vm543_vm6, %v6314_v61 }
0x27ff   :  { %8627 = vmatprep.mubr.msk.f32.mxu0 %vm9408_vm2, %v9409_v10 }
0x282a   :  { %v6271_v38 = vpop.f32.mrb[152].mxu1 }
0x282b   :  { %v6281_v46 = vmul.f32 0.35355338, %v6271_v38  ;;  %v8614_v19 = vpop.f32.mrb[153].mxu1 }
0x282d   :  { %v6284_v31 = vadd.f32 %v6281_v46, %v9750_v35 }
0x282e   :  { %v6276_v21 = vpop.f32.mrb[154].mxu1 }
0x282f   :  { %v6282_v7 = vmul.f32 0.35355338, %v6276_v21  ;;  %v8617_v34 = vpop.f32.mrb[155].mxu1  ;;  %v6289_v40 = vsel %vm543_vm6, %v6284_v31, -inf  ;;  %v7509_v21 = vld [vmem:[%s11401_s11 + $0x20] sm:$0xff] }
0x2830   :  { %6290 = vmax.xlane.f32.xlu0 %v6289_v40 }
0x2831   :  { %v6285_v22 = vadd.f32 %v6282_v7, %v9750_v35  ;;  %v6517_v35 = vadd.f32 %v11154_v3, %v10981_v2  ;;  %v7512_v7 = vld [vmem:[%s11401_s11 + $0x38] sm:$0xff] }
0x2833   :  { %v6292_v1 = vsel %vm543_vm6, %v6285_v22, -inf  ;;  %v11167_v37 = vadd.f32 %v6517_v35, %v10423_v57  ;;  %v6539_v57 = vsel %vm203_vm1, %v6525_v62, 0.0 }
0x2834   :  { %6293 = vmax.xlane.f32.xlu1 %v6292_v1 }
0x2835   :  { %v6533_v2 = vsel %vm203_vm1, %v11167_v37, 0.0 }
0x2838   :  { %6537 = vadd.xlane.f32.xlu1 %v6536_v42  ;;  %v11214_v42 = vld [vmem:[%s11399_s9 + $0x1] ss:$0 sm:$0xff] }
0x28bd   :  { %v6291_v18 = vpop.xlane.xlu0 %6290 }
0x28be   :  { %v6296_v36 = vsub.f32 %v6284_v31, %v6291_v18 }
0x28c0   :  { %v6300_v15 = vmul.f32 1.442695, %v6296_v36  ;;  %v11219_v36 = vld [vmem:[%s11400_s10 + $0x1] ss:$0 sm:$0xff] }
0x28c1   :  { %v6294_v11 = vpop.xlane.xlu1 %6293 }
0x28c2   :  { %9333 = vpow2.f32 %v6300_v15  ;;  %v6297_v41 = vsub.f32 %v6285_v22, %v6294_v11 }
0x28c4   :  { %v6302_v9 = vmul.f32 1.442695, %v6297_v41 }
0x28c5   :  { %v6538_v58 = vpop.xlane.xlu1 %6537 }
0x28c6   :  { %9335 = vpow2.f32 %v6302_v9  ;;  %v6552_v20 = vmul.f32 0.03125, %v6538_v58 }
0x28c8   :  { %v6558_v27 = vsub.f32 %v6524_v48, %v6552_v20 }
0x28ca   :  { %v6564_v19 = vmul.f32 %v6558_v27, %v6558_v27 }
0x28cc   :  { %v9334_v26 = vpop.eup %9333  ;;  %v6572_v31 = vsel %vm203_vm1, %v6564_v19, 0.0 }
0x28cd   :  { %v6307_v6 = vsel %vm543_vm6, %v9334_v26, 0.0 }
0x28ce   :  { %6308 = vadd.xlane.f32.xlu0 %v6307_v6 }
0x28d0   :  { %v9336_v4 = vpop.eup %9335 }
0x28d1   :  { %v6403_v47 = vpop.f32.mrb[150].mxu0  ;;  %v6310_v16 = vsel %vm543_vm6, %v9336_v4, 0.0 }
0x28d2   :  { %6311 = vadd.xlane.f32.xlu0 %v6310_v16  ;;  %v8626_v51 = vpop.f32.mrb[151].mxu0  ;;  %8636 = vmatmul.mubr.msk.f32.vlgmr.msra.gmra.mrb[156].mxu1 %vm444_vm3, %v6403_v47 }
0x28d3   :  { %8638 = vmatprep.mubr.msk.f32.mxu1 %vm9408_vm2, %v9409_v10 }
0x28d6   :  { %6534 = vadd.xlane.f32.xlu0 %v6533_v2 }
0x28da   :  { %6540 = vadd.xlane.f32.xlu0 %v6539_v57 }
0x295b   :  { %v6309_v53 = vpop.xlane.xlu0 %6308 }
0x295c   :  { %9337 = vrcp.f32 %v6309_v53 }
0x295f   :  { %v6312_v23 = vpop.xlane.xlu0 %6311 }
0x2960   :  { %9339 = vrcp.f32 %v6312_v23 }
0x2963   :  { %v6535_v33 = vpop.xlane.xlu0 %6534 }
0x2964   :  { %v6551_v54 = vmul.f32 0.03125, %v6535_v33 }
0x2966   :  { %v9338_v29 = vpop.eup %9337  ;;  %v6557_v39 = vsub.f32 %v11167_v37, %v6551_v54 }
0x2967   :  { %v6541_v17 = vpop.xlane.xlu0 %6540  ;;  %v6316_v45 = vmul.f32 %v9338_v29, %v9334_v26 }
0x2968   :  { %v6553_v32 = vmul.f32 0.03125, %v6541_v17  ;;  %v6563_v43 = vmul.f32 %v6557_v39, %v6557_v39 }
0x2969   :  { %8628 = vmatmul.mubr.msk.f32.gmra.mrb[152].mxu0 %vm543_vm6, %v6316_v45 }
0x296a   :  { %v9340_v55 = vpop.eup %9339  ;;  %v11181_v25 = vsub.f32 %v6525_v62, %v6553_v32  ;;  %v6569_v49 = vsel %vm203_vm1, %v6563_v43, 0.0  ;;  %8630 = vmatprep.mubr.msk.f32.mxu0 %vm9408_vm2, %v9409_v10 }
0x296b   :  { %6570 = vadd.xlane.f32.xlu0 %v6569_v49  ;;  %v6318_v12 = vmul.f32 %v9340_v55, %v9336_v4  ;;  %v7521_v55 = vld [vmem:[%s11403_s13 + $0x40] sm:$0xff] }
0x296c   :  { %v6565_v50 = vmul.f32 %v11181_v25, %v11181_v25 }
0x296d   :  { %8631 = vmatmul.mubr.msk.f32.gmra.mrb[154].mxu0 %vm543_vm6, %v6318_v12  ;;  %v7523_v12 = vld [vmem:[%s11403_s13 + $0x50] sm:$0xff] }
0x296e   :  { %v6575_v13 = vsel %vm203_vm1, %v6565_v50, 0.0  ;;  %v7524_v50 = vld [vmem:[%s11403_s13 + $0x58] sm:$0xff] }
0x296f   :  { %6576 = vadd.xlane.f32.xlu0 %v6575_v13  ;;  %v8888_v58 = vpack.c.bf16 %v7524_v50, %v7523_v12 }
0x29a5   :  { %v6492_v59 = vpop.f32.mrb[156].mxu1 }
0x29a6   :  { %v6506_v30 = vadd.f32 %v6492_v59, %v11139_v8  ;;  %v8637_v44 = vpop.f32.mrb[157].mxu1  ;;  %v7510_v8 = vld [vmem:[%s11401_s11 + $0x28] sm:$0xff] }
0x29a7   :  { %v8876_v24 = vpack.c.bf16 %v7510_v8, %v7509_v21  ;;  %v7526_v44 = vld [vmem:[%s11403_s13 + $0x68] sm:$0xff] }
0x29a8   :  { %v6520_v61 = vadd.f32 %v11154_v3, %v6506_v30  ;;  %v7525_v30 = vld [vmem:[%s11403_s13 + $0x60] sm:$0xff] }
0x29a9   :  { %8877 = vmatprep.subr.bf16.mxu0 %v8876_v24 }
0x29aa   :  { %v11193_v38 = vadd.f32 %v6520_v61, %v10438_v60  ;;  %8879 = vmatpush3.bf16.msra.mxu0 %v8876_v24  ;;  %v7511_v60 = vld [vmem:[%s11401_s11 + $0x30] sm:$0xff] }
0x29ab   :  { %v8880_v34 = vpack.c.bf16 %v7512_v7, %v7511_v60  ;;  %v7527_v61 = vld [vmem:[%s11403_s13 + $0x70] sm:$0xff] }
0x29ac   :  { %v6542_v46 = vsel %vm203_vm1, %v11193_v38, 0.0 }
0x29ad   :  { %6543 = vadd.xlane.f32.xlu1 %v6542_v46  ;;  %8881 = vmatprep.subr.bf16.mxu0 %v8880_v34  ;;  %v7528_v46 = vld [vmem:[%s11403_s13 + $0x78] sm:$0xff] }
0x29ae   :  { %8883 = vmatpush3.bf16.msra.mxu0 %v8880_v34  ;;  %v8896_v19 = vpack.c.bf16 %v7528_v46, %v7527_v61 }
0x29af   :  { %8900 = vmatprep.subr.bf16.mxu0 %v9406_v0 }
0x29b1   :  { %6573 = vadd.xlane.f32.xlu1 %v6572_v31 }
0x29f8   :  { %v6571_v40 = vpop.xlane.xlu0 %6570 }
0x29f9   :  { %v6587_v22 = vmul.f32 0.03125, %v6571_v40 }
0x29fb   :  { %v6593_v1 = vadd.f32 1e-06, %v6587_v22 }
0x29fc   :  { %v6577_v41 = vpop.xlane.xlu0 %6576 }
0x29fd   :  { %9341 = vrsqrt.f32 %v6593_v1  ;;  %v6589_v9 = vmul.f32 0.03125, %v6577_v41 }
0x29ff   :  { %v6595_v26 = vadd.f32 1e-06, %v6589_v9 }
0x2a01   :  { %9343 = vrsqrt.f32 %v6595_v26 }
0x2a07   :  { %v9342_v48 = vpop.eup %9341 }
0x2a08   :  { %v6605_v18 = vmul.f32 %v9342_v48, %v6557_v39 }
0x2a0a   :  { %v6617_v15 = vmul.f32 %v11214_v42, %v6605_v18 }
0x2a0b   :  { %v9344_v33 = vpop.eup %9343 }
0x2a0c   :  { %v6629_v11 = vadd.f32 %v11219_v36, %v6617_v15  ;;  %v6607_v54 = vmul.f32 %v9344_v33, %v11181_v25  ;;  %v7522_v25 = vld [vmem:[%s11403_s13 + $0x48] sm:$0xff] }
0x2a0d   :  { %v8884_v49 = vpack.c.bf16 %v7522_v25, %v7521_v55 }
0x2a0e   :  { %8652 = vmatprep.mubr.msk.f32.mxu0 %vm203_vm1, %v6629_v11  ;;  %v6619_v17 = vmul.f32 %v11214_v42, %v6607_v54 }
0x2a0f   :  { %8885 = vmatprep.subr.bf16.mxu1 %v8884_v49 }
0x2a10   :  { %v6631_v43 = vadd.f32 %v11219_v36, %v6619_v17  ;;  %8887 = vmatpush3.bf16.msra.mxu1 %v8884_v49 }
0x2a11   :  { %8889 = vmatprep.subr.bf16.mxu1 %v8888_v58 }
0x2a14   :  { %8891 = vmatpush3.bf16.msra.mxu1 %v8888_v58 }
0x2a3a   :  { %v6544_v35 = vpop.xlane.xlu1 %6543 }
0x2a3b   :  { %v6554_v6 = vmul.f32 0.03125, %v6544_v35 }
0x2a3c   :  { %v6408_v4 = vpop.f32.mrb[152].mxu0 }
0x2a3d   :  { %v6560_v5 = vsub.f32 %v11193_v38, %v6554_v6  ;;  %v8629_v47 = vpop.f32.mrb[153].mxu0  ;;  %8639 = vmatmul.mubr.msk.f32.gmra.mrb[158].mxu1 %vm444_vm3, %v6408_v4 }
0x2a3e   :  { %v6574_v16 = vpop.xlane.xlu1 %6573  ;;  %8641 = vmatprep.mubr.msk.f32.mxu1 %vm9408_vm2, %v9409_v10 }
0x2a3f   :  { %v6588_v51 = vmul.f32 0.03125, %v6574_v16  ;;  %v6566_v2 = vmul.f32 %v6560_v5, %v6560_v5 }
0x2a40   :  { %v6413_v62 = vpop.f32.mrb[154].mxu0 }
0x2a41   :  { %v6594_v57 = vadd.f32 1e-06, %v6588_v51  ;;  %v8632_v53 = vpop.f32.mrb[155].mxu0  ;;  %8642 = vmatmul.mubr.msk.f32.gmra.mrb[160].mxu1 %vm444_vm3, %v6413_v62  ;;  %v6578_v23 = vsel %vm203_vm1, %v6566_v2, 0.0 }
0x2a42   :  { %6579 = vadd.xlane.f32.xlu1 %v6578_v23 }
0x2a43   :  { %9345 = vrsqrt.f32 %v6594_v57 }
0x2a4d   :  { %v9346_v29 = vpop.eup %9345 }
0x2a4e   :  { %v6606_v39 = vmul.f32 %v9346_v29, %v6558_v27  ;;  %v8892_v27 = vpack.c.bf16 %v7526_v44, %v7525_v30 }
0x2a50   :  { %v6618_v45 = vmul.f32 %v11214_v42, %v6606_v39  ;;  %8893 = vmatprep.subr.bf16.mxu1 %v8892_v27 }
0x2a51   :  { %8895 = vmatpush3.bf16.msra.mxu1 %v8892_v27 }
0x2a52   :  { %v6630_v32 = vadd.f32 %v11219_v36, %v6618_v45  ;;  %8897 = vmatprep.subr.bf16.mxu1 %v8896_v19 }
0x2a54   :  { %8653 = vmatmul.mubr.msk.f32.vlgmr.msra.gmra.mrb[156].mxu0 %vm203_vm1, %v6630_v32 }
0x2a55   :  { %8655 = vmatprep.mubr.msk.f32.mxu0 %vm203_vm1, %v6631_v43  ;;  %8899 = vmatpush3.bf16.msra.mxu1 %v8896_v19 }
0x2a56   :  { %8906 = vmatprep.subr.bf16.mxu1 %v9406_v0 }
0x2acf   :  { %v6580_v13 = vpop.xlane.xlu1 %6579 }
0x2ad0   :  { %v6590_v20 = vmul.f32 0.03125, %v6580_v13 }
0x2ad2   :  { %v6596_v59 = vadd.f32 1e-06, %v6590_v20 }
0x2ad4   :  { %9347 = vrsqrt.f32 %v6596_v59 }
0x2ade   :  { %v9348_v31 = vpop.eup %9347 }
0x2adf   :  { %v6608_v21 = vmul.f32 %v9348_v31, %v6560_v5 }
0x2ae1   :  { %v6620_v8 = vmul.f32 %v11214_v42, %v6608_v21 }
0x2ae3   :  { %v6632_v24 = vadd.f32 %v11219_v36, %v6620_v8 }
0x2ae5   :  { %8656 = vmatmul.mubr.msk.f32.gmra.mrb[158].mxu0 %vm203_vm1, %v6632_v24 }
0x2b10   :  { %v6497_v60 = vpop.f32.mrb[158].mxu1 }
0x2b11   :  { %v6507_v7 = vadd.f32 %v6497_v60, %v11142_v28  ;;  %v8640_v34 = vpop.f32.mrb[159].mxu1 }
0x2b13   :  { %v6521_v40 = vadd.f32 %v11154_v3, %v6507_v7 }
0x2b14   :  { %v6502_v22 = vpop.f32.mrb[160].mxu1 }
0x2b15   :  { %v6508_v1 = vadd.f32 %v6502_v22, %v11145_v14  ;;  %v8643_v48 = vpop.f32.mrb[161].mxu1  ;;  %v11269_v18 = vadd.f32 %v6521_v40, %v10571_v63  ;;  %v11282_v14 = vld [vmem:[%s11402_s12 + $0x1] ss:$0 sm:$0xff] }
0x2b17   :  { %v6522_v15 = vadd.f32 %v11154_v3, %v6508_v1  ;;  %v6545_v11 = vsel %vm203_vm1, %v11269_v18, 0.0 }
0x2b18   :  { %6546 = vadd.xlane.f32.xlu0 %v6545_v11 }
0x2b19   :  { %v11275_v41 = vadd.f32 %v6522_v15, %v10568_v52 }
0x2b1b   :  { %v6548_v28 = vsel %vm203_vm1, %v11275_v41, 0.0 }
0x2b1c   :  { %6549 = vadd.xlane.f32.xlu1 %v6548_v28 }
0x2b27   :  { %v8654_v63 = vpop.f32.mrb[156].mxu0 }
0x2b28   :  { %v6738_v9 = vadd.f32 %v8654_v63, %v11282_v14  ;;  %v6732_v3 = vpop.f32.mrb[157].mxu0 }
0x2b29   :  { %v6733_v26 = vadd.f32 %v11282_v14, %v6732_v3 }
0x2b2a   :  { %v6768_v35 = vmul.f32 0.70710677, %v6738_v9  ;;  %v6762_v15 = vmul.f32 0.5, %v6738_v9 }
0x2b2b   :  { %v6767_v6 = vmul.f32 0.70710677, %v6733_v26  ;;  %v6761_v1 = vmul.f32 0.5, %v6733_v26 }
0x2b2c   :  { %v6786_v4 = vand.u32 2147483647, %v6768_v35  ;;  %vm6774_vm13 = vcmp.ge.f32.partialorder %v6768_v35, 0.0 }
0x2b2d   :  { %v6785_v52 = vand.u32 2147483647, %v6767_v6  ;;  %vm6773_vm14 = vcmp.ge.f32.partialorder %v6767_v6, 0.0  ;;  %v6780_v24 = vsel %vm6774_vm13, 1.0, %v9421_v56 }
0x2b2e   :  { %v6792_v5 = vmul.f32 0.3275911, %v6786_v4  ;;  %v6870_v2 = vsub.f32 0.0, %v6786_v4  ;;  %v6779_v34 = vsel %vm6773_vm14, 1.0, %v9421_v56 }
0x2b2f   :  { %v6791_v47 = vmul.f32 0.3275911, %v6785_v52  ;;  %v6869_v62 = vsub.f32 0.0, %v6785_v52 }
0x2b30   :  { %v6798_v16 = vadd.f32 1.0, %v6792_v5  ;;  %v6876_v53 = vmul.f32 %v6870_v2, %v6786_v4 }
0x2b31   :  { %v6797_v51 = vadd.f32 1.0, %v6791_v47  ;;  %v6875_v54 = vmul.f32 %v6869_v62, %v6785_v52 }
0x2b32   :  { %9349 = vrcp.f32 %v6798_v16  ;;  %v6883_v17 = vmul.f32 1.442695, %v6876_v53 }
0x2b33   :  { %9351 = vrcp.f32 %v6797_v51  ;;  %v6881_v43 = vmul.f32 1.442695, %v6875_v54 }
0x2b34   :  { %9353 = vpow2.f32 %v6883_v17 }
0x2b35   :  { %9355 = vpow2.f32 %v6881_v43 }
0x2b3c   :  { %v9350_v57 = vpop.eup %9349 }
0x2b3d   :  { %v9352_v23 = vpop.eup %9351  ;;  %v6816_v33 = vmul.f32 1.0614054, %v9350_v57 }
0x2b3e   :  { %v6815_v29 = vmul.f32 1.0614054, %v9352_v23  ;;  %v9354_v61 = vpop.eup %9353 }
0x2b3f   :  { %v6822_v39 = vadd.f32 -1.4531521, %v6816_v33  ;;  %v9356_v19 = vpop.eup %9355 }
0x2b40   :  { %v6821_v45 = vadd.f32 -1.4531521, %v6815_v29 }
0x2b41   :  { %v6828_v32 = vmul.f32 %v9350_v57, %v6822_v39 }
0x2b42   :  { %v6827_v55 = vmul.f32 %v9352_v23, %v6821_v45 }
0x2b43   :  { %v6834_v25 = vadd.f32 1.4214138, %v6828_v32 }
0x2b44   :  { %v6833_v49 = vadd.f32 1.4214138, %v6827_v55 }
0x2b45   :  { %v6840_v12 = vmul.f32 %v9350_v57, %v6834_v25 }
0x2b46   :  { %v6839_v50 = vmul.f32 %v9352_v23, %v6833_v49 }
0x2b47   :  { %v6846_v13 = vadd.f32 -0.28449672, %v6840_v12 }
0x2b48   :  { %v6845_v58 = vadd.f32 -0.28449672, %v6839_v50 }
0x2b49   :  { %v6852_v20 = vmul.f32 %v9350_v57, %v6846_v13 }
0x2b4a   :  { %v6851_v59 = vmul.f32 %v9352_v23, %v6845_v58 }
0x2b4b   :  { %v6858_v30 = vadd.f32 0.2548296, %v6852_v20 }
0x2b4c   :  { %v6857_v44 = vadd.f32 0.2548296, %v6851_v59 }
0x2b4d   :  { %v6864_v27 = vmul.f32 %v9350_v57, %v6858_v30 }
0x2b4e   :  { %v6863_v46 = vmul.f32 %v9352_v23, %v6857_v44 }
0x2b4f   :  { %v6894_v31 = vmul.f32 %v9354_v61, %v6864_v27 }
0x2b50   :  { %v6893_v21 = vmul.f32 %v9356_v19, %v6863_v46 }
0x2b51   :  { %v6900_v8 = vsub.f32 1.0, %v6894_v31 }
0x2b52   :  { %v6899_v60 = vsub.f32 1.0, %v6893_v21 }
0x2b53   :  { %v6906_v7 = vmul.f32 %v6900_v8, %v6780_v24 }
0x2b54   :  { %v6905_v40 = vmul.f32 %v6899_v60, %v6779_v34 }
0x2b55   :  { %v6912_v22 = vadd.f32 1.0, %v6906_v7 }
0x2b56   :  { %v6911_v48 = vadd.f32 1.0, %v6905_v40 }
0x2b57   :  { %v6918_v28 = vmul.f32 %v6912_v22, %v6762_v15 }
0x2b58   :  { %v6917_v11 = vmul.f32 %v6911_v48, %v6761_v1 }
0x2b5a   :  { %8677 = vmatprep.mubr.msk.f32.mxu1 %vm83_vm0, %v6917_v11 }
0x2b5b   :  { %8678 = vmatmul.mubr.msk.f32.vlgmr.msra.gmra.mrb[162].mxu1 %vm83_vm0, %v6918_v28 }
0x2ba5   :  { %v6547_v63 = vpop.xlane.xlu0 %6546 }
0x2ba6   :  { %v6555_v3 = vmul.f32 0.03125, %v6547_v63 }
0x2ba8   :  { %v11291_v35 = vsub.f32 %v11269_v18, %v6555_v3 }
0x2ba9   :  { %v6550_v6 = vpop.xlane.xlu1 %6549 }
0x2baa   :  { %v6556_v4 = vmul.f32 0.03125, %v6550_v6  ;;  %v6567_v52 = vmul.f32 %v11291_v35, %v11291_v35 }
0x2bac   :  { %v11296_v26 = vsub.f32 %v11275_v41, %v6556_v4  ;;  %v6581_v9 = vsel %vm203_vm1, %v6567_v52, 0.0 }
0x2bad   :  { %6582 = vadd.xlane.f32.xlu0 %v6581_v9 }
0x2bae   :  { %v6568_v5 = vmul.f32 %v11296_v26, %v11296_v26 }
0x2bb0   :  { %v6584_v47 = vsel %vm203_vm1, %v6568_v5, 0.0 }
0x2bb1   :  { %6585 = vadd.xlane.f32.xlu1 %v6584_v47 }
0x2bb8   :  { %v8657_v16 = vpop.f32.mrb[158].mxu0 }
0x2bb9   :  { %v6748_v18 = vadd.f32 %v8657_v16, %v11282_v14  ;;  %v6742_v51 = vpop.f32.mrb[159].mxu0  ;;  %v7530_v16 = vld [vmem:[%s11404_s14 + $0x1] ss:$0 sm:$0xff] }
0x2bba   :  { %v6743_v2 = vadd.f32 %v11282_v14, %v6742_v51 }
0x2bbb   :  { %v6770_v62 = vmul.f32 0.70710677, %v6748_v18  ;;  %v6764_v9 = vmul.f32 0.5, %v6748_v18 }
0x2bbc   :  { %v6769_v57 = vmul.f32 0.70710677, %v6743_v2  ;;  %v6763_v4 = vmul.f32 0.5, %v6743_v2 }
0x2bbd   :  { %v6788_v53 = vand.u32 2147483647, %v6770_v62  ;;  %vm6776_vm15 = vcmp.ge.f32.partialorder %v6770_v62, 0.0 }
0x2bbe   :  { %v6787_v41 = vand.u32 2147483647, %v6769_v57  ;;  %vm6775_vm3 = vcmp.ge.f32.partialorder %v6769_v57, 0.0  ;;  %v6782_v15 = vsel %vm6776_vm15, 1.0, %v9421_v56 }
0x2bbf   :  { %v6794_v23 = vmul.f32 0.3275911, %v6788_v53  ;;  %v6872_v39 = vsub.f32 0.0, %v6788_v53  ;;  %v6781_v63 = vsel %vm6775_vm3, 1.0, %v9421_v56 }
0x2bc0   :  { %v6793_v33 = vmul.f32 0.3275911, %v6787_v41  ;;  %v6871_v17 = vsub.f32 0.0, %v6787_v41 }
0x2bc1   :  { %v6800_v54 = vadd.f32 1.0, %v6794_v23  ;;  %v6878_v32 = vmul.f32 %v6872_v39, %v6788_v53 }
0x2bc2   :  { %v6799_v29 = vadd.f32 1.0, %v6793_v33  ;;  %v6877_v25 = vmul.f32 %v6871_v17, %v6787_v41 }
0x2bc3   :  { %9357 = vrcp.f32 %v6800_v54  ;;  %v6887_v50 = vmul.f32 1.442695, %v6878_v32 }
0x2bc4   :  { %9359 = vrcp.f32 %v6799_v29  ;;  %v6885_v20 = vmul.f32 1.442695, %v6877_v25 }
0x2bc5   :  { %9361 = vpow2.f32 %v6887_v50 }
0x2bc6   :  { %9363 = vpow2.f32 %v6885_v20 }
0x2bcd   :  { %v9358_v45 = vpop.eup %9357 }
0x2bce   :  { %v9360_v43 = vpop.eup %9359  ;;  %v6818_v55 = vmul.f32 1.0614054, %v9358_v45 }
0x2bcf   :  { %v6817_v49 = vmul.f32 1.0614054, %v9360_v43  ;;  %v9362_v7 = vpop.eup %9361 }
0x2bd0   :  { %v6824_v12 = vadd.f32 -1.4531521, %v6818_v55  ;;  %v9364_v40 = vpop.eup %9363 }
0x2bd1   :  { %v6823_v13 = vadd.f32 -1.4531521, %v6817_v49 }
0x2bd2   :  { %v6830_v58 = vmul.f32 %v9358_v45, %v6824_v12 }
0x2bd3   :  { %v6829_v59 = vmul.f32 %v9360_v43, %v6823_v13 }
0x2bd4   :  { %v6836_v30 = vadd.f32 1.4214138, %v6830_v58 }
0x2bd5   :  { %v6835_v44 = vadd.f32 1.4214138, %v6829_v59  ;;  %v7069_v59 = vld [vmem:[%s11407_s17] sm:$0xff] }
0x2bd6   :  { %v6842_v27 = vmul.f32 %v9358_v45, %v6836_v30 }
0x2bd7   :  { %v6841_v61 = vmul.f32 %v9360_v43, %v6835_v44  ;;  %v7071_v44 = vld [vmem:[%s11407_s17 + $0x10] sm:$0xff] }
0x2bd8   :  { %v6848_v46 = vadd.f32 -0.28449672, %v6842_v27  ;;  %v7072_v27 = vld [vmem:[%s11407_s17 + $0x18] sm:$0xff] }
0x2bd9   :  { %v6847_v19 = vadd.f32 -0.28449672, %v6841_v61  ;;  %v8904_v61 = vpack.c.bf16 %v7072_v27, %v7071_v44 }
0x2bda   :  { %v6854_v31 = vmul.f32 %v9358_v45, %v6848_v46 }
0x2bdb   :  { %v6853_v21 = vmul.f32 %v9360_v43, %v6847_v19 }
0x2bdc   :  { %v6860_v8 = vadd.f32 0.2548296, %v6854_v31 }
0x2bdd   :  { %v6859_v24 = vadd.f32 0.2548296, %v6853_v21 }
0x2bde   :  { %v6866_v60 = vmul.f32 %v9358_v45, %v6860_v8 }
0x2bdf   :  { %v6865_v34 = vmul.f32 %v9360_v43, %v6859_v24 }
0x2be0   :  { %v6896_v22 = vmul.f32 %v9362_v7, %v6866_v60 }
0x2be1   :  { %v6895_v1 = vmul.f32 %v9364_v40, %v6865_v34 }
0x2be2   :  { %v6902_v48 = vsub.f32 1.0, %v6896_v22 }
0x2be3   :  { %v6901_v11 = vsub.f32 1.0, %v6895_v1 }
0x2be4   :  { %v6908_v28 = vmul.f32 %v6902_v48, %v6782_v15 }
0x2be5   :  { %v6907_v3 = vmul.f32 %v6901_v11, %v6781_v63 }
0x2be6   :  { %v6914_v6 = vadd.f32 1.0, %v6908_v28 }
0x2be7   :  { %v6913_v52 = vadd.f32 1.0, %v6907_v3 }
0x2be8   :  { %v6920_v47 = vmul.f32 %v6914_v6, %v6764_v9 }
0x2be9   :  { %v6919_v5 = vmul.f32 %v6913_v52, %v6763_v4 }
0x2beb   :  { %8680 = vmatprep.mubr.msk.f32.mxu1 %vm83_vm0, %v6919_v5 }
0x2bec   :  { %8681 = vmatmul.mubr.msk.f32.gmra.mrb[164].mxu1 %vm83_vm0, %v6920_v47 }
0x2c2e   :  { %v8679_v51 = vpop.f32.mrb[162].mxu1 }
0x2c2f   :  { %v7024_v62 = vpop.f32.mrb[163].mxu1 }
0x2c30   :  { %v7025_v57 = vadd.f32 %v7530_v16, %v7024_v62 }
0x2c32   :  { %v7049_v53 = vadd.f32 %v7025_v57, %v11167_v37 }
0x2c34   :  { %v7054_v2 = vsel %vm7053_vm4, %v7049_v53, 0.0 }
0x2c35   :  { %7055 = vadd.xlane.f32.xlu0 %v7054_v2 }
0x2c3a   :  { %v6583_v18 = vpop.xlane.xlu0 %6582 }
0x2c3b   :  { %v6591_v41 = vmul.f32 0.03125, %v6583_v18 }
0x2c3d   :  { %v6597_v23 = vadd.f32 1e-06, %v6591_v41 }
0x2c3e   :  { %v6586_v33 = vpop.xlane.xlu1 %6585 }
0x2c3f   :  { %9365 = vrsqrt.f32 %v6597_v23  ;;  %v6592_v54 = vmul.f32 0.03125, %v6586_v33 }
0x2c41   :  { %v6598_v29 = vadd.f32 1e-06, %v6592_v54 }
0x2c43   :  { %9367 = vrsqrt.f32 %v6598_v29 }
0x2c49   :  { %v9366_v39 = vpop.eup %9365 }
0x2c4a   :  { %v6609_v17 = vmul.f32 %v9366_v39, %v11291_v35 }
0x2c4c   :  { %v6621_v45 = vmul.f32 %v11214_v42, %v6609_v17 }
0x2c4d   :  { %v9368_v32 = vpop.eup %9367 }
0x2c4e   :  { %v6633_v43 = vadd.f32 %v11219_v36, %v6621_v45  ;;  %v6610_v37 = vmul.f32 %v9368_v32, %v11296_v26 }
0x2c50   :  { %8658 = vmatprep.mubr.msk.f32.mxu0 %vm203_vm1, %v6633_v43  ;;  %v6622_v55 = vmul.f32 %v11214_v42, %v6610_v37 }
0x2c52   :  { %v6634_v25 = vadd.f32 %v11219_v36, %v6622_v55 }
0x2c54   :  { %8659 = vmatmul.mubr.msk.f32.gmra.mrb[160].mxu0 %vm203_vm1, %v6634_v25 }
0x2c55   :  { %8694 = vmatprep.mubr.msk.f32.mxu0 %vm9408_vm2, %v9409_v10 }
0x2cbf   :  { %v8682_v49 = vpop.f32.mrb[164].mxu1 }
0x2cc0   :  { %v7038_v35 = vadd.f32 %v8682_v49, %v7530_v16  ;;  %v7033_v12 = vpop.f32.mrb[165].mxu1 }
0x2cc2   :  { %v11324_v50 = vadd.f32 %v7038_v35, %v11193_v38  ;;  %v7056_v13 = vpop.xlane.xlu0 %7055  ;;  %v7070_v38 = vld [vmem:[%s11407_s17 + $0x8] sm:$0xff] }
0x2cc3   :  { %v7057_v58 = vmul.f32 0.03125, %v7056_v13  ;;  %v8901_v30 = vpack.c.bf16 %v7070_v38, %v7069_v59 }
0x2cc4   :  { %v7151_v26 = vsel %vm7053_vm4, %v11324_v50, 0.0 }
0x2cc5   :  { %v11328_v20 = vsub.f32 %v7049_v53, %v7057_v58  ;;  %7152 = vadd.xlane.f32.xlu1 %v7151_v26  ;;  %8902 = vmatpush3.bf16.msra.mxu0 %v8901_v30 }
0x2cc6   :  { %8908 = vmatpush3.bf16.msra.mxu1 %v8901_v30  ;;  %8903 = vmatprep.subr.bf16.mxu0 %v9406_v0 }
0x2cc7   :  { %v7059_v42 = vmul.f32 %v11328_v20, %v11328_v20  ;;  %8909 = vmatprep.subr.bf16.mxu1 %v9406_v0 }
0x2cc9   :  { %v7060_v36 = vsel %vm7053_vm4, %v7059_v42, 0.0  ;;  %8905 = vmatpush3.bf16.msra.mxu0 %v8904_v61 }
0x2cca   :  { %7061 = vadd.xlane.f32.xlu0 %v7060_v36  ;;  %8911 = vmatpush3.bf16.msra.mxu1 %v8904_v61 }
0x2d27   :  { %v8660_v46 = vpop.f32.mrb[160].mxu0 }
0x2d28   :  { %v6758_v19 = vadd.f32 %v8660_v46, %v11282_v14  ;;  %v6752_v31 = vpop.f32.mrb[161].mxu0 }
0x2d29   :  { %v6753_v21 = vadd.f32 %v11282_v14, %v6752_v31 }
0x2d2a   :  { %v6772_v8 = vmul.f32 0.70710677, %v6758_v19  ;;  %v6766_v59 = vmul.f32 0.5, %v6758_v19 }
0x2d2b   :  { %v6771_v24 = vmul.f32 0.70710677, %v6753_v21  ;;  %v6765_v42 = vmul.f32 0.5, %v6753_v21  ;;  %v7052_v21 = vld [vmem:[%s11406_s16] sm:$0x1] }
0x2d2c   :  { %v6790_v60 = vand.u32 2147483647, %v6772_v8  ;;  %vm6778_vm5 = vcmp.ge.f32.partialorder %v6772_v8, 0.0 }
0x2d2d   :  { %v6789_v7 = vand.u32 2147483647, %v6771_v24  ;;  %vm6777_vm6 = vcmp.ge.f32.partialorder %v6771_v24, 0.0  ;;  %v6784_v37 = vsel %vm6778_vm5, 1.0, %v9421_v56 }
0x2d2e   :  { %v6796_v34 = vmul.f32 0.3275911, %v6790_v60  ;;  %v6874_v0 = vsub.f32 0.0, %v6790_v60  ;;  %v6783_v35 = vsel %vm6777_vm6, 1.0, %v9421_v56 }
0x2d2f   :  { %v6795_v40 = vmul.f32 0.3275911, %v6789_v7  ;;  %v6873_v48 = vsub.f32 0.0, %v6789_v7 }
0x2d30   :  { %v6802_v22 = vadd.f32 1.0, %v6796_v34  ;;  %v6880_v11 = vmul.f32 %v6874_v0, %v6790_v60 }
0x2d31   :  { %v6801_v1 = vadd.f32 1.0, %v6795_v40  ;;  %v6879_v3 = vmul.f32 %v6873_v48, %v6789_v7  ;;  %v7149_v40 = vld [vmem:[%s11405_s15] sm:$0x1] }
0x2d32   :  { %9369 = vrcp.f32 %v6802_v22  ;;  %v6891_v14 = vmul.f32 1.442695, %v6880_v11  ;;  %v7073_v11 = vld [vmem:[%s11408_s18] sm:$0x1] }
0x2d33   :  { %9371 = vrcp.f32 %v6801_v1  ;;  %v6889_v5 = vmul.f32 1.442695, %v6879_v3 }
0x2d34   :  { %9373 = vpow2.f32 %v6891_v14 }
0x2d35   :  { %9375 = vpow2.f32 %v6889_v5 }
0x2d3c   :  { %v9370_v15 = vpop.eup %9369 }
0x2d3d   :  { %v9372_v28 = vpop.eup %9371  ;;  %v6820_v63 = vmul.f32 1.0614054, %v9370_v15 }
0x2d3e   :  { %v6819_v6 = vmul.f32 1.0614054, %v9372_v28  ;;  %v9374_v29 = vpop.eup %9373 }
0x2d3f   :  { %v6826_v4 = vadd.f32 -1.4531521, %v6820_v63  ;;  %v9376_v17 = vpop.eup %9375 }
0x2d40   :  { %v6825_v52 = vadd.f32 -1.4531521, %v6819_v6  ;;  %v7170_v6 = vld [vmem:[%s11408_s18] sm:$0x1] }
0x2d41   :  { %v6832_v9 = vmul.f32 %v9370_v15, %v6826_v4 }
0x2d42   :  { %v6831_v47 = vmul.f32 %v9372_v28, %v6825_v52 }
0x2d43   :  { %v6838_v16 = vadd.f32 1.4214138, %v6832_v9 }
0x2d44   :  { %v6837_v51 = vadd.f32 1.4214138, %v6831_v47 }
0x2d45   :  { %v6844_v62 = vmul.f32 %v9370_v15, %v6838_v16 }
0x2d46   :  { %v6843_v57 = vmul.f32 %v9372_v28, %v6837_v51 }
0x2d47   :  { %v6850_v53 = vadd.f32 -0.28449672, %v6844_v62 }
0x2d48   :  { %v6849_v2 = vadd.f32 -0.28449672, %v6843_v57 }
0x2d49   :  { %v6856_v18 = vmul.f32 %v9370_v15, %v6850_v53 }
0x2d4a   :  { %v6855_v41 = vmul.f32 %v9372_v28, %v6849_v2 }
0x2d4b   :  { %v6862_v23 = vadd.f32 0.2548296, %v6856_v18 }
0x2d4c   :  { %v6861_v33 = vadd.f32 0.2548296, %v6855_v41 }
0x2d4d   :  { %v6868_v54 = vmul.f32 %v9370_v15, %v6862_v23 }
0x2d4e   :  { %v6867_v39 = vmul.f32 %v9372_v28, %v6861_v33 }
0x2d4f   :  { %v6898_v45 = vmul.f32 %v9374_v29, %v6868_v54 }
0x2d50   :  { %v6897_v32 = vmul.f32 %v9376_v17, %v6867_v39 }
0x2d51   :  { %v6904_v43 = vsub.f32 1.0, %v6898_v45 }
0x2d52   :  { %v6903_v55 = vsub.f32 1.0, %v6897_v32  ;;  %v7153_v25 = vpop.xlane.xlu1 %7152 }
0x2d53   :  { %v6910_v49 = vmul.f32 %v6904_v43, %v6784_v37  ;;  %v7154_v12 = vmul.f32 0.03125, %v7153_v25 }
0x2d54   :  { %v6909_v13 = vmul.f32 %v6903_v55, %v6783_v35 }
0x2d55   :  { %v6916_v58 = vadd.f32 1.0, %v6910_v49  ;;  %v7155_v26 = vsub.f32 %v11324_v50, %v7154_v12  ;;  %v7051_v50 = vld [vmem:[%s11405_s15] sm:$0x1] }
0x2d56   :  { %v6915_v36 = vadd.f32 1.0, %v6909_v13 }
0x2d57   :  { %v7062_v38 = vpop.xlane.xlu0 %7061  ;;  %v7156_v30 = vmul.f32 %v7155_v26, %v7155_v26  ;;  %v6922_v61 = vmul.f32 %v6916_v58, %v6766_v59 }
0x2d58   :  { %v6921_v44 = vmul.f32 %v6915_v36, %v6765_v42  ;;  %v7063_v27 = vmul.f32 0.03125, %v7062_v38 }
0x2d59   :  { %v7157_v46 = vsel %vm7053_vm4, %v7156_v30, 0.0 }
0x2d5a   :  { %v7064_v31 = vadd.f32 1e-06, %v7063_v27  ;;  %8683 = vmatprep.mubr.msk.f32.mxu1 %vm83_vm0, %v6921_v44  ;;  %7158 = vadd.xlane.f32.xlu1 %v7157_v46 }
0x2d5b   :  { %8684 = vmatmul.mubr.msk.f32.gmra.mrb[166].mxu1 %vm83_vm0, %v6922_v61  ;;  %vm7147_vm0 = vcmask 73728  }
0x2d5c   :  { %9377 = vrsqrt.f32 %v7064_v31  ;;  %8705 = vmatprep.mubr.msk.f32.mxu1 %vm9408_vm2, %v9409_v10 }
0x2d66   :  { %v9378_v56 = vpop.eup %9377 }
0x2d67   :  { %v7066_v19 = vmul.f32 %v9378_v56, %v11328_v20  ;;  %v7150_v20 = vld [vmem:[%s11406_s16] sm:$0x1]  ;;  %s9422_s16 = smov [#allocation2]  }
0x2d68   :  { %s7251_s30 = sshll.u32 %s9422_s16, 4  ;;  %s7252_s30 = int_to_ptr.vmem [resolvable:$true] %s7251_s30 }
0x2d69   :  { %v7067_v8 = vmul.f32 %v7066_v19, %v7051_v50  ;;  %s9382_s21 = scalar_lea.vmem %s7252_s30, 32  ;;  %p9387_p1 = scmp.lt.s32.totalorder %s7252_s30, %s7252_s30 }
0x2d6a   :  { %p9383_p0 = scmp.ne.s32.totalorder %s7252_s30, %s9382_s21  ;;  %p9388_p2 = scmp.lt.s32.totalorder %s9382_s21, %s9382_s21 }
0x2d6b   :  { %v7068_v24 = vadd.f32 %v7067_v8, %v7052_v21 }
0x2d6c   :  { %p9389_p3 = por %p9388_p2, %p9387_p1 }
0x2d6d   :  { %8695 = vmatmul.mubr.msk.f32.vlgmr.msra.gmra.mrb[162].mxu0 %vm203_vm1, %v7068_v24 }
0x2d6e   :  { %p9390_p4 = pnand %p9389_p3, %p9383_p0 }
0x2de7   :  { %v7159_v60 = vpop.xlane.xlu1 %7158 }
0x2de8   :  { %v7160_v7 = vmul.f32 0.03125, %v7159_v60 }
0x2dea   :  { %v7161_v34 = vadd.f32 1e-06, %v7160_v7 }
0x2dec   :  { %9379 = vrsqrt.f32 %v7161_v34 }
0x2df6   :  { %v9380_v10 = vpop.eup %9379 }
0x2df7   :  { %v7163_v22 = vmul.f32 %v9380_v10, %v7155_v26 }
0x2df9   :  { %v7164_v1 = vmul.f32 %v7163_v22, %v7149_v40 }
0x2dfb   :  { %v7165_v0 = vadd.f32 %v7164_v1, %v7150_v20 }
0x2dfd   :  { %8706 = vmatmul.mubr.msk.f32.vlgmr.msra.gmra.mrb[168].mxu1 %vm203_vm1, %v7165_v0 }
0x2e2e   :  { %v8685_v48 = vpop.f32.mrb[166].mxu1 }
0x2e2f   :  { %v7042_v15 = vpop.f32.mrb[167].mxu1 }
0x2e40   :  { %v7143_v28 = vpop.f32.mrb[162].mxu0 }
0x2e41   :  { %v7144_v63 = vadd.f32 %v7143_v28, %v7073_v11  ;;  %v8696_v3 = vpop.f32.mrb[163].mxu0 }
0x2e43   :  { %7148 = vst.msk [vmem:[#allocation2] sm:$0x1] %vm7147_vm0, %v7144_v63 }
0x2ed0   :  { %v7240_v4 = vpop.f32.mrb[168].mxu1 }
0x2ed1   :  { %v7241_v14 = vadd.f32 %v7240_v4, %v7170_v6  ;;  %v8707_v52 = vpop.f32.mrb[169].mxu1 }
0x2ed3   :  { %7244 = vst.msk [vmem:[#allocation2 + $0x1] sm:$0x1] %vm7147_vm0, %v7241_v14 }
0x2ed4   :  { %9393 = shalt.err (!%p9390_p4)
}
0x2ed5   :  { %s9394_s13 = scalar_lea.hbm %s11409_s19, 32 }
0x2ed6   :  { %p9395_p5 = scmp.ne.s32.totalorder %s11409_s19, %s9394_s13  ;;  %p9398_p6 = scmp.lt.u32.totalorder %s9394_s13, %s11409_s19 }
0x2ed8   :  { %p9400_p7 = pnand %p9398_p6, %p9395_p5 }
0x2eda   :  { %9403 = shalt.err (!%p9400_p7)
}
0x2edb   :  { %7254 = dma.vmem_to_hbm [thread:$0]  %s7252_s30, 32, %s11409_s19, [#allocation3]  }
0x2edc   :  { %9404 = dma.done.wait [#allocation3], 32  }
0x2edd   :  { %9405 = vsyncadd [#allocation3], 4294967264 }
0x2ede   :  { %7258 = vsyncpa [#allocation3], 1 }

</bundles_post_ra>
